<compile_context>
chip_gen: v7x
topology: tpu7x:2x2x1
jax: 0.10.0
libtpu: 0.0.40
codegen_flags: <defaults>
</compile_context>

<pallas_src>
import functools

import jax
import jax.numpy as jnp
from jax.experimental import pallas as pl
from jax.experimental.pallas import tpu as pltpu

LN_EPS = 1e-5
LANE = 128
NEG_INF = -1e30


def _round_up(x, m):
    return ((x + m - 1) // m) * m


# -----------------------------------------------------------------------------
# Fully fused forward kernel (single pallas_call, two packed parameter slabs)
# -----------------------------------------------------------------------------
def fused_transformer_kernel(cc_ref, vs_ref, w_ref, v_ref, out_ref, *,
                             wl, vl, n_enc, n_dec, num_heads):
    # --- packed-slab accessors: static offsets -> zero-cost slices -----------
    def W(name):                       # bf16 weight block (rows, cols)
        r, nr, nc = wl[name]
        return w_ref[r:r + nr, :nc]

    def V(name):                       # f32 (1, cols) bias / LayerNorm row
        r, nc = vl[name]
        return v_ref[r:r + 1, :nc]

    def mm(x, wname, bname=None):
        y = jnp.dot(x.astype(jnp.bfloat16), W(wname),
                    preferred_element_type=jnp.float32)
        if bname is not None:
            y = y + V(bname)
        return y

    def layernorm(x, prefix):
        mean = jnp.mean(x, axis=-1, keepdims=True)
        var = jnp.mean((x - mean) ** 2, axis=-1, keepdims=True)
        return ((x - mean) * jax.lax.rsqrt(var + LN_EPS)
                * V(prefix + "_g") + V(prefix + "_b"))

    def attention(q, k, v, prefix, mask):
        """Unbatched MHA across rows.  Output projection folded per-head."""
        e = q.shape[-1]
        dh = e // num_heads
        qb = q.astype(jnp.bfloat16)          # cast whole slabs ONCE
        kb = k.astype(jnp.bfloat16)
        vb = v.astype(jnp.bfloat16)
        wo = W(prefix + "_wo")
        acc = None
        for h in range(num_heads):
            c = h * dh
            s = jax.lax.dot_general(qb[:, c:c + dh], kb[:, c:c + dh],
                                    (((1,), (1,)), ((), ())),
                                    preferred_element_type=jnp.float32)
            if mask is not None:
                s = s + mask                 # block-diagonal stream mask
            s = s - jnp.max(s, axis=-1, keepdims=True)
            p = jnp.exp(s)
            p = p * pl.reciprocal(jnp.sum(p, axis=-1, keepdims=True), approx=True)
            oh = jnp.dot(p.astype(jnp.bfloat16), vb[:, c:c + dh],
                         preferred_element_type=jnp.float32)
            contrib = jnp.dot(oh.astype(jnp.bfloat16), wo[c:c + dh, :],
                              preferred_element_type=jnp.float32)
            acc = contrib if acc is None else acc + contrib   # no zeros init
        return acc + V(prefix + "_bo")

    def self_attn_block(x, prefix, mask):
        e = x.shape[-1]
        qkv = mm(x, prefix + "_wqkv", prefix + "_bqkv")   # one fused (E,3E) matmul
        a = attention(qkv[:, :e], qkv[:, e:2 * e], qkv[:, 2 * e:], prefix, mask)
        return layernorm(x + a, prefix)                   # dropout = identity (eval)

    def cross_attn_block(x, y, prefix):
        e = x.shape[-1]
        q = mm(x, prefix + "_wq", prefix + "_bq")
        kv = mm(y, prefix + "_wkv", prefix + "_bkv")      # fused K|V matmul
        a = attention(q, kv[:, :e], kv[:, e:], prefix, None)
        return layernorm(x + a, prefix)

    def ffn_block(x, prefix):
        h = jnp.maximum(mm(x, prefix + "_w1", prefix + "_b1"), 0.0)
        y = mm(h, prefix + "_w2", prefix + "_b2")
        return layernorm(x + y, prefix)

    B = vs_ref.shape[0]
    cc_cls = cc_ref[...].astype(jnp.float32)
    vs = vs_ref[...].astype(jnp.float32)

    # 1) input projection of the CC [CLS] token
    cc0 = mm(cc_cls, "lin_w", "lin_b")                    # (B, E)

    # 2) shared encoder over BOTH streams in ONE block-diagonal pass:
    #    rows [0:B] = CC stream, rows [B:2B] = vital-sign stream; streams must
    #    not attend to each other -> additive -1e30 mask on off-diagonal blocks.
    x = jnp.concatenate([cc0, vs], axis=0)                # (2B, E)
    rid = jax.lax.broadcasted_iota(jnp.int32, (2 * B, 2 * B), 0)
    cid = jax.lax.broadcasted_iota(jnp.int32, (2 * B, 2 * B), 1)
    enc_mask = jnp.where((rid >= B) == (cid >= B), 0.0, NEG_INF).astype(jnp.float32)
    for i in range(n_enc):
        x = self_attn_block(x, f"enc{i}_mha", enc_mask)
        x = ffn_block(x, f"enc{i}_ffn")
    enc_cc, enc_vs = x[:B, :], x[B:, :]

    # 3) decoder on cc0 with cross-attention to the CC encoder output
    d = cc0
    for i in range(n_dec):
        d = self_attn_block(d, f"dec{i}_self", None)
        d = cross_attn_block(d, enc_cc, f"dec{i}_cross")
        d = ffn_block(d, f"dec{i}_ffn")

    # 4) fused classifier heads: one (2B,E)x(E,256) matmul, lane-aligned halves
    heads_in = jnp.concatenate([enc_vs, d], axis=0)       # (2B, E)
    logits = mm(heads_in, "head_w", "head_b")             # (2B, 256)
    out_ref[0, :, :] = logits[:B, :LANE]                  # severity (padded)
    out_ref[1, :, :] = logits[B:, LANE:2 * LANE]          # department (padded)


def _full_spec(a):
    nd = a.ndim
    return pl.BlockSpec(a.shape, lambda i, nd=nd: (0,) * nd)


def fused_forward(prepped, cc_cls, vs_feat, *, num_heads, out_s, out_d):
    B, E = vs_feat.shape
    args = (cc_cls, vs_feat, prepped["w_slab"], prepped["v_slab"])

    kern = functools.partial(
        fused_transformer_kernel,
        wl=prepped["w_layout"], vl=prepped["v_layout"],
        n_enc=prepped["n_enc"], n_dec=prepped["n_dec"], num_heads=num_heads)

    in_bytes = sum(int(a.size) * a.dtype.itemsize for a in args)
    out_bytes = 2 * B * LANE * 4
    # VMEM budget derived from the packed footprint (+ headroom) so it stays
    # within the v5e 16 MiB / v6e 32 MiB / v7x default scoped limits.
    vmem_limit = int(min(max(2 * (in_bytes + out_bytes) + (8 << 20), 8 << 20),
                         64 << 20))

    # Advisory cost estimate (flops / transcendentals / bytes) for XLA.
    hpad = prepped["hpad"]
    n_enc, n_dec = prepped["n_enc"], prepped["n_dec"]
    flops = 2 * B * cc_cls.shape[1] * E
    r = 2 * B
    flops += n_enc * (2 * r * E * 3 * E + 4 * r * r * E + 2 * r * E * E
                      + 4 * r * E * hpad)
    r = B
    flops += n_dec * (2 * r * E * 3 * E + 4 * r * r * E + 2 * r * E * E     # self
                      + 2 * r * E * E + 2 * r * E * 2 * E + 4 * r * r * E
                      + 2 * r * E * E                                        # cross
                      + 4 * r * E * hpad)                                    # ffn
    flops += 2 * (2 * B) * E * (2 * LANE)
    transcendentals = (n_enc * num_heads * (2 * B) * (2 * B)
                       + n_dec * num_heads * 2 * B * B)

    out = pl.pallas_call(
        kern,
        out_shape=jax.ShapeDtypeStruct((2, B, LANE), jnp.float32),
        grid=(1,),
        in_specs=[_full_spec(a) for a in args],
        out_specs=pl.BlockSpec((2, B, LANE), lambda i: (0, 0, 0)),
        compiler_params=pltpu.CompilerParams(
            dimension_semantics=("arbitrary",),
            vmem_limit_bytes=vmem_limit,
        ),
        cost_estimate=pl.CostEstimate(
            flops=int(flops),
            transcendentals=int(transcendentals),
            bytes_accessed=int(in_bytes + out_bytes)),
    )(*args)
    return out[0, :, :out_s], out[1, :, :out_d]


# -----------------------------------------------------------------------------
# Parameter init (torch-like uniform fan-in init; weights stored (in, out))
# -----------------------------------------------------------------------------
def _dense(key, fan_in, fan_out):
    kw, kb = jax.random.split(key)
    lim = fan_in ** -0.5
    w = jax.random.uniform(kw, (fan_in, fan_out), jnp.float32, -lim, lim)
    b = jax.random.uniform(kb, (fan_out,), jnp.float32, -lim, lim)
    return {"w": w, "b": b}


def _mha_params(key, e):
    ks = jax.random.split(key, 4)
    q, k, v, o = (_dense(kk, e, e) for kk in ks)
    return {"wq": q["w"], "bq": q["b"], "wk": k["w"], "bk": k["b"],
            "wv": v["w"], "bv": v["b"], "wo": o["w"], "bo": o["b"],
            "gamma": jnp.ones((e,), jnp.float32),
            "beta": jnp.zeros((e,), jnp.float32)}


def _ffn_params(key, e, h):
    k1, k2 = jax.random.split(key)
    d1, d2 = _dense(k1, e, h), _dense(k2, h, e)
    return {"w1": d1["w"], "b1": d1["b"], "w2": d2["w"], "b2": d2["b"],
            "gamma": jnp.ones((e,), jnp.float32),
            "beta": jnp.zeros((e,), jnp.float32)}


def init_transformer_params(key, input_dim, embed_dim, hidden_dim,
                            n_enc, n_dec, out_s, out_d):
    keys = jax.random.split(key, 3 + 2 * n_enc + 3 * n_dec)
    it = iter(keys)
    return {
        "linear_layer": _dense(next(it), input_dim, embed_dim),
        "encoder": [{"mha": _mha_params(next(it), embed_dim),
                     "ffn": _ffn_params(next(it), embed_dim, hidden_dim)}
                    for _ in range(n_enc)],
        "decoder": [{"self_mha": _mha_params(next(it), embed_dim),
                     "cross_mha": _mha_params(next(it), embed_dim),
                     "ffn": _ffn_params(next(it), embed_dim, hidden_dim)}
                    for _ in range(n_dec)],
        "fc_severity": _dense(next(it), embed_dim, out_s),
        "fc_department": _dense(next(it), embed_dim, out_d),
    }


# -----------------------------------------------------------------------------
# Parameter packing: ONE bf16 weight slab + ONE f32 bias/LN slab (2 DMAs total)
# -----------------------------------------------------------------------------
class _SlabBuilder:
    def __init__(self, wmax):
        self.wmax = wmax
        self._w_blocks, self._w_layout, self._w_off = [], {}, 0
        self._v_blocks, self._v_layout, self._v_off = [], {}, 0

    def add_w(self, name, mat):
        mat = jnp.asarray(mat, jnp.float32)
        rows, cols = mat.shape
        alloc = _round_up(rows, 16)     # keep bf16 (16,128) tile-aligned offsets
        blk = jnp.zeros((alloc, self.wmax), jnp.float32).at[:rows, :cols].set(mat)
        self._w_blocks.append(blk)
        self._w_layout[name] = (self._w_off, rows, cols)
        self._w_off += alloc

    def add_v(self, name, vec):
        vec = jnp.asarray(vec, jnp.float32).reshape(-1)
        cols = vec.shape[0]
        blk = jnp.zeros((1, self.wmax), jnp.float32).at[0, :cols].set(vec)
        self._v_blocks.append(blk)
        self._v_layout[name] = (self._v_off, cols)
        self._v_off += 1

    def build(self):
        w = jnp.concatenate(self._w_blocks, axis=0).astype(jnp.bfloat16)
        v = jnp.concatenate(self._v_blocks, axis=0)
        pad = _round_up(v.shape[0], 8) - v.shape[0]
        if pad:
            v = jnp.concatenate([v, jnp.zeros((pad, self.wmax), jnp.float32)], 0)
        return w, v, self._w_layout, self._v_layout


def prepare_kernel_params(params, num_heads, out_s, out_d):
    """Fuse QKV / KV, fold softmax scale into wq/bq, zero-pad FFN hidden and
    classifier columns to lane-dense widths, then pack everything into two
    contiguous slabs with a static layout table."""
    e = params["linear_layer"]["w"].shape[1]
    scale = (e // num_heads) ** -0.5
    if params["encoder"]:
        hidden = params["encoder"][0]["ffn"]["w1"].shape[1]
    else:
        hidden = params["decoder"][0]["ffn"]["w1"].shape[1]
    hpad = _round_up(hidden, LANE)
    wmax = max(3 * e, 2 * e, hpad, e, 2 * LANE)

    sb = _SlabBuilder(wmax)
    sb.add_w("lin_w", params["linear_layer"]["w"])
    sb.add_v("lin_b", params["linear_layer"]["b"])

    def add_self_mha(prefix, p):
        sb.add_w(prefix + "_wqkv",
                 jnp.concatenate([p["wq"] * scale, p["wk"], p["wv"]], axis=1))
        sb.add_v(prefix + "_bqkv",
                 jnp.concatenate([p["bq"] * scale, p["bk"], p["bv"]], axis=0))
        sb.add_w(prefix + "_wo", p["wo"])
        sb.add_v(prefix + "_bo", p["bo"])
        sb.add_v(prefix + "_g", p["gamma"])
        sb.add_v(prefix + "_b", p["beta"])

    def add_cross_mha(prefix, p):
        sb.add_w(prefix + "_wq", p["wq"] * scale)
        sb.add_v(prefix + "_bq", p["bq"] * scale)
        sb.add_w(prefix + "_wkv", jnp.concatenate([p["wk"], p["wv"]], axis=1))
        sb.add_v(prefix + "_bkv", jnp.concatenate([p["bk"], p["bv"]], axis=0))
        sb.add_w(prefix + "_wo", p["wo"])
        sb.add_v(prefix + "_bo", p["bo"])
        sb.add_v(prefix + "_g", p["gamma"])
        sb.add_v(prefix + "_b", p["beta"])

    def add_ffn(prefix, p):
        w1 = jnp.zeros((e, hpad), jnp.float32).at[:, :hidden].set(p["w1"])
        b1 = jnp.zeros((hpad,), jnp.float32).at[:hidden].set(p["b1"])
        w2 = jnp.zeros((hpad, e), jnp.float32).at[:hidden, :].set(p["w2"])
        sb.add_w(prefix + "_w1", w1)
        sb.add_v(prefix + "_b1", b1)
        sb.add_w(prefix + "_w2", w2)
        sb.add_v(prefix + "_b2", p["b2"])
        sb.add_v(prefix + "_g", p["gamma"])
        sb.add_v(prefix + "_b", p["beta"])

    for i, lyr in enumerate(params["encoder"]):
        add_self_mha(f"enc{i}_mha", lyr["mha"])
        add_ffn(f"enc{i}_ffn", lyr["ffn"])
    for i, lyr in enumerate(params["decoder"]):
        add_self_mha(f"dec{i}_self", lyr["self_mha"])
        add_cross_mha(f"dec{i}_cross", lyr["cross_mha"])
        add_ffn(f"dec{i}_ffn", lyr["ffn"])

    # fused classifier heads: severity -> lanes [0:128), department -> [128:256)
    assert out_s <= LANE and out_d <= LANE
    hw = jnp.zeros((e, 2 * LANE), jnp.float32)
    hw = hw.at[:, :out_s].set(params["fc_severity"]["w"])
    hw = hw.at[:, LANE:LANE + out_d].set(params["fc_department"]["w"])
    hb = jnp.zeros((2 * LANE,), jnp.float32)
    hb = hb.at[:out_s].set(params["fc_severity"]["b"])
    hb = hb.at[LANE:LANE + out_d].set(params["fc_department"]["b"])
    sb.add_w("head_w", hw)
    sb.add_v("head_b", hb)

    w_slab, v_slab, wl, vl = sb.build()
    return {"w_slab": w_slab, "v_slab": v_slab,
            "w_layout": wl, "v_layout": vl,
            "n_enc": len(params["encoder"]), "n_dec": len(params["decoder"]),
            "hpad": hpad}


# -----------------------------------------------------------------------------
# Host-side glue (loss / metrics in plain JAX)
# -----------------------------------------------------------------------------
def cross_entropy(logits, labels):
    lse = jax.nn.logsumexp(logits, axis=-1)
    picked = jnp.take_along_axis(logits, labels[:, None], axis=-1)[:, 0]
    return jnp.mean(lse - picked)


def transformer_forward(prepped, vs_feat, batch, *, num_heads, out_s, out_d):
    ret = {}
    label1, label2 = batch["Level"], batch["Dept_digit"]
    cc_cls = batch["CC_tokens"][:, 0, :]          # (B, input_dim); .squeeze() no-op

    severity_out, department_out = fused_forward(
        prepped, cc_cls, vs_feat,
        num_heads=num_heads, out_s=out_s, out_d=out_d)

    loss_s = cross_entropy(severity_out, label1)
    loss_d = cross_entropy(department_out, label2)
    ret["cel_loss"] = loss_s + loss_d
    ret["severity_out"] = severity_out
    ret["department_out"] = department_out
    ret["correct_s"] = jnp.sum(jnp.argmax(severity_out, axis=1) == label1)
    ret["correct_d"] = jnp.sum(jnp.argmax(department_out, axis=1) == label2)
    return ret, severity_out, department_out


# -----------------------------------------------------------------------------
# Main
# -----------------------------------------------------------------------------
if __name__ == "__main__":
    B = 8             # rows (PyTorch batch; attention mixes across it — unbatched MHA)
    T = 4             # number of CC tokens
    INPUT_DIM = 32    # CC token feature dim (stand-in for 768)
    EMBED_DIM = 128   # embed_dim == embed_dim2 (CMF=False)
    NUM_HEADS = 4
    HIDDEN_DIM = 64   # padded to 128 lanes inside prepare_kernel_params
    N_ENC, N_DEC = 1, 1
    OUT_S, OUT_D = 4, 6

    root = jax.random.PRNGKey(0)
    kp, kvs, kcc, kl1, kl2 = jax.random.split(root, 5)

    params = init_transformer_params(kp, INPUT_DIM, EMBED_DIM, HIDDEN_DIM,
                                     N_ENC, N_DEC, OUT_S, OUT_D)
    prepped = prepare_kernel_params(params, NUM_HEADS, OUT_S, OUT_D)

    vs_feat = jax.random.normal(kvs, (B, EMBED_DIM), jnp.float32)
    batch = {
        "CC_tokens": jax.random.normal(kcc, (B, T, INPUT_DIM), jnp.float32),
        "Level": jax.random.randint(kl1, (B,), 0, OUT_S),
        "Dept_digit": jax.random.randint(kl2, (B,), 0, OUT_D),
    }

    ret, severity_out, department_out = transformer_forward(
        prepped, vs_feat, batch,
        num_heads=NUM_HEADS, out_s=OUT_S, out_d=OUT_D)

    jax.block_until_ready((ret["cel_loss"], severity_out, department_out))
    assert severity_out.shape == (B, OUT_S)
    assert department_out.shape == (B, OUT_D)
    assert bool(jnp.isfinite(ret["cel_loss"]))
    assert bool(jnp.all(jnp.isfinite(severity_out)))
    assert bool(jnp.all(jnp.isfinite(department_out)))
    print("KERNEL_OK")
</pallas_src>

<mosaic_0001>
module attributes {stable_mosaic.version = 11 : i64} {
  func.func @fused_transformer_kernel(%arg0: i32, %arg1: memref<8x32xf32, #tpu.memory_space<vmem>>, %arg2: memref<8x128xf32, #tpu.memory_space<vmem>>, %arg3: memref<1568x384xbf16, #tpu.memory_space<vmem>>, %arg4: memref<24x384xf32, #tpu.memory_space<vmem>>, %arg5: memref<2x8x128xf32, #tpu.memory_space<vmem>>) attributes {dimension_semantics = [#tpu.dimension_semantics<arbitrary>], iteration_bounds = array<i64: 1>, scalar_prefetch = 0 : i64, scratch_operands = 0 : i64, tpu.core_type = #tpu.core_type<tc>, window_params = [{pipeline_mode = #tpu.pipeline_mode<synchronous>, transform_indices = @transform_0, window_bounds = array<i64: 8, 32>}, {pipeline_mode = #tpu.pipeline_mode<synchronous>, transform_indices = @transform_1, window_bounds = array<i64: 8, 128>}, {pipeline_mode = #tpu.pipeline_mode<synchronous>, transform_indices = @transform_2, window_bounds = array<i64: 1568, 384>}, {pipeline_mode = #tpu.pipeline_mode<synchronous>, transform_indices = @transform_3, window_bounds = array<i64: 24, 384>}, {pipeline_mode = #tpu.pipeline_mode<synchronous>, transform_indices = @transform_4, window_bounds = array<i64: 2, 8, 128>}]} {
    %c0 = arith.constant 0 : index
    %c0_0 = arith.constant 0 : index
    %0 = vector.load %arg1[%c0, %c0_0] : memref<8x32xf32, #tpu.memory_space<vmem>>, vector<8x32xf32>
    %c0_1 = arith.constant 0 : index
    %c0_2 = arith.constant 0 : index
    %1 = vector.load %arg2[%c0_1, %c0_2] : memref<8x128xf32, #tpu.memory_space<vmem>>, vector<8x128xf32>
    %2 = arith.truncf %0 : vector<8x32xf32> to vector<8x32xbf16>
    %c0_3 = arith.constant 0 : index
    %c0_4 = arith.constant 0 : index
    %3 = vector.load %arg3[%c0_3, %c0_4] : memref<1568x384xbf16, #tpu.memory_space<vmem>>, vector<32x128xbf16>
    %cst = arith.constant dense<0.000000e+00> : vector<8x128xf32>
    %4 = tpu.matmul %2, %3, %cst {dimension_numbers = #tpu.dot_dimension_numbers<[1], [0], [0], [1], [0, 0, 1, 1], [], []>} : vector<8x32xbf16>, vector<32x128xbf16>, vector<8x128xf32> -> vector<8x128xf32>
    %c0_5 = arith.constant 0 : index
    %c0_6 = arith.constant 0 : index
    %5 = vector.load %arg4[%c0_5, %c0_6] : memref<24x384xf32, #tpu.memory_space<vmem>>, vector<1x128xf32>
    %6 = vector.broadcast %5 : vector<1x128xf32> to vector<8x128xf32>
    %7 = arith.addf %4, %6 : vector<8x128xf32>
    %8 = tpu.concatenate %7, %1 in 0 : vector<8x128xf32>, vector<8x128xf32> -> vector<16x128xf32>
    %9 = tpu.iota {dimensions = array<i32: 0>} : vector<16x16xi32>
    %10 = tpu.iota {dimensions = array<i32: 1>} : vector<16x16xi32>
    %c8_i32 = arith.constant 8 : i32
    %11 = vector.broadcast %c8_i32 : i32 to vector<16x16xi32>
    %12 = arith.cmpi sge, %9, %11 : vector<16x16xi32>
    %c8_i32_7 = arith.constant 8 : i32
    %13 = vector.broadcast %c8_i32_7 : i32 to vector<16x16xi32>
    %14 = arith.cmpi sge, %10, %13 : vector<16x16xi32>
    %15 = arith.xori %12, %14 : vector<16x16xi1>
    %cst_8 = arith.constant dense<true> : vector<16x16xi1>
    %16 = arith.xori %15, %cst_8 : vector<16x16xi1>
    %cst_9 = arith.constant 0.000000e+00 : f32
    %cst_10 = arith.constant -1.000000e+30 : f32
    %17 = vector.broadcast %cst_9 : f32 to vector<16x16xf32>
    %18 = vector.broadcast %cst_10 : f32 to vector<16x16xf32>
    %19 = arith.select %16, %17, %18 : vector<16x16xi1>, vector<16x16xf32>
    %20 = arith.truncf %8 : vector<16x128xf32> to vector<16x128xbf16>
    %c32 = arith.constant 32 : index
    %c0_11 = arith.constant 0 : index
    %21 = vector.load %arg3[%c32, %c0_11] : memref<1568x384xbf16, #tpu.memory_space<vmem>>, vector<128x384xbf16>
    %cst_12 = arith.constant dense<0.000000e+00> : vector<16x384xf32>
    %22 = tpu.matmul %20, %21, %cst_12 {dimension_numbers = #tpu.dot_dimension_numbers<[1], [0], [0], [1], [0, 0, 1, 1], [], []>} : vector<16x128xbf16>, vector<128x384xbf16>, vector<16x384xf32> -> vector<16x384xf32>
    %c1 = arith.constant 1 : index
    %c0_13 = arith.constant 0 : index
    %23 = vector.load %arg4[%c1, %c0_13] : memref<24x384xf32, #tpu.memory_space<vmem>>, vector<1x384xf32>
    %24 = vector.broadcast %23 : vector<1x384xf32> to vector<16x384xf32>
    %25 = arith.addf %22, %24 : vector<16x384xf32>
    %26 = vector.extract_strided_slice %25 {offsets = [0, 0], sizes = [16, 128], strides = [1, 1]} : vector<16x384xf32> to vector<16x128xf32>
    %27 = vector.extract_strided_slice %25 {offsets = [0, 128], sizes = [16, 128], strides = [1, 1]} : vector<16x384xf32> to vector<16x128xf32>
    %28 = vector.extract_strided_slice %25 {offsets = [0, 256], sizes = [16, 128], strides = [1, 1]} : vector<16x384xf32> to vector<16x128xf32>
    %29 = arith.truncf %26 : vector<16x128xf32> to vector<16x128xbf16>
    %30 = arith.truncf %27 : vector<16x128xf32> to vector<16x128xbf16>
    %31 = arith.truncf %28 : vector<16x128xf32> to vector<16x128xbf16>
    %c160 = arith.constant 160 : index
    %c0_14 = arith.constant 0 : index
    %32 = vector.load %arg3[%c160, %c0_14] : memref<1568x384xbf16, #tpu.memory_space<vmem>>, vector<128x128xbf16>
    %33 = vector.extract_strided_slice %29 {offsets = [0, 0], sizes = [16, 32], strides = [1, 1]} : vector<16x128xbf16> to vector<16x32xbf16>
    %34 = vector.extract_strided_slice %30 {offsets = [0, 0], sizes = [16, 32], strides = [1, 1]} : vector<16x128xbf16> to vector<16x32xbf16>
    %cst_15 = arith.constant dense<0.000000e+00> : vector<16x16xf32>
    %35 = tpu.matmul %33, %34, %cst_15 {dimension_numbers = #tpu.dot_dimension_numbers<[1], [1], [0], [0], [0, 0, 1, 0], [], []>} : vector<16x32xbf16>, vector<16x32xbf16>, vector<16x16xf32> -> vector<16x16xf32>
    %36 = arith.addf %35, %19 : vector<16x16xf32>
    %cst_16 = arith.constant dense<0xFF800000> : vector<16xf32>
    %37 = vector.multi_reduction <maximumf>, %36, %cst_16 [1] : vector<16x16xf32> to vector<16xf32>
    %38 = vector.shape_cast %37 : vector<16xf32> to vector<16x1xf32>
    %39 = vector.broadcast %38 : vector<16x1xf32> to vector<16x16xf32>
    %40 = arith.subf %36, %39 : vector<16x16xf32>
    %41 = math.exp %40 : vector<16x16xf32>
    %cst_17 = arith.constant dense<0.000000e+00> : vector<16xf32>
    %42 = vector.multi_reduction <add>, %41, %cst_17 [1] : vector<16x16xf32> to vector<16xf32>
    %43 = vector.shape_cast %42 : vector<16xf32> to vector<16x1xf32>
    %44 = tpu.reciprocal %43 {approx = true} : vector<16x1xf32> -> vector<16x1xf32>
    %45 = vector.broadcast %44 : vector<16x1xf32> to vector<16x16xf32>
    %46 = arith.mulf %41, %45 : vector<16x16xf32>
    %47 = arith.truncf %46 : vector<16x16xf32> to vector<16x16xbf16>
    %48 = vector.extract_strided_slice %31 {offsets = [0, 0], sizes = [16, 32], strides = [1, 1]} : vector<16x128xbf16> to vector<16x32xbf16>
    %cst_18 = arith.constant dense<0.000000e+00> : vector<16x32xf32>
    %49 = tpu.matmul %47, %48, %cst_18 {dimension_numbers = #tpu.dot_dimension_numbers<[1], [0], [0], [1], [0, 0, 1, 1], [], []>} : vector<16x16xbf16>, vector<16x32xbf16>, vector<16x32xf32> -> vector<16x32xf32>
    %50 = arith.truncf %49 : vector<16x32xf32> to vector<16x32xbf16>
    %51 = vector.extract_strided_slice %32 {offsets = [0, 0], sizes = [32, 128], strides = [1, 1]} : vector<128x128xbf16> to vector<32x128xbf16>
    %cst_19 = arith.constant dense<0.000000e+00> : vector<16x128xf32>
    %52 = tpu.matmul %50, %51, %cst_19 {dimension_numbers = #tpu.dot_dimension_numbers<[1], [0], [0], [1], [0, 0, 1, 1], [], []>} : vector<16x32xbf16>, vector<32x128xbf16>, vector<16x128xf32> -> vector<16x128xf32>
    %53 = vector.extract_strided_slice %29 {offsets = [0, 32], sizes = [16, 32], strides = [1, 1]} : vector<16x128xbf16> to vector<16x32xbf16>
    %54 = vector.extract_strided_slice %30 {offsets = [0, 32], sizes = [16, 32], strides = [1, 1]} : vector<16x128xbf16> to vector<16x32xbf16>
    %cst_20 = arith.constant dense<0.000000e+00> : vector<16x16xf32>
    %55 = tpu.matmul %53, %54, %cst_20 {dimension_numbers = #tpu.dot_dimension_numbers<[1], [1], [0], [0], [0, 0, 1, 0], [], []>} : vector<16x32xbf16>, vector<16x32xbf16>, vector<16x16xf32> -> vector<16x16xf32>
    %56 = arith.addf %55, %19 : vector<16x16xf32>
    %cst_21 = arith.constant dense<0xFF800000> : vector<16xf32>
    %57 = vector.multi_reduction <maximumf>, %56, %cst_21 [1] : vector<16x16xf32> to vector<16xf32>
    %58 = vector.shape_cast %57 : vector<16xf32> to vector<16x1xf32>
    %59 = vector.broadcast %58 : vector<16x1xf32> to vector<16x16xf32>
    %60 = arith.subf %56, %59 : vector<16x16xf32>
    %61 = math.exp %60 : vector<16x16xf32>
    %cst_22 = arith.constant dense<0.000000e+00> : vector<16xf32>
    %62 = vector.multi_reduction <add>, %61, %cst_22 [1] : vector<16x16xf32> to vector<16xf32>
    %63 = vector.shape_cast %62 : vector<16xf32> to vector<16x1xf32>
    %64 = tpu.reciprocal %63 {approx = true} : vector<16x1xf32> -> vector<16x1xf32>
    %65 = vector.broadcast %64 : vector<16x1xf32> to vector<16x16xf32>
    %66 = arith.mulf %61, %65 : vector<16x16xf32>
    %67 = arith.truncf %66 : vector<16x16xf32> to vector<16x16xbf16>
    %68 = vector.extract_strided_slice %31 {offsets = [0, 32], sizes = [16, 32], strides = [1, 1]} : vector<16x128xbf16> to vector<16x32xbf16>
    %cst_23 = arith.constant dense<0.000000e+00> : vector<16x32xf32>
    %69 = tpu.matmul %67, %68, %cst_23 {dimension_numbers = #tpu.dot_dimension_numbers<[1], [0], [0], [1], [0, 0, 1, 1], [], []>} : vector<16x16xbf16>, vector<16x32xbf16>, vector<16x32xf32> -> vector<16x32xf32>
    %70 = arith.truncf %69 : vector<16x32xf32> to vector<16x32xbf16>
    %71 = vector.extract_strided_slice %32 {offsets = [32, 0], sizes = [32, 128], strides = [1, 1]} : vector<128x128xbf16> to vector<32x128xbf16>
    %cst_24 = arith.constant dense<0.000000e+00> : vector<16x128xf32>
    %72 = tpu.matmul %70, %71, %cst_24 {dimension_numbers = #tpu.dot_dimension_numbers<[1], [0], [0], [1], [0, 0, 1, 1], [], []>} : vector<16x32xbf16>, vector<32x128xbf16>, vector<16x128xf32> -> vector<16x128xf32>
    %73 = arith.addf %52, %72 : vector<16x128xf32>
    %74 = vector.extract_strided_slice %29 {offsets = [0, 64], sizes = [16, 32], strides = [1, 1]} : vector<16x128xbf16> to vector<16x32xbf16>
    %75 = vector.extract_strided_slice %30 {offsets = [0, 64], sizes = [16, 32], strides = [1, 1]} : vector<16x128xbf16> to vector<16x32xbf16>
    %cst_25 = arith.constant dense<0.000000e+00> : vector<16x16xf32>
    %76 = tpu.matmul %74, %75, %cst_25 {dimension_numbers = #tpu.dot_dimension_numbers<[1], [1], [0], [0], [0, 0, 1, 0], [], []>} : vector<16x32xbf16>, vector<16x32xbf16>, vector<16x16xf32> -> vector<16x16xf32>
    %77 = arith.addf %76, %19 : vector<16x16xf32>
    %cst_26 = arith.constant dense<0xFF800000> : vector<16xf32>
    %78 = vector.multi_reduction <maximumf>, %77, %cst_26 [1] : vector<16x16xf32> to vector<16xf32>
    %79 = vector.shape_cast %78 : vector<16xf32> to vector<16x1xf32>
    %80 = vector.broadcast %79 : vector<16x1xf32> to vector<16x16xf32>
    %81 = arith.subf %77, %80 : vector<16x16xf32>
    %82 = math.exp %81 : vector<16x16xf32>
    %cst_27 = arith.constant dense<0.000000e+00> : vector<16xf32>
    %83 = vector.multi_reduction <add>, %82, %cst_27 [1] : vector<16x16xf32> to vector<16xf32>
    %84 = vector.shape_cast %83 : vector<16xf32> to vector<16x1xf32>
    %85 = tpu.reciprocal %84 {approx = true} : vector<16x1xf32> -> vector<16x1xf32>
    %86 = vector.broadcast %85 : vector<16x1xf32> to vector<16x16xf32>
    %87 = arith.mulf %82, %86 : vector<16x16xf32>
    %88 = arith.truncf %87 : vector<16x16xf32> to vector<16x16xbf16>
    %89 = vector.extract_strided_slice %31 {offsets = [0, 64], sizes = [16, 32], strides = [1, 1]} : vector<16x128xbf16> to vector<16x32xbf16>
    %cst_28 = arith.constant dense<0.000000e+00> : vector<16x32xf32>
    %90 = tpu.matmul %88, %89, %cst_28 {dimension_numbers = #tpu.dot_dimension_numbers<[1], [0], [0], [1], [0, 0, 1, 1], [], []>} : vector<16x16xbf16>, vector<16x32xbf16>, vector<16x32xf32> -> vector<16x32xf32>
    %91 = arith.truncf %90 : vector<16x32xf32> to vector<16x32xbf16>
    %92 = vector.extract_strided_slice %32 {offsets = [64, 0], sizes = [32, 128], strides = [1, 1]} : vector<128x128xbf16> to vector<32x128xbf16>
    %cst_29 = arith.constant dense<0.000000e+00> : vector<16x128xf32>
    %93 = tpu.matmul %91, %92, %cst_29 {dimension_numbers = #tpu.dot_dimension_numbers<[1], [0], [0], [1], [0, 0, 1, 1], [], []>} : vector<16x32xbf16>, vector<32x128xbf16>, vector<16x128xf32> -> vector<16x128xf32>
    %94 = arith.addf %73, %93 : vector<16x128xf32>
    %95 = vector.extract_strided_slice %29 {offsets = [0, 96], sizes = [16, 32], strides = [1, 1]} : vector<16x128xbf16> to vector<16x32xbf16>
    %96 = vector.extract_strided_slice %30 {offsets = [0, 96], sizes = [16, 32], strides = [1, 1]} : vector<16x128xbf16> to vector<16x32xbf16>
    %cst_30 = arith.constant dense<0.000000e+00> : vector<16x16xf32>
    %97 = tpu.matmul %95, %96, %cst_30 {dimension_numbers = #tpu.dot_dimension_numbers<[1], [1], [0], [0], [0, 0, 1, 0], [], []>} : vector<16x32xbf16>, vector<16x32xbf16>, vector<16x16xf32> -> vector<16x16xf32>
    %98 = arith.addf %97, %19 : vector<16x16xf32>
    %cst_31 = arith.constant dense<0xFF800000> : vector<16xf32>
    %99 = vector.multi_reduction <maximumf>, %98, %cst_31 [1] : vector<16x16xf32> to vector<16xf32>
    %100 = vector.shape_cast %99 : vector<16xf32> to vector<16x1xf32>
    %101 = vector.broadcast %100 : vector<16x1xf32> to vector<16x16xf32>
    %102 = arith.subf %98, %101 : vector<16x16xf32>
    %103 = math.exp %102 : vector<16x16xf32>
    %cst_32 = arith.constant dense<0.000000e+00> : vector<16xf32>
    %104 = vector.multi_reduction <add>, %103, %cst_32 [1] : vector<16x16xf32> to vector<16xf32>
    %105 = vector.shape_cast %104 : vector<16xf32> to vector<16x1xf32>
    %106 = tpu.reciprocal %105 {approx = true} : vector<16x1xf32> -> vector<16x1xf32>
    %107 = vector.broadcast %106 : vector<16x1xf32> to vector<16x16xf32>
    %108 = arith.mulf %103, %107 : vector<16x16xf32>
    %109 = arith.truncf %108 : vector<16x16xf32> to vector<16x16xbf16>
    %110 = vector.extract_strided_slice %31 {offsets = [0, 96], sizes = [16, 32], strides = [1, 1]} : vector<16x128xbf16> to vector<16x32xbf16>
    %cst_33 = arith.constant dense<0.000000e+00> : vector<16x32xf32>
    %111 = tpu.matmul %109, %110, %cst_33 {dimension_numbers = #tpu.dot_dimension_numbers<[1], [0], [0], [1], [0, 0, 1, 1], [], []>} : vector<16x16xbf16>, vector<16x32xbf16>, vector<16x32xf32> -> vector<16x32xf32>
    %112 = arith.truncf %111 : vector<16x32xf32> to vector<16x32xbf16>
    %113 = vector.extract_strided_slice %32 {offsets = [96, 0], sizes = [32, 128], strides = [1, 1]} : vector<128x128xbf16> to vector<32x128xbf16>
    %cst_34 = arith.constant dense<0.000000e+00> : vector<16x128xf32>
    %114 = tpu.matmul %112, %113, %cst_34 {dimension_numbers = #tpu.dot_dimension_numbers<[1], [0], [0], [1], [0, 0, 1, 1], [], []>} : vector<16x32xbf16>, vector<32x128xbf16>, vector<16x128xf32> -> vector<16x128xf32>
    %115 = arith.addf %94, %114 : vector<16x128xf32>
    %c2 = arith.constant 2 : index
    %c0_35 = arith.constant 0 : index
    %116 = vector.load %arg4[%c2, %c0_35] : memref<24x384xf32, #tpu.memory_space<vmem>>, vector<1x128xf32>
    %117 = vector.broadcast %116 : vector<1x128xf32> to vector<16x128xf32>
    %118 = arith.addf %115, %117 : vector<16x128xf32>
    %119 = arith.addf %8, %118 : vector<16x128xf32>
    %cst_36 = arith.constant dense<0.000000e+00> : vector<16xf32>
    %120 = vector.multi_reduction <add>, %119, %cst_36 [1] : vector<16x128xf32> to vector<16xf32>
    %121 = vector.shape_cast %120 : vector<16xf32> to vector<16x1xf32>
    %cst_37 = arith.constant 1.280000e+02 : f32
    %122 = vector.broadcast %cst_37 : f32 to vector<16x1xf32>
    %123 = arith.divf %121, %122 : vector<16x1xf32>
    %124 = vector.broadcast %123 : vector<16x1xf32> to vector<16x128xf32>
    %125 = arith.subf %119, %124 : vector<16x128xf32>
    %126 = arith.mulf %125, %125 : vector<16x128xf32>
    %cst_38 = arith.constant dense<0.000000e+00> : vector<16xf32>
    %127 = vector.multi_reduction <add>, %126, %cst_38 [1] : vector<16x128xf32> to vector<16xf32>
    %128 = vector.shape_cast %127 : vector<16xf32> to vector<16x1xf32>
    %cst_39 = arith.constant 1.280000e+02 : f32
    %129 = vector.broadcast %cst_39 : f32 to vector<16x1xf32>
    %130 = arith.divf %128, %129 : vector<16x1xf32>
    %131 = vector.broadcast %123 : vector<16x1xf32> to vector<16x128xf32>
    %132 = arith.subf %119, %131 : vector<16x128xf32>
    %cst_40 = arith.constant 9.99999974E-6 : f32
    %133 = vector.broadcast %cst_40 : f32 to vector<16x1xf32>
    %134 = arith.addf %130, %133 : vector<16x1xf32>
    %135 = math.rsqrt %134 : vector<16x1xf32>
    %136 = vector.broadcast %135 : vector<16x1xf32> to vector<16x128xf32>
    %137 = arith.mulf %132, %136 : vector<16x128xf32>
    %c3 = arith.constant 3 : index
    %c0_41 = arith.constant 0 : index
    %138 = vector.load %arg4[%c3, %c0_41] : memref<24x384xf32, #tpu.memory_space<vmem>>, vector<1x128xf32>
    %139 = vector.broadcast %138 : vector<1x128xf32> to vector<16x128xf32>
    %140 = arith.mulf %137, %139 : vector<16x128xf32>
    %c4 = arith.constant 4 : index
    %c0_42 = arith.constant 0 : index
    %141 = vector.load %arg4[%c4, %c0_42] : memref<24x384xf32, #tpu.memory_space<vmem>>, vector<1x128xf32>
    %142 = vector.broadcast %141 : vector<1x128xf32> to vector<16x128xf32>
    %143 = arith.addf %140, %142 : vector<16x128xf32>
    %144 = arith.truncf %143 : vector<16x128xf32> to vector<16x128xbf16>
    %c288 = arith.constant 288 : index
    %c0_43 = arith.constant 0 : index
    %145 = vector.load %arg3[%c288, %c0_43] : memref<1568x384xbf16, #tpu.memory_space<vmem>>, vector<128x128xbf16>
    %cst_44 = arith.constant dense<0.000000e+00> : vector<16x128xf32>
    %146 = tpu.matmul %144, %145, %cst_44 {dimension_numbers = #tpu.dot_dimension_numbers<[1], [0], [0], [1], [0, 0, 1, 1], [], []>} : vector<16x128xbf16>, vector<128x128xbf16>, vector<16x128xf32> -> vector<16x128xf32>
    %c5 = arith.constant 5 : index
    %c0_45 = arith.constant 0 : index
    %147 = vector.load %arg4[%c5, %c0_45] : memref<24x384xf32, #tpu.memory_space<vmem>>, vector<1x128xf32>
    %148 = vector.broadcast %147 : vector<1x128xf32> to vector<16x128xf32>
    %149 = arith.addf %146, %148 : vector<16x128xf32>
    %cst_46 = arith.constant 0.000000e+00 : f32
    %150 = vector.broadcast %cst_46 : f32 to vector<16x128xf32>
    %151 = arith.maximumf %149, %150 : vector<16x128xf32>
    %152 = arith.truncf %151 : vector<16x128xf32> to vector<16x128xbf16>
    %c416 = arith.constant 416 : index
    %c0_47 = arith.constant 0 : index
    %153 = vector.load %arg3[%c416, %c0_47] : memref<1568x384xbf16, #tpu.memory_space<vmem>>, vector<128x128xbf16>
    %cst_48 = arith.constant dense<0.000000e+00> : vector<16x128xf32>
    %154 = tpu.matmul %152, %153, %cst_48 {dimension_numbers = #tpu.dot_dimension_numbers<[1], [0], [0], [1], [0, 0, 1, 1], [], []>} : vector<16x128xbf16>, vector<128x128xbf16>, vector<16x128xf32> -> vector<16x128xf32>
    %c6 = arith.constant 6 : index
    %c0_49 = arith.constant 0 : index
    %155 = vector.load %arg4[%c6, %c0_49] : memref<24x384xf32, #tpu.memory_space<vmem>>, vector<1x128xf32>
    %156 = vector.broadcast %155 : vector<1x128xf32> to vector<16x128xf32>
    %157 = arith.addf %154, %156 : vector<16x128xf32>
    %158 = arith.addf %143, %157 : vector<16x128xf32>
    %cst_50 = arith.constant dense<0.000000e+00> : vector<16xf32>
    %159 = vector.multi_reduction <add>, %158, %cst_50 [1] : vector<16x128xf32> to vector<16xf32>
    %160 = vector.shape_cast %159 : vector<16xf32> to vector<16x1xf32>
    %cst_51 = arith.constant 1.280000e+02 : f32
    %161 = vector.broadcast %cst_51 : f32 to vector<16x1xf32>
    %162 = arith.divf %160, %161 : vector<16x1xf32>
    %163 = vector.broadcast %162 : vector<16x1xf32> to vector<16x128xf32>
    %164 = arith.subf %158, %163 : vector<16x128xf32>
    %165 = arith.mulf %164, %164 : vector<16x128xf32>
    %cst_52 = arith.constant dense<0.000000e+00> : vector<16xf32>
    %166 = vector.multi_reduction <add>, %165, %cst_52 [1] : vector<16x128xf32> to vector<16xf32>
    %167 = vector.shape_cast %166 : vector<16xf32> to vector<16x1xf32>
    %cst_53 = arith.constant 1.280000e+02 : f32
    %168 = vector.broadcast %cst_53 : f32 to vector<16x1xf32>
    %169 = arith.divf %167, %168 : vector<16x1xf32>
    %170 = vector.broadcast %162 : vector<16x1xf32> to vector<16x128xf32>
    %171 = arith.subf %158, %170 : vector<16x128xf32>
    %cst_54 = arith.constant 9.99999974E-6 : f32
    %172 = vector.broadcast %cst_54 : f32 to vector<16x1xf32>
    %173 = arith.addf %169, %172 : vector<16x1xf32>
    %174 = math.rsqrt %173 : vector<16x1xf32>
    %175 = vector.broadcast %174 : vector<16x1xf32> to vector<16x128xf32>
    %176 = arith.mulf %171, %175 : vector<16x128xf32>
    %c7 = arith.constant 7 : index
    %c0_55 = arith.constant 0 : index
    %177 = vector.load %arg4[%c7, %c0_55] : memref<24x384xf32, #tpu.memory_space<vmem>>, vector<1x128xf32>
    %178 = vector.broadcast %177 : vector<1x128xf32> to vector<16x128xf32>
    %179 = arith.mulf %176, %178 : vector<16x128xf32>
    %c8 = arith.constant 8 : index
    %c0_56 = arith.constant 0 : index
    %180 = vector.load %arg4[%c8, %c0_56] : memref<24x384xf32, #tpu.memory_space<vmem>>, vector<1x128xf32>
    %181 = vector.broadcast %180 : vector<1x128xf32> to vector<16x128xf32>
    %182 = arith.addf %179, %181 : vector<16x128xf32>
    %183 = vector.extract_strided_slice %182 {offsets = [0, 0], sizes = [8, 128], strides = [1, 1]} : vector<16x128xf32> to vector<8x128xf32>
    %184 = vector.extract_strided_slice %182 {offsets = [8, 0], sizes = [8, 128], strides = [1, 1]} : vector<16x128xf32> to vector<8x128xf32>
    %185 = arith.truncf %7 : vector<8x128xf32> to vector<8x128xbf16>
    %c544 = arith.constant 544 : index
    %c0_57 = arith.constant 0 : index
    %186 = vector.load %arg3[%c544, %c0_57] : memref<1568x384xbf16, #tpu.memory_space<vmem>>, vector<128x384xbf16>
    %cst_58 = arith.constant dense<0.000000e+00> : vector<8x384xf32>
    %187 = tpu.matmul %185, %186, %cst_58 {dimension_numbers = #tpu.dot_dimension_numbers<[1], [0], [0], [1], [0, 0, 1, 1], [], []>} : vector<8x128xbf16>, vector<128x384xbf16>, vector<8x384xf32> -> vector<8x384xf32>
    %c9 = arith.constant 9 : index
    %c0_59 = arith.constant 0 : index
    %188 = vector.load %arg4[%c9, %c0_59] : memref<24x384xf32, #tpu.memory_space<vmem>>, vector<1x384xf32>
    %189 = vector.broadcast %188 : vector<1x384xf32> to vector<8x384xf32>
    %190 = arith.addf %187, %189 : vector<8x384xf32>
    %191 = vector.extract_strided_slice %190 {offsets = [0, 0], sizes = [8, 128], strides = [1, 1]} : vector<8x384xf32> to vector<8x128xf32>
    %192 = vector.extract_strided_slice %190 {offsets = [0, 128], sizes = [8, 128], strides = [1, 1]} : vector<8x384xf32> to vector<8x128xf32>
    %193 = vector.extract_strided_slice %190 {offsets = [0, 256], sizes = [8, 128], strides = [1, 1]} : vector<8x384xf32> to vector<8x128xf32>
    %194 = arith.truncf %191 : vector<8x128xf32> to vector<8x128xbf16>
    %195 = arith.truncf %192 : vector<8x128xf32> to vector<8x128xbf16>
    %196 = arith.truncf %193 : vector<8x128xf32> to vector<8x128xbf16>
    %c672 = arith.constant 672 : index
    %c0_60 = arith.constant 0 : index
    %197 = vector.load %arg3[%c672, %c0_60] : memref<1568x384xbf16, #tpu.memory_space<vmem>>, vector<128x128xbf16>
    %198 = vector.extract_strided_slice %194 {offsets = [0, 0], sizes = [8, 32], strides = [1, 1]} : vector<8x128xbf16> to vector<8x32xbf16>
    %199 = vector.extract_strided_slice %195 {offsets = [0, 0], sizes = [8, 32], strides = [1, 1]} : vector<8x128xbf16> to vector<8x32xbf16>
    %cst_61 = arith.constant dense<0.000000e+00> : vector<8x8xf32>
    %200 = tpu.matmul %198, %199, %cst_61 {dimension_numbers = #tpu.dot_dimension_numbers<[1], [1], [0], [0], [0, 0, 1, 0], [], []>} : vector<8x32xbf16>, vector<8x32xbf16>, vector<8x8xf32> -> vector<8x8xf32>
    %cst_62 = arith.constant dense<0xFF800000> : vector<8xf32>
    %201 = vector.multi_reduction <maximumf>, %200, %cst_62 [1] : vector<8x8xf32> to vector<8xf32>
    %202 = vector.shape_cast %201 : vector<8xf32> to vector<8x1xf32>
    %203 = vector.broadcast %202 : vector<8x1xf32> to vector<8x8xf32>
    %204 = arith.subf %200, %203 : vector<8x8xf32>
    %205 = math.exp %204 : vector<8x8xf32>
    %cst_63 = arith.constant dense<0.000000e+00> : vector<8xf32>
    %206 = vector.multi_reduction <add>, %205, %cst_63 [1] : vector<8x8xf32> to vector<8xf32>
    %207 = vector.shape_cast %206 : vector<8xf32> to vector<8x1xf32>
    %208 = tpu.reciprocal %207 {approx = true} : vector<8x1xf32> -> vector<8x1xf32>
    %209 = vector.broadcast %208 : vector<8x1xf32> to vector<8x8xf32>
    %210 = arith.mulf %205, %209 : vector<8x8xf32>
    %211 = arith.truncf %210 : vector<8x8xf32> to vector<8x8xbf16>
    %212 = vector.extract_strided_slice %196 {offsets = [0, 0], sizes = [8, 32], strides = [1, 1]} : vector<8x128xbf16> to vector<8x32xbf16>
    %cst_64 = arith.constant dense<0.000000e+00> : vector<8x32xf32>
    %213 = tpu.matmul %211, %212, %cst_64 {dimension_numbers = #tpu.dot_dimension_numbers<[1], [0], [0], [1], [0, 0, 1, 1], [], []>} : vector<8x8xbf16>, vector<8x32xbf16>, vector<8x32xf32> -> vector<8x32xf32>
    %214 = arith.truncf %213 : vector<8x32xf32> to vector<8x32xbf16>
    %215 = vector.extract_strided_slice %197 {offsets = [0, 0], sizes = [32, 128], strides = [1, 1]} : vector<128x128xbf16> to vector<32x128xbf16>
    %cst_65 = arith.constant dense<0.000000e+00> : vector<8x128xf32>
    %216 = tpu.matmul %214, %215, %cst_65 {dimension_numbers = #tpu.dot_dimension_numbers<[1], [0], [0], [1], [0, 0, 1, 1], [], []>} : vector<8x32xbf16>, vector<32x128xbf16>, vector<8x128xf32> -> vector<8x128xf32>
    %217 = vector.extract_strided_slice %194 {offsets = [0, 32], sizes = [8, 32], strides = [1, 1]} : vector<8x128xbf16> to vector<8x32xbf16>
    %218 = vector.extract_strided_slice %195 {offsets = [0, 32], sizes = [8, 32], strides = [1, 1]} : vector<8x128xbf16> to vector<8x32xbf16>
    %cst_66 = arith.constant dense<0.000000e+00> : vector<8x8xf32>
    %219 = tpu.matmul %217, %218, %cst_66 {dimension_numbers = #tpu.dot_dimension_numbers<[1], [1], [0], [0], [0, 0, 1, 0], [], []>} : vector<8x32xbf16>, vector<8x32xbf16>, vector<8x8xf32> -> vector<8x8xf32>
    %cst_67 = arith.constant dense<0xFF800000> : vector<8xf32>
    %220 = vector.multi_reduction <maximumf>, %219, %cst_67 [1] : vector<8x8xf32> to vector<8xf32>
    %221 = vector.shape_cast %220 : vector<8xf32> to vector<8x1xf32>
    %222 = vector.broadcast %221 : vector<8x1xf32> to vector<8x8xf32>
    %223 = arith.subf %219, %222 : vector<8x8xf32>
    %224 = math.exp %223 : vector<8x8xf32>
    %cst_68 = arith.constant dense<0.000000e+00> : vector<8xf32>
    %225 = vector.multi_reduction <add>, %224, %cst_68 [1] : vector<8x8xf32> to vector<8xf32>
    %226 = vector.shape_cast %225 : vector<8xf32> to vector<8x1xf32>
    %227 = tpu.reciprocal %226 {approx = true} : vector<8x1xf32> -> vector<8x1xf32>
    %228 = vector.broadcast %227 : vector<8x1xf32> to vector<8x8xf32>
    %229 = arith.mulf %224, %228 : vector<8x8xf32>
    %230 = arith.truncf %229 : vector<8x8xf32> to vector<8x8xbf16>
    %231 = vector.extract_strided_slice %196 {offsets = [0, 32], sizes = [8, 32], strides = [1, 1]} : vector<8x128xbf16> to vector<8x32xbf16>
    %cst_69 = arith.constant dense<0.000000e+00> : vector<8x32xf32>
    %232 = tpu.matmul %230, %231, %cst_69 {dimension_numbers = #tpu.dot_dimension_numbers<[1], [0], [0], [1], [0, 0, 1, 1], [], []>} : vector<8x8xbf16>, vector<8x32xbf16>, vector<8x32xf32> -> vector<8x32xf32>
    %233 = arith.truncf %232 : vector<8x32xf32> to vector<8x32xbf16>
    %234 = vector.extract_strided_slice %197 {offsets = [32, 0], sizes = [32, 128], strides = [1, 1]} : vector<128x128xbf16> to vector<32x128xbf16>
    %cst_70 = arith.constant dense<0.000000e+00> : vector<8x128xf32>
    %235 = tpu.matmul %233, %234, %cst_70 {dimension_numbers = #tpu.dot_dimension_numbers<[1], [0], [0], [1], [0, 0, 1, 1], [], []>} : vector<8x32xbf16>, vector<32x128xbf16>, vector<8x128xf32> -> vector<8x128xf32>
    %236 = arith.addf %216, %235 : vector<8x128xf32>
    %237 = vector.extract_strided_slice %194 {offsets = [0, 64], sizes = [8, 32], strides = [1, 1]} : vector<8x128xbf16> to vector<8x32xbf16>
    %238 = vector.extract_strided_slice %195 {offsets = [0, 64], sizes = [8, 32], strides = [1, 1]} : vector<8x128xbf16> to vector<8x32xbf16>
    %cst_71 = arith.constant dense<0.000000e+00> : vector<8x8xf32>
    %239 = tpu.matmul %237, %238, %cst_71 {dimension_numbers = #tpu.dot_dimension_numbers<[1], [1], [0], [0], [0, 0, 1, 0], [], []>} : vector<8x32xbf16>, vector<8x32xbf16>, vector<8x8xf32> -> vector<8x8xf32>
    %cst_72 = arith.constant dense<0xFF800000> : vector<8xf32>
    %240 = vector.multi_reduction <maximumf>, %239, %cst_72 [1] : vector<8x8xf32> to vector<8xf32>
    %241 = vector.shape_cast %240 : vector<8xf32> to vector<8x1xf32>
    %242 = vector.broadcast %241 : vector<8x1xf32> to vector<8x8xf32>
    %243 = arith.subf %239, %242 : vector<8x8xf32>
    %244 = math.exp %243 : vector<8x8xf32>
    %cst_73 = arith.constant dense<0.000000e+00> : vector<8xf32>
    %245 = vector.multi_reduction <add>, %244, %cst_73 [1] : vector<8x8xf32> to vector<8xf32>
    %246 = vector.shape_cast %245 : vector<8xf32> to vector<8x1xf32>
    %247 = tpu.reciprocal %246 {approx = true} : vector<8x1xf32> -> vector<8x1xf32>
    %248 = vector.broadcast %247 : vector<8x1xf32> to vector<8x8xf32>
    %249 = arith.mulf %244, %248 : vector<8x8xf32>
    %250 = arith.truncf %249 : vector<8x8xf32> to vector<8x8xbf16>
    %251 = vector.extract_strided_slice %196 {offsets = [0, 64], sizes = [8, 32], strides = [1, 1]} : vector<8x128xbf16> to vector<8x32xbf16>
    %cst_74 = arith.constant dense<0.000000e+00> : vector<8x32xf32>
    %252 = tpu.matmul %250, %251, %cst_74 {dimension_numbers = #tpu.dot_dimension_numbers<[1], [0], [0], [1], [0, 0, 1, 1], [], []>} : vector<8x8xbf16>, vector<8x32xbf16>, vector<8x32xf32> -> vector<8x32xf32>
    %253 = arith.truncf %252 : vector<8x32xf32> to vector<8x32xbf16>
    %254 = vector.extract_strided_slice %197 {offsets = [64, 0], sizes = [32, 128], strides = [1, 1]} : vector<128x128xbf16> to vector<32x128xbf16>
    %cst_75 = arith.constant dense<0.000000e+00> : vector<8x128xf32>
    %255 = tpu.matmul %253, %254, %cst_75 {dimension_numbers = #tpu.dot_dimension_numbers<[1], [0], [0], [1], [0, 0, 1, 1], [], []>} : vector<8x32xbf16>, vector<32x128xbf16>, vector<8x128xf32> -> vector<8x128xf32>
    %256 = arith.addf %236, %255 : vector<8x128xf32>
    %257 = vector.extract_strided_slice %194 {offsets = [0, 96], sizes = [8, 32], strides = [1, 1]} : vector<8x128xbf16> to vector<8x32xbf16>
    %258 = vector.extract_strided_slice %195 {offsets = [0, 96], sizes = [8, 32], strides = [1, 1]} : vector<8x128xbf16> to vector<8x32xbf16>
    %cst_76 = arith.constant dense<0.000000e+00> : vector<8x8xf32>
    %259 = tpu.matmul %257, %258, %cst_76 {dimension_numbers = #tpu.dot_dimension_numbers<[1], [1], [0], [0], [0, 0, 1, 0], [], []>} : vector<8x32xbf16>, vector<8x32xbf16>, vector<8x8xf32> -> vector<8x8xf32>
    %cst_77 = arith.constant dense<0xFF800000> : vector<8xf32>
    %260 = vector.multi_reduction <maximumf>, %259, %cst_77 [1] : vector<8x8xf32> to vector<8xf32>
    %261 = vector.shape_cast %260 : vector<8xf32> to vector<8x1xf32>
    %262 = vector.broadcast %261 : vector<8x1xf32> to vector<8x8xf32>
    %263 = arith.subf %259, %262 : vector<8x8xf32>
    %264 = math.exp %263 : vector<8x8xf32>
    %cst_78 = arith.constant dense<0.000000e+00> : vector<8xf32>
    %265 = vector.multi_reduction <add>, %264, %cst_78 [1] : vector<8x8xf32> to vector<8xf32>
    %266 = vector.shape_cast %265 : vector<8xf32> to vector<8x1xf32>
    %267 = tpu.reciprocal %266 {approx = true} : vector<8x1xf32> -> vector<8x1xf32>
    %268 = vector.broadcast %267 : vector<8x1xf32> to vector<8x8xf32>
    %269 = arith.mulf %264, %268 : vector<8x8xf32>
    %270 = arith.truncf %269 : vector<8x8xf32> to vector<8x8xbf16>
    %271 = vector.extract_strided_slice %196 {offsets = [0, 96], sizes = [8, 32], strides = [1, 1]} : vector<8x128xbf16> to vector<8x32xbf16>
    %cst_79 = arith.constant dense<0.000000e+00> : vector<8x32xf32>
    %272 = tpu.matmul %270, %271, %cst_79 {dimension_numbers = #tpu.dot_dimension_numbers<[1], [0], [0], [1], [0, 0, 1, 1], [], []>} : vector<8x8xbf16>, vector<8x32xbf16>, vector<8x32xf32> -> vector<8x32xf32>
    %273 = arith.truncf %272 : vector<8x32xf32> to vector<8x32xbf16>
    %274 = vector.extract_strided_slice %197 {offsets = [96, 0], sizes = [32, 128], strides = [1, 1]} : vector<128x128xbf16> to vector<32x128xbf16>
    %cst_80 = arith.constant dense<0.000000e+00> : vector<8x128xf32>
    %275 = tpu.matmul %273, %274, %cst_80 {dimension_numbers = #tpu.dot_dimension_numbers<[1], [0], [0], [1], [0, 0, 1, 1], [], []>} : vector<8x32xbf16>, vector<32x128xbf16>, vector<8x128xf32> -> vector<8x128xf32>
    %276 = arith.addf %256, %275 : vector<8x128xf32>
    %c10 = arith.constant 10 : index
    %c0_81 = arith.constant 0 : index
    %277 = vector.load %arg4[%c10, %c0_81] : memref<24x384xf32, #tpu.memory_space<vmem>>, vector<1x128xf32>
    %278 = vector.broadcast %277 : vector<1x128xf32> to vector<8x128xf32>
    %279 = arith.addf %276, %278 : vector<8x128xf32>
    %280 = arith.addf %7, %279 : vector<8x128xf32>
    %cst_82 = arith.constant dense<0.000000e+00> : vector<8xf32>
    %281 = vector.multi_reduction <add>, %280, %cst_82 [1] : vector<8x128xf32> to vector<8xf32>
    %282 = vector.shape_cast %281 : vector<8xf32> to vector<8x1xf32>
    %cst_83 = arith.constant 1.280000e+02 : f32
    %283 = vector.broadcast %cst_83 : f32 to vector<8x1xf32>
    %284 = arith.divf %282, %283 : vector<8x1xf32>
    %285 = vector.broadcast %284 : vector<8x1xf32> to vector<8x128xf32>
    %286 = arith.subf %280, %285 : vector<8x128xf32>
    %287 = arith.mulf %286, %286 : vector<8x128xf32>
    %cst_84 = arith.constant dense<0.000000e+00> : vector<8xf32>
    %288 = vector.multi_reduction <add>, %287, %cst_84 [1] : vector<8x128xf32> to vector<8xf32>
    %289 = vector.shape_cast %288 : vector<8xf32> to vector<8x1xf32>
    %cst_85 = arith.constant 1.280000e+02 : f32
    %290 = vector.broadcast %cst_85 : f32 to vector<8x1xf32>
    %291 = arith.divf %289, %290 : vector<8x1xf32>
    %292 = vector.broadcast %284 : vector<8x1xf32> to vector<8x128xf32>
    %293 = arith.subf %280, %292 : vector<8x128xf32>
    %cst_86 = arith.constant 9.99999974E-6 : f32
    %294 = vector.broadcast %cst_86 : f32 to vector<8x1xf32>
    %295 = arith.addf %291, %294 : vector<8x1xf32>
    %296 = math.rsqrt %295 : vector<8x1xf32>
    %297 = vector.broadcast %296 : vector<8x1xf32> to vector<8x128xf32>
    %298 = arith.mulf %293, %297 : vector<8x128xf32>
    %c11 = arith.constant 11 : index
    %c0_87 = arith.constant 0 : index
    %299 = vector.load %arg4[%c11, %c0_87] : memref<24x384xf32, #tpu.memory_space<vmem>>, vector<1x128xf32>
    %300 = vector.broadcast %299 : vector<1x128xf32> to vector<8x128xf32>
    %301 = arith.mulf %298, %300 : vector<8x128xf32>
    %c12 = arith.constant 12 : index
    %c0_88 = arith.constant 0 : index
    %302 = vector.load %arg4[%c12, %c0_88] : memref<24x384xf32, #tpu.memory_space<vmem>>, vector<1x128xf32>
    %303 = vector.broadcast %302 : vector<1x128xf32> to vector<8x128xf32>
    %304 = arith.addf %301, %303 : vector<8x128xf32>
    %305 = arith.truncf %304 : vector<8x128xf32> to vector<8x128xbf16>
    %c800 = arith.constant 800 : index
    %c0_89 = arith.constant 0 : index
    %306 = vector.load %arg3[%c800, %c0_89] : memref<1568x384xbf16, #tpu.memory_space<vmem>>, vector<128x128xbf16>
    %cst_90 = arith.constant dense<0.000000e+00> : vector<8x128xf32>
    %307 = tpu.matmul %305, %306, %cst_90 {dimension_numbers = #tpu.dot_dimension_numbers<[1], [0], [0], [1], [0, 0, 1, 1], [], []>} : vector<8x128xbf16>, vector<128x128xbf16>, vector<8x128xf32> -> vector<8x128xf32>
    %c13 = arith.constant 13 : index
    %c0_91 = arith.constant 0 : index
    %308 = vector.load %arg4[%c13, %c0_91] : memref<24x384xf32, #tpu.memory_space<vmem>>, vector<1x128xf32>
    %309 = vector.broadcast %308 : vector<1x128xf32> to vector<8x128xf32>
    %310 = arith.addf %307, %309 : vector<8x128xf32>
    %311 = arith.truncf %183 : vector<8x128xf32> to vector<8x128xbf16>
    %c928 = arith.constant 928 : index
    %c0_92 = arith.constant 0 : index
    %312 = vector.load %arg3[%c928, %c0_92] : memref<1568x384xbf16, #tpu.memory_space<vmem>>, vector<128x256xbf16>
    %cst_93 = arith.constant dense<0.000000e+00> : vector<8x256xf32>
    %313 = tpu.matmul %311, %312, %cst_93 {dimension_numbers = #tpu.dot_dimension_numbers<[1], [0], [0], [1], [0, 0, 1, 1], [], []>} : vector<8x128xbf16>, vector<128x256xbf16>, vector<8x256xf32> -> vector<8x256xf32>
    %c14 = arith.constant 14 : index
    %c0_94 = arith.constant 0 : index
    %314 = vector.load %arg4[%c14, %c0_94] : memref<24x384xf32, #tpu.memory_space<vmem>>, vector<1x256xf32>
    %315 = vector.broadcast %314 : vector<1x256xf32> to vector<8x256xf32>
    %316 = arith.addf %313, %315 : vector<8x256xf32>
    %317 = vector.extract_strided_slice %316 {offsets = [0, 0], sizes = [8, 128], strides = [1, 1]} : vector<8x256xf32> to vector<8x128xf32>
    %318 = vector.extract_strided_slice %316 {offsets = [0, 128], sizes = [8, 128], strides = [1, 1]} : vector<8x256xf32> to vector<8x128xf32>
    %319 = arith.truncf %310 : vector<8x128xf32> to vector<8x128xbf16>
    %320 = arith.truncf %317 : vector<8x128xf32> to vector<8x128xbf16>
    %321 = arith.truncf %318 : vector<8x128xf32> to vector<8x128xbf16>
    %c1056 = arith.constant 1056 : index
    %c0_95 = arith.constant 0 : index
    %322 = vector.load %arg3[%c1056, %c0_95] : memref<1568x384xbf16, #tpu.memory_space<vmem>>, vector<128x128xbf16>
    %323 = vector.extract_strided_slice %319 {offsets = [0, 0], sizes = [8, 32], strides = [1, 1]} : vector<8x128xbf16> to vector<8x32xbf16>
    %324 = vector.extract_strided_slice %320 {offsets = [0, 0], sizes = [8, 32], strides = [1, 1]} : vector<8x128xbf16> to vector<8x32xbf16>
    %cst_96 = arith.constant dense<0.000000e+00> : vector<8x8xf32>
    %325 = tpu.matmul %323, %324, %cst_96 {dimension_numbers = #tpu.dot_dimension_numbers<[1], [1], [0], [0], [0, 0, 1, 0], [], []>} : vector<8x32xbf16>, vector<8x32xbf16>, vector<8x8xf32> -> vector<8x8xf32>
    %cst_97 = arith.constant dense<0xFF800000> : vector<8xf32>
    %326 = vector.multi_reduction <maximumf>, %325, %cst_97 [1] : vector<8x8xf32> to vector<8xf32>
    %327 = vector.shape_cast %326 : vector<8xf32> to vector<8x1xf32>
    %328 = vector.broadcast %327 : vector<8x1xf32> to vector<8x8xf32>
    %329 = arith.subf %325, %328 : vector<8x8xf32>
    %330 = math.exp %329 : vector<8x8xf32>
    %cst_98 = arith.constant dense<0.000000e+00> : vector<8xf32>
    %331 = vector.multi_reduction <add>, %330, %cst_98 [1] : vector<8x8xf32> to vector<8xf32>
    %332 = vector.shape_cast %331 : vector<8xf32> to vector<8x1xf32>
    %333 = tpu.reciprocal %332 {approx = true} : vector<8x1xf32> -> vector<8x1xf32>
    %334 = vector.broadcast %333 : vector<8x1xf32> to vector<8x8xf32>
    %335 = arith.mulf %330, %334 : vector<8x8xf32>
    %336 = arith.truncf %335 : vector<8x8xf32> to vector<8x8xbf16>
    %337 = vector.extract_strided_slice %321 {offsets = [0, 0], sizes = [8, 32], strides = [1, 1]} : vector<8x128xbf16> to vector<8x32xbf16>
    %cst_99 = arith.constant dense<0.000000e+00> : vector<8x32xf32>
    %338 = tpu.matmul %336, %337, %cst_99 {dimension_numbers = #tpu.dot_dimension_numbers<[1], [0], [0], [1], [0, 0, 1, 1], [], []>} : vector<8x8xbf16>, vector<8x32xbf16>, vector<8x32xf32> -> vector<8x32xf32>
    %339 = arith.truncf %338 : vector<8x32xf32> to vector<8x32xbf16>
    %340 = vector.extract_strided_slice %322 {offsets = [0, 0], sizes = [32, 128], strides = [1, 1]} : vector<128x128xbf16> to vector<32x128xbf16>
    %cst_100 = arith.constant dense<0.000000e+00> : vector<8x128xf32>
    %341 = tpu.matmul %339, %340, %cst_100 {dimension_numbers = #tpu.dot_dimension_numbers<[1], [0], [0], [1], [0, 0, 1, 1], [], []>} : vector<8x32xbf16>, vector<32x128xbf16>, vector<8x128xf32> -> vector<8x128xf32>
    %342 = vector.extract_strided_slice %319 {offsets = [0, 32], sizes = [8, 32], strides = [1, 1]} : vector<8x128xbf16> to vector<8x32xbf16>
    %343 = vector.extract_strided_slice %320 {offsets = [0, 32], sizes = [8, 32], strides = [1, 1]} : vector<8x128xbf16> to vector<8x32xbf16>
    %cst_101 = arith.constant dense<0.000000e+00> : vector<8x8xf32>
    %344 = tpu.matmul %342, %343, %cst_101 {dimension_numbers = #tpu.dot_dimension_numbers<[1], [1], [0], [0], [0, 0, 1, 0], [], []>} : vector<8x32xbf16>, vector<8x32xbf16>, vector<8x8xf32> -> vector<8x8xf32>
    %cst_102 = arith.constant dense<0xFF800000> : vector<8xf32>
    %345 = vector.multi_reduction <maximumf>, %344, %cst_102 [1] : vector<8x8xf32> to vector<8xf32>
    %346 = vector.shape_cast %345 : vector<8xf32> to vector<8x1xf32>
    %347 = vector.broadcast %346 : vector<8x1xf32> to vector<8x8xf32>
    %348 = arith.subf %344, %347 : vector<8x8xf32>
    %349 = math.exp %348 : vector<8x8xf32>
    %cst_103 = arith.constant dense<0.000000e+00> : vector<8xf32>
    %350 = vector.multi_reduction <add>, %349, %cst_103 [1] : vector<8x8xf32> to vector<8xf32>
    %351 = vector.shape_cast %350 : vector<8xf32> to vector<8x1xf32>
    %352 = tpu.reciprocal %351 {approx = true} : vector<8x1xf32> -> vector<8x1xf32>
    %353 = vector.broadcast %352 : vector<8x1xf32> to vector<8x8xf32>
    %354 = arith.mulf %349, %353 : vector<8x8xf32>
    %355 = arith.truncf %354 : vector<8x8xf32> to vector<8x8xbf16>
    %356 = vector.extract_strided_slice %321 {offsets = [0, 32], sizes = [8, 32], strides = [1, 1]} : vector<8x128xbf16> to vector<8x32xbf16>
    %cst_104 = arith.constant dense<0.000000e+00> : vector<8x32xf32>
    %357 = tpu.matmul %355, %356, %cst_104 {dimension_numbers = #tpu.dot_dimension_numbers<[1], [0], [0], [1], [0, 0, 1, 1], [], []>} : vector<8x8xbf16>, vector<8x32xbf16>, vector<8x32xf32> -> vector<8x32xf32>
    %358 = arith.truncf %357 : vector<8x32xf32> to vector<8x32xbf16>
    %359 = vector.extract_strided_slice %322 {offsets = [32, 0], sizes = [32, 128], strides = [1, 1]} : vector<128x128xbf16> to vector<32x128xbf16>
    %cst_105 = arith.constant dense<0.000000e+00> : vector<8x128xf32>
    %360 = tpu.matmul %358, %359, %cst_105 {dimension_numbers = #tpu.dot_dimension_numbers<[1], [0], [0], [1], [0, 0, 1, 1], [], []>} : vector<8x32xbf16>, vector<32x128xbf16>, vector<8x128xf32> -> vector<8x128xf32>
    %361 = arith.addf %341, %360 : vector<8x128xf32>
    %362 = vector.extract_strided_slice %319 {offsets = [0, 64], sizes = [8, 32], strides = [1, 1]} : vector<8x128xbf16> to vector<8x32xbf16>
    %363 = vector.extract_strided_slice %320 {offsets = [0, 64], sizes = [8, 32], strides = [1, 1]} : vector<8x128xbf16> to vector<8x32xbf16>
    %cst_106 = arith.constant dense<0.000000e+00> : vector<8x8xf32>
    %364 = tpu.matmul %362, %363, %cst_106 {dimension_numbers = #tpu.dot_dimension_numbers<[1], [1], [0], [0], [0, 0, 1, 0], [], []>} : vector<8x32xbf16>, vector<8x32xbf16>, vector<8x8xf32> -> vector<8x8xf32>
    %cst_107 = arith.constant dense<0xFF800000> : vector<8xf32>
    %365 = vector.multi_reduction <maximumf>, %364, %cst_107 [1] : vector<8x8xf32> to vector<8xf32>
    %366 = vector.shape_cast %365 : vector<8xf32> to vector<8x1xf32>
    %367 = vector.broadcast %366 : vector<8x1xf32> to vector<8x8xf32>
    %368 = arith.subf %364, %367 : vector<8x8xf32>
    %369 = math.exp %368 : vector<8x8xf32>
    %cst_108 = arith.constant dense<0.000000e+00> : vector<8xf32>
    %370 = vector.multi_reduction <add>, %369, %cst_108 [1] : vector<8x8xf32> to vector<8xf32>
    %371 = vector.shape_cast %370 : vector<8xf32> to vector<8x1xf32>
    %372 = tpu.reciprocal %371 {approx = true} : vector<8x1xf32> -> vector<8x1xf32>
    %373 = vector.broadcast %372 : vector<8x1xf32> to vector<8x8xf32>
    %374 = arith.mulf %369, %373 : vector<8x8xf32>
    %375 = arith.truncf %374 : vector<8x8xf32> to vector<8x8xbf16>
    %376 = vector.extract_strided_slice %321 {offsets = [0, 64], sizes = [8, 32], strides = [1, 1]} : vector<8x128xbf16> to vector<8x32xbf16>
    %cst_109 = arith.constant dense<0.000000e+00> : vector<8x32xf32>
    %377 = tpu.matmul %375, %376, %cst_109 {dimension_numbers = #tpu.dot_dimension_numbers<[1], [0], [0], [1], [0, 0, 1, 1], [], []>} : vector<8x8xbf16>, vector<8x32xbf16>, vector<8x32xf32> -> vector<8x32xf32>
    %378 = arith.truncf %377 : vector<8x32xf32> to vector<8x32xbf16>
    %379 = vector.extract_strided_slice %322 {offsets = [64, 0], sizes = [32, 128], strides = [1, 1]} : vector<128x128xbf16> to vector<32x128xbf16>
    %cst_110 = arith.constant dense<0.000000e+00> : vector<8x128xf32>
    %380 = tpu.matmul %378, %379, %cst_110 {dimension_numbers = #tpu.dot_dimension_numbers<[1], [0], [0], [1], [0, 0, 1, 1], [], []>} : vector<8x32xbf16>, vector<32x128xbf16>, vector<8x128xf32> -> vector<8x128xf32>
    %381 = arith.addf %361, %380 : vector<8x128xf32>
    %382 = vector.extract_strided_slice %319 {offsets = [0, 96], sizes = [8, 32], strides = [1, 1]} : vector<8x128xbf16> to vector<8x32xbf16>
    %383 = vector.extract_strided_slice %320 {offsets = [0, 96], sizes = [8, 32], strides = [1, 1]} : vector<8x128xbf16> to vector<8x32xbf16>
    %cst_111 = arith.constant dense<0.000000e+00> : vector<8x8xf32>
    %384 = tpu.matmul %382, %383, %cst_111 {dimension_numbers = #tpu.dot_dimension_numbers<[1], [1], [0], [0], [0, 0, 1, 0], [], []>} : vector<8x32xbf16>, vector<8x32xbf16>, vector<8x8xf32> -> vector<8x8xf32>
    %cst_112 = arith.constant dense<0xFF800000> : vector<8xf32>
    %385 = vector.multi_reduction <maximumf>, %384, %cst_112 [1] : vector<8x8xf32> to vector<8xf32>
    %386 = vector.shape_cast %385 : vector<8xf32> to vector<8x1xf32>
    %387 = vector.broadcast %386 : vector<8x1xf32> to vector<8x8xf32>
    %388 = arith.subf %384, %387 : vector<8x8xf32>
    %389 = math.exp %388 : vector<8x8xf32>
    %cst_113 = arith.constant dense<0.000000e+00> : vector<8xf32>
    %390 = vector.multi_reduction <add>, %389, %cst_113 [1] : vector<8x8xf32> to vector<8xf32>
    %391 = vector.shape_cast %390 : vector<8xf32> to vector<8x1xf32>
    %392 = tpu.reciprocal %391 {approx = true} : vector<8x1xf32> -> vector<8x1xf32>
    %393 = vector.broadcast %392 : vector<8x1xf32> to vector<8x8xf32>
    %394 = arith.mulf %389, %393 : vector<8x8xf32>
    %395 = arith.truncf %394 : vector<8x8xf32> to vector<8x8xbf16>
    %396 = vector.extract_strided_slice %321 {offsets = [0, 96], sizes = [8, 32], strides = [1, 1]} : vector<8x128xbf16> to vector<8x32xbf16>
    %cst_114 = arith.constant dense<0.000000e+00> : vector<8x32xf32>
    %397 = tpu.matmul %395, %396, %cst_114 {dimension_numbers = #tpu.dot_dimension_numbers<[1], [0], [0], [1], [0, 0, 1, 1], [], []>} : vector<8x8xbf16>, vector<8x32xbf16>, vector<8x32xf32> -> vector<8x32xf32>
    %398 = arith.truncf %397 : vector<8x32xf32> to vector<8x32xbf16>
    %399 = vector.extract_strided_slice %322 {offsets = [96, 0], sizes = [32, 128], strides = [1, 1]} : vector<128x128xbf16> to vector<32x128xbf16>
    %cst_115 = arith.constant dense<0.000000e+00> : vector<8x128xf32>
    %400 = tpu.matmul %398, %399, %cst_115 {dimension_numbers = #tpu.dot_dimension_numbers<[1], [0], [0], [1], [0, 0, 1, 1], [], []>} : vector<8x32xbf16>, vector<32x128xbf16>, vector<8x128xf32> -> vector<8x128xf32>
    %401 = arith.addf %381, %400 : vector<8x128xf32>
    %c15 = arith.constant 15 : index
    %c0_116 = arith.constant 0 : index
    %402 = vector.load %arg4[%c15, %c0_116] : memref<24x384xf32, #tpu.memory_space<vmem>>, vector<1x128xf32>
    %403 = vector.broadcast %402 : vector<1x128xf32> to vector<8x128xf32>
    %404 = arith.addf %401, %403 : vector<8x128xf32>
    %405 = arith.addf %304, %404 : vector<8x128xf32>
    %cst_117 = arith.constant dense<0.000000e+00> : vector<8xf32>
    %406 = vector.multi_reduction <add>, %405, %cst_117 [1] : vector<8x128xf32> to vector<8xf32>
    %407 = vector.shape_cast %406 : vector<8xf32> to vector<8x1xf32>
    %cst_118 = arith.constant 1.280000e+02 : f32
    %408 = vector.broadcast %cst_118 : f32 to vector<8x1xf32>
    %409 = arith.divf %407, %408 : vector<8x1xf32>
    %410 = vector.broadcast %409 : vector<8x1xf32> to vector<8x128xf32>
    %411 = arith.subf %405, %410 : vector<8x128xf32>
    %412 = arith.mulf %411, %411 : vector<8x128xf32>
    %cst_119 = arith.constant dense<0.000000e+00> : vector<8xf32>
    %413 = vector.multi_reduction <add>, %412, %cst_119 [1] : vector<8x128xf32> to vector<8xf32>
    %414 = vector.shape_cast %413 : vector<8xf32> to vector<8x1xf32>
    %cst_120 = arith.constant 1.280000e+02 : f32
    %415 = vector.broadcast %cst_120 : f32 to vector<8x1xf32>
    %416 = arith.divf %414, %415 : vector<8x1xf32>
    %417 = vector.broadcast %409 : vector<8x1xf32> to vector<8x128xf32>
    %418 = arith.subf %405, %417 : vector<8x128xf32>
    %cst_121 = arith.constant 9.99999974E-6 : f32
    %419 = vector.broadcast %cst_121 : f32 to vector<8x1xf32>
    %420 = arith.addf %416, %419 : vector<8x1xf32>
    %421 = math.rsqrt %420 : vector<8x1xf32>
    %422 = vector.broadcast %421 : vector<8x1xf32> to vector<8x128xf32>
    %423 = arith.mulf %418, %422 : vector<8x128xf32>
    %c16 = arith.constant 16 : index
    %c0_122 = arith.constant 0 : index
    %424 = vector.load %arg4[%c16, %c0_122] : memref<24x384xf32, #tpu.memory_space<vmem>>, vector<1x128xf32>
    %425 = vector.broadcast %424 : vector<1x128xf32> to vector<8x128xf32>
    %426 = arith.mulf %423, %425 : vector<8x128xf32>
    %c17 = arith.constant 17 : index
    %c0_123 = arith.constant 0 : index
    %427 = vector.load %arg4[%c17, %c0_123] : memref<24x384xf32, #tpu.memory_space<vmem>>, vector<1x128xf32>
    %428 = vector.broadcast %427 : vector<1x128xf32> to vector<8x128xf32>
    %429 = arith.addf %426, %428 : vector<8x128xf32>
    %430 = arith.truncf %429 : vector<8x128xf32> to vector<8x128xbf16>
    %c1184 = arith.constant 1184 : index
    %c0_124 = arith.constant 0 : index
    %431 = vector.load %arg3[%c1184, %c0_124] : memref<1568x384xbf16, #tpu.memory_space<vmem>>, vector<128x128xbf16>
    %cst_125 = arith.constant dense<0.000000e+00> : vector<8x128xf32>
    %432 = tpu.matmul %430, %431, %cst_125 {dimension_numbers = #tpu.dot_dimension_numbers<[1], [0], [0], [1], [0, 0, 1, 1], [], []>} : vector<8x128xbf16>, vector<128x128xbf16>, vector<8x128xf32> -> vector<8x128xf32>
    %c18 = arith.constant 18 : index
    %c0_126 = arith.constant 0 : index
    %433 = vector.load %arg4[%c18, %c0_126] : memref<24x384xf32, #tpu.memory_space<vmem>>, vector<1x128xf32>
    %434 = vector.broadcast %433 : vector<1x128xf32> to vector<8x128xf32>
    %435 = arith.addf %432, %434 : vector<8x128xf32>
    %cst_127 = arith.constant 0.000000e+00 : f32
    %436 = vector.broadcast %cst_127 : f32 to vector<8x128xf32>
    %437 = arith.maximumf %435, %436 : vector<8x128xf32>
    %438 = arith.truncf %437 : vector<8x128xf32> to vector<8x128xbf16>
    %c1312 = arith.constant 1312 : index
    %c0_128 = arith.constant 0 : index
    %439 = vector.load %arg3[%c1312, %c0_128] : memref<1568x384xbf16, #tpu.memory_space<vmem>>, vector<128x128xbf16>
    %cst_129 = arith.constant dense<0.000000e+00> : vector<8x128xf32>
    %440 = tpu.matmul %438, %439, %cst_129 {dimension_numbers = #tpu.dot_dimension_numbers<[1], [0], [0], [1], [0, 0, 1, 1], [], []>} : vector<8x128xbf16>, vector<128x128xbf16>, vector<8x128xf32> -> vector<8x128xf32>
    %c19 = arith.constant 19 : index
    %c0_130 = arith.constant 0 : index
    %441 = vector.load %arg4[%c19, %c0_130] : memref<24x384xf32, #tpu.memory_space<vmem>>, vector<1x128xf32>
    %442 = vector.broadcast %441 : vector<1x128xf32> to vector<8x128xf32>
    %443 = arith.addf %440, %442 : vector<8x128xf32>
    %444 = arith.addf %429, %443 : vector<8x128xf32>
    %cst_131 = arith.constant dense<0.000000e+00> : vector<8xf32>
    %445 = vector.multi_reduction <add>, %444, %cst_131 [1] : vector<8x128xf32> to vector<8xf32>
    %446 = vector.shape_cast %445 : vector<8xf32> to vector<8x1xf32>
    %cst_132 = arith.constant 1.280000e+02 : f32
    %447 = vector.broadcast %cst_132 : f32 to vector<8x1xf32>
    %448 = arith.divf %446, %447 : vector<8x1xf32>
    %449 = vector.broadcast %448 : vector<8x1xf32> to vector<8x128xf32>
    %450 = arith.subf %444, %449 : vector<8x128xf32>
    %451 = arith.mulf %450, %450 : vector<8x128xf32>
    %cst_133 = arith.constant dense<0.000000e+00> : vector<8xf32>
    %452 = vector.multi_reduction <add>, %451, %cst_133 [1] : vector<8x128xf32> to vector<8xf32>
    %453 = vector.shape_cast %452 : vector<8xf32> to vector<8x1xf32>
    %cst_134 = arith.constant 1.280000e+02 : f32
    %454 = vector.broadcast %cst_134 : f32 to vector<8x1xf32>
    %455 = arith.divf %453, %454 : vector<8x1xf32>
    %456 = vector.broadcast %448 : vector<8x1xf32> to vector<8x128xf32>
    %457 = arith.subf %444, %456 : vector<8x128xf32>
    %cst_135 = arith.constant 9.99999974E-6 : f32
    %458 = vector.broadcast %cst_135 : f32 to vector<8x1xf32>
    %459 = arith.addf %455, %458 : vector<8x1xf32>
    %460 = math.rsqrt %459 : vector<8x1xf32>
    %461 = vector.broadcast %460 : vector<8x1xf32> to vector<8x128xf32>
    %462 = arith.mulf %457, %461 : vector<8x128xf32>
    %c20 = arith.constant 20 : index
    %c0_136 = arith.constant 0 : index
    %463 = vector.load %arg4[%c20, %c0_136] : memref<24x384xf32, #tpu.memory_space<vmem>>, vector<1x128xf32>
    %464 = vector.broadcast %463 : vector<1x128xf32> to vector<8x128xf32>
    %465 = arith.mulf %462, %464 : vector<8x128xf32>
    %c21 = arith.constant 21 : index
    %c0_137 = arith.constant 0 : index
    %466 = vector.load %arg4[%c21, %c0_137] : memref<24x384xf32, #tpu.memory_space<vmem>>, vector<1x128xf32>
    %467 = vector.broadcast %466 : vector<1x128xf32> to vector<8x128xf32>
    %468 = arith.addf %465, %467 : vector<8x128xf32>
    %469 = tpu.concatenate %184, %468 in 0 : vector<8x128xf32>, vector<8x128xf32> -> vector<16x128xf32>
    %470 = arith.truncf %469 : vector<16x128xf32> to vector<16x128xbf16>
    %c1440 = arith.constant 1440 : index
    %c0_138 = arith.constant 0 : index
    %471 = vector.load %arg3[%c1440, %c0_138] : memref<1568x384xbf16, #tpu.memory_space<vmem>>, vector<128x256xbf16>
    %cst_139 = arith.constant dense<0.000000e+00> : vector<16x256xf32>
    %472 = tpu.matmul %470, %471, %cst_139 {dimension_numbers = #tpu.dot_dimension_numbers<[1], [0], [0], [1], [0, 0, 1, 1], [], []>} : vector<16x128xbf16>, vector<128x256xbf16>, vector<16x256xf32> -> vector<16x256xf32>
    %c22 = arith.constant 22 : index
    %c0_140 = arith.constant 0 : index
    %473 = vector.load %arg4[%c22, %c0_140] : memref<24x384xf32, #tpu.memory_space<vmem>>, vector<1x256xf32>
    %474 = vector.broadcast %473 : vector<1x256xf32> to vector<16x256xf32>
    %475 = arith.addf %472, %474 : vector<16x256xf32>
    %476 = vector.extract_strided_slice %475 {offsets = [0, 0], sizes = [8, 128], strides = [1, 1]} : vector<16x256xf32> to vector<8x128xf32>
    %c0_141 = arith.constant 0 : index
    %c0_142 = arith.constant 0 : index
    %c0_143 = arith.constant 0 : index
    %477 = vector.load %arg5[%c0_141, %c0_142, %c0_143] : memref<2x8x128xf32, #tpu.memory_space<vmem>>, vector<1x8x128xf32>
    %478 = vector.shape_cast %477 : vector<1x8x128xf32> to vector<8x128xf32>
    %479 = vector.shape_cast %476 : vector<8x128xf32> to vector<1x8x128xf32>
    tpu.vector_store %arg5[%c0_141, %c0_142, %c0_143], %479 {strides = array<i32>} : memref<2x8x128xf32, #tpu.memory_space<vmem>>, vector<1x8x128xf32>,
    %480 = vector.extract_strided_slice %475 {offsets = [8, 128], sizes = [8, 128], strides = [1, 1]} : vector<16x256xf32> to vector<8x128xf32>
    %c1_144 = arith.constant 1 : index
    %c0_145 = arith.constant 0 : index
    %c0_146 = arith.constant 0 : index
    %481 = vector.load %arg5[%c1_144, %c0_145, %c0_146] : memref<2x8x128xf32, #tpu.memory_space<vmem>>, vector<1x8x128xf32>
    %482 = vector.shape_cast %481 : vector<1x8x128xf32> to vector<8x128xf32>
    %483 = vector.shape_cast %480 : vector<8x128xf32> to vector<1x8x128xf32>
    tpu.vector_store %arg5[%c1_144, %c0_145, %c0_146], %483 {strides = array<i32>} : memref<2x8x128xf32, #tpu.memory_space<vmem>>, vector<1x8x128xf32>,
    return
  }
  func.func @transform_0(%arg0: i32) -> (i32, i32) {
    %c0_i32 = arith.constant 0 : i32
    %c0_i32_0 = arith.constant 0 : i32
    %c0_i32_1 = arith.constant 0 : i32
    return %c0_i32, %c0_i32_0 : i32, i32
  }
  func.func @transform_1(%arg0: i32) -> (i32, i32) {
    %c0_i32 = arith.constant 0 : i32
    %c0_i32_0 = arith.constant 0 : i32
    %c0_i32_1 = arith.constant 0 : i32
    return %c0_i32, %c0_i32_0 : i32, i32
  }
  func.func @transform_2(%arg0: i32) -> (i32, i32) {
    %c0_i32 = arith.constant 0 : i32
    %c0_i32_0 = arith.constant 0 : i32
    %c0_i32_1 = arith.constant 0 : i32
    return %c0_i32, %c0_i32_0 : i32, i32
  }
  func.func @transform_3(%arg0: i32) -> (i32, i32) {
    %c0_i32 = arith.constant 0 : i32
    %c0_i32_0 = arith.constant 0 : i32
    %c0_i32_1 = arith.constant 0 : i32
    return %c0_i32, %c0_i32_0 : i32, i32
  }
  func.func @transform_4(%arg0: i32) -> (i32, i32, i32) {
    %c0_i32 = arith.constant 0 : i32
    %c0_i32_0 = arith.constant 0 : i32
    %c0_i32_1 = arith.constant 0 : i32
    %c0_i32_2 = arith.constant 0 : i32
    return %c0_i32, %c0_i32_0, %c0_i32_1 : i32, i32, i32
  }
}

</mosaic_0001>

<bundles_post_ra>
// kernel: tpu_custom_call.1
= control target key start
LH: loop header
LB: loop body
LE: loop exit
PB: predicated region body
PF: predicated region fallthrough
CT: control target
= control target key end

     0   :  { %9 = vsyncpa [#allocation3], 0  ;;  %s5421_s0 = inlined_call_operand.hbm [shape: f32[8,32], index: 0, kind: input, shape index: {}]   ;;  %s5422_s1 = inlined_call_operand.hbm [shape: f32[8,128], index: 1, kind: input, shape index: {}]   ;;  %s5423_s2 = inlined_call_operand.hbm [shape: bf16[1568,384], index: 2, kind: input, shape index: {}]   ;;  %s5424_s3 = inlined_call_operand.hbm [shape: f32[24,384], index: 3, kind: input, shape index: {}]   ;;  %s5425_s4 = inlined_call_operand.hbm [shape: f32[2,8,128], index: 4, kind: output, shape index: {}]  }
   0x1   :  { %10 = vsyncpa [#allocation6], 0 }
   0x2   :  { %11 = vsyncpa [#allocation9], 0 }
   0x3   :  { %12 = vsyncpa [#allocation4], 0  ;;  %s4858_s15 = smov [#allocation5]   ;;  %s4859_s17 = smov [#allocation2]  }
   0x4   :  { %s29_s16 = sshll.u32 %s4858_s15, 4  ;;  %s19_s18 = sshll.u32 %s4859_s17, 4  ;;  %s30_s16 = int_to_ptr.vmem [resolvable:$true] %s29_s16  ;;  %s20_s18 = int_to_ptr.vmem [resolvable:$true] %s19_s18 }
   0x5   :  { %s4740_s21 = scalar_lea.hbm %s5422_s1, 128 }
   0x6   :  { %p4741_p0 = scmp.ne.s32.totalorder %s5422_s1, %s4740_s21  ;;  %p4744_p1 = scmp.lt.u32.totalorder %s4740_s21, %s5422_s1 }
   0x8   :  { %p4746_p2 = pnand %p4744_p1, %p4741_p0 }
   0xa   :  { %4749 = shalt.err (!%p4746_p2)
}
   0xb   :  { %s4750_s26 = scalar_lea.vmem %s30_s16, 128  ;;  %p4755_p4 = scmp.lt.s32.totalorder %s30_s16, %s30_s16 }
   0xc   :  { %p4751_p3 = scmp.ne.s32.totalorder %s30_s16, %s4750_s26  ;;  %p4756_p5 = scmp.lt.s32.totalorder %s4750_s26, %s4750_s26 }
   0xe   :  { %p4757_p6 = por %p4756_p5, %p4755_p4 }
  0x10   :  { %p4758_p7 = pnand %p4757_p6, %p4751_p3 }
  0x12   :  { %4761 = shalt.err (!%p4758_p7)
}
  0x13   :  { %32 = dma.hbm_to_vmem [thread:$0]  %s5422_s1, 128, %s30_s16, [#allocation6]  }
  0x14   :  { %s4762_s5 = scalar_lea.hbm %s5421_s0, 128 }
  0x15   :  { %p4763_p8 = scmp.ne.s32.totalorder %s5421_s0, %s4762_s5  ;;  %p4766_p9 = scmp.lt.u32.totalorder %s4762_s5, %s5421_s0 }
  0x17   :  { %p4768_p10 = pnand %p4766_p9, %p4763_p8 }
  0x19   :  { %4771 = shalt.err (!%p4768_p10)
}
  0x1a   :  { %s4772_s10 = scalar_lea.vmem %s20_s18, 128  ;;  %p4777_p12 = scmp.lt.s32.totalorder %s20_s18, %s20_s18 }
  0x1b   :  { %p4773_p11 = scmp.ne.s32.totalorder %s20_s18, %s4772_s10  ;;  %p4778_p13 = scmp.lt.s32.totalorder %s4772_s10, %s4772_s10 }
  0x1d   :  { %p4779_p0 = por %p4778_p13, %p4777_p12 }
  0x1f   :  { %p4780_p1 = pnand %p4779_p0, %p4773_p11 }
  0x21   :  { %4783 = shalt.err (!%p4780_p1)
}
  0x22   :  { %22 = dma.hbm_to_vmem [thread:$0]  %s5421_s0, 128, %s20_s18, [#allocation3]  }
  0x23   :  { %s4860_s12 = smov [#allocation7]   ;;  %s4784_s16 = scalar_lea.hbm %s5423_s2, 37632 }
  0x24   :  { %s38_s13 = sshll.u32 %s4860_s12, 4  ;;  %p4785_p2 = scmp.ne.s32.totalorder %s5423_s2, %s4784_s16  ;;  %s39_s13 = int_to_ptr.vmem [resolvable:$true] %s38_s13 }
  0x25   :  { %p4788_p3 = scmp.lt.u32.totalorder %s4784_s16, %s5423_s2 }
  0x27   :  { %p4790_p4 = pnand %p4788_p3, %p4785_p2 }
  0x29   :  { %4793 = shalt.err (!%p4790_p4)
}
  0x2a   :  { %s4794_s22 = scalar_lea.vmem %s39_s13, 37632  ;;  %p4799_p6 = scmp.lt.s32.totalorder %s39_s13, %s39_s13 }
  0x2b   :  { %p4795_p5 = scmp.ne.s32.totalorder %s39_s13, %s4794_s22  ;;  %p4800_p7 = scmp.lt.s32.totalorder %s4794_s22, %s4794_s22 }
  0x2d   :  { %p4801_p8 = por %p4800_p7, %p4799_p6 }
  0x2f   :  { %p4802_p9 = pnand %p4801_p8, %p4795_p5 }
  0x31   :  { %4805 = shalt.err (!%p4802_p9)
}
  0x32   :  { %s4861_s0 = smov 192   ;;  %s4862_s18 = smov 12  }
  0x33   :  { %44 = dma.hbm_to_vmem [thread:$0]  %s5423_s2, 37632, %s39_s13, [#allocation6], %s4861_s0, %s4861_s0, %s4862_s18  }
  0x34   :  { %s4863_s25 = smov [#allocation8]   ;;  %s4806_s29 = scalar_lea.hbm %s5424_s3, 1152 }
  0x35   :  { %s50_s26 = sshll.u32 %s4863_s25, 4  ;;  %p4807_p10 = scmp.ne.s32.totalorder %s5424_s3, %s4806_s29  ;;  %s51_s26 = int_to_ptr.vmem [resolvable:$true] %s50_s26 }
  0x36   :  { %p4810_p11 = scmp.lt.u32.totalorder %s4806_s29, %s5424_s3 }
  0x38   :  { %p4812_p12 = pnand %p4810_p11, %p4807_p10 }
  0x3a   :  { %4815 = shalt.err (!%p4812_p12)
}
  0x3b   :  { %s4816_s8 = scalar_lea.vmem %s51_s26, 1152  ;;  %p4821_p0 = scmp.lt.s32.totalorder %s51_s26, %s51_s26 }
  0x3c   :  { %p4817_p13 = scmp.ne.s32.totalorder %s51_s26, %s4816_s8  ;;  %p4822_p1 = scmp.lt.s32.totalorder %s4816_s8, %s4816_s8 }
  0x3e   :  { %p4823_p2 = por %p4822_p1, %p4821_p0 }
  0x40   :  { %p4824_p3 = pnand %p4823_p2, %p4817_p13 }
  0x42   :  { %4827 = shalt.err (!%p4824_p3)
}
  0x43   :  { %s4864_s2 = smov 384   ;;  %s4865_s9 = smov 24  }
  0x44   :  { %56 = dma.hbm_to_vmem [thread:$0]  %s5424_s3, 1152, %s51_s26, [#allocation9], %s4864_s2, %s4864_s2, %s4865_s9  }
  0x45   :  { %4850 = dma.done.wait [#allocation3], 128  }
  0x46   :  { %4851 = vsyncadd [#allocation3], 4294967168 }
  0x47   :  { %4852 = dma.done.wait [#allocation6], 37760  }
  0x48   :  { %4853 = vsyncadd [#allocation6], 4294929536 }
  0x49   :  { %4854 = dma.done.wait [#allocation9], 1152  }
  0x4a   :  { %4855 = vsyncadd [#allocation9], 4294966144  ;;  %v4866_v0 = vmov 0.0   ;;  %vm4867_vm0 = vmmov 0   ;;  %v4484_v1 = vld [vmem:[#allocation7] ss:$12 sps:$4 sm:$0xff]   ;;  %v137_v38 = vlaneseq }
  0x4b   :  { %4077 = vmatprep.subr.bf16.mxu0 %v4866_v0  ;;  %4081 = vmatprep.mubr.msk.bf16.mxu0 %vm4867_vm0, %v4866_v0  ;;  %v4485_v2 = vld [vmem:[#allocation7 + $0x18] ss:$12 sps:$4 sm:$0xff]   ;;  %v70_v3 = vld [vmem:[#allocation2] sm:$0xff]  ;;  %vm90_vm1 = vcmask 261120   ;;  %v4496_v12 = vld [vmem:[#allocation7 + $0x60] ss:$12 sps:$4 sm:$0xff]  }
  0x4c   :  { %4078 = vmatpush3.bf16.msra.mxu0 %v4484_v1  ;;  %v4486_v4 = vld [vmem:[#allocation7 + $0x34] ss:$12 sps:$4 sm:$0xff]   ;;  %v4488_v5 = vld [vmem:[#allocation7 + $0x30] ss:$12 sps:$4 sm:$0xff]   ;;  %v72_v6 = vpack.c.bf16 %v70_v3, %v70_v3  ;;  %v4489_v7 = vld [vmem:[#allocation7 + $0x38] ss:$12 sps:$4 sm:$0xff]  }
  0x4d   :  { %4079 = vmatprep.subr.bf16.mxu0 %v4866_v0  ;;  %327 = vmatprep.subr.bf16.mxu1 %v4486_v4  ;;  %v4490_v8 = vld [vmem:[#allocation7 + $0x4c] ss:$12 sps:$4 sm:$0xff]   ;;  %v4492_v9 = vld [vmem:[#allocation7 + $0x48] ss:$12 sps:$4 sm:$0xff]   ;;  %v4494_v10 = vld [vmem:[#allocation7 + $0x64] ss:$12 sps:$4 sm:$0xff]  }
  0x4e   :  { %328 = vmatpush1.bf16.msra.mxu1 %v4488_v5  ;;  %v4493_v11 = vld [vmem:[#allocation7 + $0x50] ss:$12 sps:$4 sm:$0xff]   ;;  %v4497_v14 = vld [vmem:[#allocation7 + $0x68] ss:$12 sps:$4 sm:$0xff]   ;;  %v4500_v15 = vld [vmem:[#allocation7 + $0x78] ss:$12 sps:$4 sm:$0xff]  }
  0x4f   :  { %329 = vmatprep.subr.bf16.mxu1 %v4490_v8  ;;  %v4498_v13 = vld [vmem:[#allocation7 + $0x7c] ss:$12 sps:$4 sm:$0xff]   ;;  %v4502_v16 = vld [vmem:[#allocation7 + $0x94] ss:$12 sps:$4 sm:$0xff]   ;;  %v4506_v19 = vld [vmem:[#allocation7 + $0xac] ss:$12 sps:$4 sm:$0xff]  }
  0x50   :  { %4080 = vmatpush3.bf16.msra.mxu0 %v4485_v2  ;;  %v4501_v17 = vld [vmem:[#allocation7 + $0x80] ss:$12 sps:$4 sm:$0xff]   ;;  %v4504_v18 = vld [vmem:[#allocation7 + $0x90] ss:$12 sps:$4 sm:$0xff]   ;;  %v4505_v20 = vld [vmem:[#allocation7 + $0x98] ss:$12 sps:$4 sm:$0xff]  }
  0x51   :  { %4085 = vmatprep.subr.bf16.mxu0 %v4866_v0  ;;  %v4508_v21 = vld [vmem:[#allocation7 + $0xa8] ss:$12 sps:$4 sm:$0xff]   ;;  %v4510_v22 = vld [vmem:[#allocation7 + $0xc4] ss:$12 sps:$4 sm:$0xff]   ;;  %v4512_v24 = vld [vmem:[#allocation7 + $0xc0] ss:$12 sps:$4 sm:$0xff]  }
  0x52   :  { %330 = vmatpush1.bf16.msra.mxu1 %v4492_v9  ;;  %v4509_v23 = vld [vmem:[#allocation7 + $0xb0] ss:$12 sps:$4 sm:$0xff]   ;;  %v4513_v25 = vld [vmem:[#allocation7 + $0xc8] ss:$12 sps:$4 sm:$0xff]   ;;  %v4516_v27 = vld [vmem:[#allocation7 + $0xd8] ss:$12 sps:$4 sm:$0xff]  }
  0x53   :  { %4082 = vmatmul.mubr.msk.bf16.vlgmr.msra.gmra.mrb[0].mxu0 %vm90_vm1, %v72_v6  ;;  %331 = vmatprep.subr.bf16.mxu1 %v4494_v10  ;;  %v4514_v26 = vld [vmem:[#allocation7 + $0xdc] ss:$12 sps:$4 sm:$0xff]   ;;  %v4517_v28 = vld [vmem:[#allocation7 + $0xe0] ss:$12 sps:$4 sm:$0xff]   ;;  %v4868_v29 = vmov 0   ;;  %v4978_v39 = vshrl.u32 %v137_v38, 7 }
  0x54   :  { %4086 = vmatpush3.bf16.msra.mxu0 %v4489_v7  ;;  %4101 = vmatprep.mubr.msk.bf16.mxu0 %vm4867_vm0, %v4866_v0  ;;  %v77_v30 = vld [vmem:[#allocation8] ss:$0 sm:$0xff]  ;;  %v4968_v32 = vld [vmem:[#allocation5] sm:$0xff]  ;;  %s4869_s3 = smov 96   ;;  %v138_v5 = vand.u32 127, %v137_v38  ;;  %vm4870_vm3 = vmmov 1  }
  0x55   :  { %4087 = vmatprep.subr.bf16.mxu0 %v4866_v0  ;;  %359 = vmatprep.mubr.bf16.mxu1 %v4868_v29  ;;  %v4981_v40 = vsub.s32 0, %v4978_v39  ;;  %v194_v41 = vsub.s32 2, %v4978_v39  ;;  %v182_v42 = vld [vmem:[#allocation8 + $0x1] ss:$8 sm:$0x7]  ;;  %v4985_v43 = vsub.s32 1, %v4978_v39 }
  0x56   :  { %332 = vmatpush1.bf16.msra.mxu1 %v4496_v12  ;;  %vm141_vm2 = vcmp.ge.s32.totalorder %v138_v5, 8  ;;  %v4871_v6 = vmov -1e+30   ;;  %vm477_vm7 = vcmask 130048   ;;  %s4872_s11 = smov 64   ;;  %s4873_s12 = smov 32  }
  0x57   :  { %333 = vmatprep.subr.bf16.mxu1 %v4498_v13  ;;  %v187_v44 = vrot.slane %v182_v42, %v4981_v40  ;;  %v195_v45 = vrot.slane %v182_v42, %v194_v41  ;;  %v191_v48 = vrot.slane %v182_v42, %v4985_v43  ;;  %vm143_vm4 = vmxor %vm4870_vm3, %vm141_vm2  ;;  %vm1764_vm8 = vcmask 1043456   ;;  %s4874_s13 = smov [#allocation10]  }
  0x58   :  { %4088 = vmatpush3.bf16.msra.mxu0 %v4493_v11  ;;  %vm144_vm5 = vmxor %vm141_vm2, %vm4870_vm3  ;;  %vm1748_vm9 = vcmask 64512   ;;  %s3730_s14 = sshll.u32 %s4874_s13, 4  ;;  %s3731_s14 = int_to_ptr.vmem [resolvable:$true] %s3730_s14 }
  0x59   :  { %4089 = vmatprep.subr.bf16.mxu0 %v4866_v0  ;;  %vm145_vm6 = vmxor %vm143_vm4, %vm4870_vm3  ;;  %v5015_v7 = vsel %vm144_vm5, 0.0, %v4871_v6  ;;  %s4828_s15 = scalar_lea.vmem %s3731_s14, 256  ;;  %p4833_p5 = scmp.lt.s32.totalorder %s3731_s14, %s3731_s14 }
  0x5a   :  { %334 = vmatpush1.bf16.msra.mxu1 %v4500_v15  ;;  %v5017_v9 = vsel %vm145_vm6, 0.0, %v4871_v6  ;;  %p4829_p4 = scmp.ne.s32.totalorder %s3731_s14, %s4828_s15  ;;  %p4834_p6 = scmp.lt.s32.totalorder %s4828_s15, %s4828_s15 }
  0x5b   :  { %335 = vmatprep.subr.bf16.mxu1 %v4502_v16 }
  0x5c   :  { %4090 = vmatpush3.bf16.msra.mxu0 %v4497_v14  ;;  %p4835_p7 = por %p4834_p6, %p4833_p5 }
  0x5d   :  { %4091 = vmatprep.subr.bf16.mxu0 %v4866_v0 }
  0x5e   :  { %336 = vmatpush1.bf16.msra.mxu1 %v4504_v18  ;;  %p4836_p8 = pnand %p4835_p7, %p4829_p4 }
  0x5f   :  { %337 = vmatprep.subr.bf16.mxu1 %v4506_v19 }
  0x60   :  { %4092 = vmatpush3.bf16.msra.mxu0 %v4501_v17 }
  0x61   :  { %4093 = vmatprep.subr.bf16.mxu0 %v4866_v0 }
  0x62   :  { %338 = vmatpush1.bf16.msra.mxu1 %v4508_v21 }
  0x63   :  { %339 = vmatprep.subr.bf16.mxu1 %v4510_v22 }
  0x64   :  { %4094 = vmatpush3.bf16.msra.mxu0 %v4505_v20 }
  0x65   :  { %4095 = vmatprep.subr.bf16.mxu0 %v4866_v0 }
  0x66   :  { %340 = vmatpush1.bf16.msra.mxu1 %v4512_v24 }
  0x67   :  { %341 = vmatprep.subr.bf16.mxu1 %v4514_v26 }
  0x68   :  { %4096 = vmatpush3.bf16.msra.mxu0 %v4509_v23 }
  0x69   :  { %4097 = vmatprep.subr.bf16.mxu0 %v4866_v0 }
  0x6a   :  { %342 = vmatpush1.bf16.msra.mxu1 %v4516_v27 }
  0x6b   :  { %4117 = vmatprep.subr.bf16.mxu1 %v4866_v0 }
  0x6c   :  { %4098 = vmatpush3.bf16.msra.mxu0 %v4513_v25 }
  0x6d   :  { %4099 = vmatprep.subr.bf16.mxu0 %v4866_v0 }
  0x70   :  { %4100 = vmatpush3.bf16.msra.mxu0 %v4517_v28 }
  0x71   :  { %4105 = vmatprep.subr.bf16.mxu0 %v4866_v0 }
 0x126   :  { %v128_v31 = vpop.f32.mrb[0].mxu0 }
 0x127   :  { %v4970_v33 = vadd.f32 %v128_v31, %v77_v30  ;;  %v4083_v34 = vpop.f32.mrb[1].mxu0 }
 0x128   :  { %v131_v35 = vpop.f32.mrb[2].mxu0 }
 0x129   :  { %v4084_v36 = vpop.f32.mrb[3].mxu0  ;;  %v148_v37 = vpack.c.bf16 %v4968_v32, %v4970_v33 }
 0x12b   :  { %360 = vmatmul.mubr.bf16.vlgmr.msra.gmra.mrb[0].mxu1 %v148_v37  ;;  %4102 = vmatmul.mubr.bf16.vlgmr.msra.gmra.mrb[4].mxu0 %v148_v37 }
 0x12c   :  { %4107 = vmatprep.mubr.msk.bf16.mxu0 %vm4867_vm0, %v4866_v0  ;;  %4119 = vmatprep.mubr.msk.bf16.mxu1 %vm4867_vm0, %v4866_v0 }
 0x1fe   :  { %v361_v46 = vpop.f32.mrb[0].mxu1  ;;  %v404_v47 = vpop.f32.mrb[4].mxu0 }
 0x1ff   :  { %v363_v49 = vpop.f32.mrb[1].mxu1  ;;  %v4103_v50 = vpop.f32.mrb[5].mxu0  ;;  %v362_v53 = vadd.f32 %v361_v46, %v187_v44  ;;  %v405_v54 = vadd.f32 %v404_v47, %v195_v45 }
 0x200   :  { %v365_v51 = vpop.f32.mrb[2].mxu1  ;;  %v407_v52 = vpop.f32.mrb[6].mxu0  ;;  %v364_v59 = vadd.f32 %v363_v49, %v191_v48 }
 0x201   :  { %v366_v55 = vadd.f32 %v365_v51, %v187_v44  ;;  %v408_v56 = vadd.f32 %v407_v52, %v195_v45  ;;  %v367_v57 = vpop.f32.mrb[3].mxu1  ;;  %v4104_v58 = vpop.f32.mrb[7].mxu0 }
 0x202   :  { %v368_v60 = vadd.f32 %v367_v57, %v191_v48 }
 0x203   :  { %v4991_v61 = vpack.c.bf16 %v366_v55, %v362_v53  ;;  %v4993_v62 = vpack.c.bf16 %v408_v56, %v405_v54 }
 0x204   :  { %v4995_v63 = vpack.c.bf16 %v368_v60, %v364_v59  ;;  %v4520_v59 = vld [vmem:[#allocation7 + $0x120] ss:$12 sps:$4 sm:$0xff]   ;;  %v4521_v60 = vld [vmem:[#allocation7 + $0x138] ss:$12 sps:$4 sm:$0xff]  }
 0x206   :  { %550 = vrot.lane.b32.xlu0 %v4995_v63, %s4869_s3  ;;  %v434_v1 = vsel %vm90_vm1, %v4995_v63, 0 }
 0x207   :  { %4106 = vmatpush3.bf16.xpose.msra.mxu0 %v434_v1 }
 0x208   :  { %4111 = vmatprep.subr.bf16.mxu0 %v4866_v0 }
 0x20a   :  { %547 = vrot.lane.b32.xlu0 %v4991_v61, %s4869_s3 }
 0x20e   :  { %4108 = vmatmul.mubr.msk.bf16.vlgmr.msra.gmra.mrb[8].mxu0 %vm90_vm1, %v4991_v61 }
 0x20f   :  { %4112 = vmatpush3.bf16.msra.mxu0 %v4993_v62  ;;  %4113 = vmatprep.mubr.msk.bf16.mxu0 %vm4867_vm0, %v4866_v0 }
 0x210   :  { %4123 = vmatprep.subr.bf16.mxu0 %v4866_v0 }
 0x278   :  { %v551_v2 = vpop.permute.xlu0 %550 }
 0x279   :  { %v556_v3 = vsel %vm90_vm1, %v551_v2, 0 }
 0x27a   :  { %4118 = vmatpush3.bf16.xpose.msra.mxu1 %v556_v3 }
 0x27b   :  { %4129 = vmatprep.subr.bf16.mxu1 %v4866_v0 }
 0x27c   :  { %v548_v4 = vpop.permute.xlu0 %547 }
 0x281   :  { %4120 = vmatmul.mubr.msk.bf16.vlgmr.msra.gmra.mrb[4].mxu1 %vm90_vm1, %v548_v4 }
 0x282   :  { %4133 = vmatprep.mubr.msk.bf16.mxu1 %vm4867_vm0, %v4866_v0  ;;  %4130 = vmatpush3.bf16.msra.mxu1 %v4520_v59 }
 0x283   :  { %4131 = vmatprep.subr.bf16.mxu1 %v4866_v0 }
 0x286   :  { %4132 = vmatpush3.bf16.msra.mxu1 %v4521_v60 }
 0x287   :  { %4145 = vmatprep.subr.bf16.mxu1 %v4866_v0 }
 0x2e1   :  { %v470_v8 = vpop.f32.mrb[8].mxu0 }
 0x2e2   :  { %v471_v10 = vadd.f32 %v470_v8, %v5015_v7  ;;  %v4109_v11 = vpop.f32.mrb[9].mxu0 }
 0x2e3   :  { %v473_v12 = vpop.f32.mrb[10].mxu0 }
 0x2e4   :  { %v474_v13 = vadd.f32 %v473_v12, %v5017_v9  ;;  %v4110_v14 = vpop.f32.mrb[11].mxu0  ;;  %v478_v15 = vsel %vm477_vm7, %v471_v10, -inf  ;;  %v4519_v12 = vld [vmem:[#allocation7 + $0x108] ss:$12 sps:$4 sm:$0xff]  }
 0x2e5   :  { %479 = vmax.xlane.f32.xlu1 %v478_v15 }
 0x2e6   :  { %v481_v16 = vsel %vm477_vm7, %v474_v13, -inf }
 0x2e9   :  { %482 = vmax.xlane.f32.xlu1 %v481_v16 }
 0x354   :  { %v592_v17 = vpop.f32.mrb[4].mxu1 }
 0x355   :  { %v593_v18 = vadd.f32 %v592_v17, %v5015_v7  ;;  %v4121_v19 = vpop.f32.mrb[5].mxu1 }
 0x356   :  { %v595_v20 = vpop.f32.mrb[6].mxu1 }
 0x357   :  { %v596_v21 = vadd.f32 %v595_v20, %v5017_v9  ;;  %v4122_v22 = vpop.f32.mrb[7].mxu1  ;;  %v599_v23 = vsel %vm477_vm7, %v593_v18, -inf }
 0x358   :  { %600 = vmax.xlane.f32.xlu0 %v599_v23 }
 0x359   :  { %v602_v24 = vsel %vm477_vm7, %v596_v21, -inf }
 0x35a   :  { %603 = vmax.xlane.f32.xlu1 %v602_v24 }
 0x36e   :  { %785 = vrot.lane.b32.xlu0 %v4995_v63, %s4872_s11 }
 0x372   :  { %v480_v25 = vpop.xlane.xlu1 %479 }
 0x373   :  { %v484_v26 = vsub.f32 %v471_v10, %v480_v25  ;;  %v4518_v10 = vld [vmem:[#allocation7 + $0xf0] ss:$12 sps:$4 sm:$0xff]  }
 0x375   :  { %v486_v27 = vmul.f32 1.442695, %v484_v26 }
 0x376   :  { %v483_v28 = vpop.xlane.xlu1 %482 }
 0x377   :  { %4662 = vpow2.f32 %v486_v27  ;;  %v485_v30 = vsub.f32 %v474_v13, %v483_v28 }
 0x379   :  { %v488_v31 = vmul.f32 1.442695, %v485_v30 }
 0x37b   :  { %4664 = vpow2.f32 %v488_v31 }
 0x381   :  { %v4663_v34 = vpop.eup %4662 }
 0x382   :  { %v490_v35 = vsel %vm477_vm7, %v4663_v34, 0.0 }
 0x383   :  { %491 = vadd.xlane.f32.xlu1 %v490_v35 }
 0x385   :  { %v4665_v36 = vpop.eup %4664 }
 0x386   :  { %v493_v37 = vsel %vm477_vm7, %v4665_v36, 0.0 }
 0x387   :  { %494 = vadd.xlane.f32.xlu1 %v493_v37 }
 0x3e5   :  { %v601_v38 = vpop.xlane.xlu0 %600 }
 0x3e6   :  { %v605_v42 = vsub.f32 %v593_v18, %v601_v38 }
 0x3e7   :  { %v604_v44 = vpop.xlane.xlu1 %603 }
 0x3e8   :  { %v607_v45 = vmul.f32 1.442695, %v605_v42  ;;  %v606_v46 = vsub.f32 %v596_v21, %v604_v44 }
 0x3e9   :  { %v786_v20 = vpop.permute.xlu0 %785 }
 0x3ea   :  { %4666 = vpow2.f32 %v607_v45  ;;  %v609_v47 = vmul.f32 1.442695, %v606_v46  ;;  %v791_v24 = vsel %vm90_vm1, %v786_v20, 0 }
 0x3ec   :  { %4668 = vpow2.f32 %v609_v47 }
 0x3f4   :  { %v4667_v48 = vpop.eup %4666 }
 0x3f5   :  { %v611_v49 = vsel %vm477_vm7, %v4667_v48, 0.0 }
 0x3f6   :  { %v4669_v50 = vpop.eup %4668  ;;  %612 = vadd.xlane.f32.xlu1 %v611_v49 }
 0x3f7   :  { %v614_v51 = vsel %vm477_vm7, %v4669_v50, 0.0 }
 0x3fa   :  { %615 = vadd.xlane.f32.xlu1 %v614_v51 }
 0x40b   :  { %623 = vrot.lane.b32.xlu1 %v4993_v62, %s4869_s3 }
 0x40f   :  { %783 = vrot.lane.b32.xlu1 %v4991_v61, %s4872_s11 }
 0x410   :  { %v492_v52 = vpop.xlane.xlu1 %491 }
 0x411   :  { %4670 = vrcp.f32 %v492_v52 }
 0x414   :  { %v495_v53 = vpop.xlane.xlu1 %494 }
 0x415   :  { %4672 = vrcp.f32 %v495_v53 }
 0x41b   :  { %v4671_v54 = vpop.eup %4670 }
 0x41c   :  { %v498_v56 = vmul.f32 %v4671_v54, %v4663_v34 }
 0x41f   :  { %v4673_v55 = vpop.eup %4672 }
 0x420   :  { %v499_v57 = vmul.f32 %v4673_v55, %v4665_v36 }
 0x422   :  { %v500_v58 = vpack.c.bf16 %v499_v57, %v498_v56 }
 0x424   :  { %4114 = vmatmul.mubr.msk.bf16.vlgmr.msra.gmra.mrb[12].mxu0 %vm477_vm7, %v500_v58 }
 0x425   :  { %4125 = vmatprep.mubr.msk.bf16.mxu0 %vm4867_vm0, %v4866_v0 }
 0x483   :  { %v613_v1 = vpop.xlane.xlu1 %612 }
 0x484   :  { %4674 = vrcp.f32 %v613_v1 }
 0x487   :  { %v616_v2 = vpop.xlane.xlu1 %615 }
 0x488   :  { %4676 = vrcp.f32 %v616_v2  ;;  %v4522_v2 = vld [vmem:[#allocation7 + $0x150] ss:$12 sps:$4 sm:$0xff]  }
 0x48b   :  { %v624_v3 = vpop.permute.xlu1 %623 }
 0x48c   :  { %4124 = vmatpush3.bf16.msra.mxu0 %v624_v3 }
 0x48d   :  { %4137 = vmatprep.subr.bf16.mxu0 %v4866_v0 }
 0x48e   :  { %v4675_v4 = vpop.eup %4674 }
 0x48f   :  { %v619_v6 = vmul.f32 %v4675_v4, %v4667_v48  ;;  %v784_v25 = vpop.permute.xlu1 %783 }
 0x492   :  { %v4677_v5 = vpop.eup %4676 }
 0x493   :  { %v620_v8 = vmul.f32 %v4677_v5, %v4669_v50 }
 0x495   :  { %v621_v11 = vpack.c.bf16 %v620_v8, %v619_v6 }
 0x497   :  { %4126 = vmatmul.mubr.msk.bf16.vlgmr.msra.gmra.mrb[16].mxu0 %vm477_vm7, %v621_v11 }
 0x498   :  { %4138 = vmatpush3.bf16.msra.mxu0 %v4518_v10  ;;  %4141 = vmatprep.mubr.msk.bf16.mxu0 %vm4867_vm0, %v4866_v0 }
 0x499   :  { %4139 = vmatprep.subr.bf16.mxu0 %v4866_v0 }
 0x49c   :  { %4140 = vmatpush3.bf16.msra.mxu0 %v4519_v12 }
 0x49d   :  { %4151 = vmatprep.subr.bf16.mxu0 %v4866_v0 }
 0x4f7   :  { %v538_v13 = vpop.f32.mrb[12].mxu0 }
 0x4f8   :  { %v4115_v14 = vpop.f32.mrb[13].mxu0 }
 0x4f9   :  { %v541_v15 = vpop.f32.mrb[14].mxu0 }
 0x4fa   :  { %v545_v16 = vpack.c.bf16 %v541_v15, %v538_v13  ;;  %v4116_v17 = vpop.f32.mrb[15].mxu0 }
 0x4fc   :  { %4142 = vmatmul.mubr.msk.bf16.vlgmr.msra.gmra.mrb[20].mxu0 %vm90_vm1, %v545_v16 }
 0x4fd   :  { %4153 = vmatprep.mubr.msk.bf16.mxu0 %vm4867_vm0, %v4866_v0 }
 0x56a   :  { %v663_v18 = vpop.f32.mrb[16].mxu0 }
 0x56b   :  { %v4127_v19 = vpop.f32.mrb[17].mxu0 }
 0x56c   :  { %v666_v21 = vpop.f32.mrb[18].mxu0 }
 0x56d   :  { %v670_v22 = vpack.c.bf16 %v666_v21, %v663_v18  ;;  %v4128_v23 = vpop.f32.mrb[19].mxu0 }
 0x56f   :  { %4134 = vmatmul.mubr.msk.bf16.vlgmr.msra.gmra.mrb[8].mxu1 %vm90_vm1, %v670_v22 }
 0x570   :  { %4146 = vmatpush3.bf16.xpose.msra.mxu1 %v791_v24  ;;  %4147 = vmatprep.mubr.msk.bf16.mxu1 %vm4867_vm0, %v4866_v0 }
 0x571   :  { %4157 = vmatprep.subr.bf16.mxu1 %v4866_v0 }
 0x577   :  { %4148 = vmatmul.mubr.msk.bf16.vlgmr.msra.gmra.mrb[12].mxu1 %vm90_vm1, %v784_v25 }
 0x578   :  { %4161 = vmatprep.mubr.msk.bf16.mxu1 %vm4867_vm0, %v4866_v0  ;;  %4158 = vmatpush3.bf16.msra.mxu1 %v4522_v2 }
 0x579   :  { %4159 = vmatprep.subr.bf16.mxu1 %v4866_v0 }
 0x5cf   :  { %v776_v26 = vpop.f32.mrb[20].mxu0 }
 0x5d0   :  { %v4143_v27 = vpop.f32.mrb[21].mxu0 }
 0x5d1   :  { %v779_v28 = vpop.f32.mrb[22].mxu0 }
 0x5d2   :  { %v4144_v30 = vpop.f32.mrb[23].mxu0 }
 0x642   :  { %v720_v31 = vpop.f32.mrb[8].mxu1 }
 0x643   :  { %v5059_v34 = vadd.f32 %v776_v26, %v720_v31  ;;  %v4135_v35 = vpop.f32.mrb[9].mxu1 }
 0x644   :  { %v723_v36 = vpop.f32.mrb[10].mxu1 }
 0x645   :  { %v5061_v37 = vadd.f32 %v779_v28, %v723_v36  ;;  %v4136_v38 = vpop.f32.mrb[11].mxu1 }
 0x64a   :  { %v827_v42 = vpop.f32.mrb[12].mxu1 }
 0x64b   :  { %v828_v44 = vadd.f32 %v827_v42, %v5015_v7  ;;  %v4149_v45 = vpop.f32.mrb[13].mxu1 }
 0x64c   :  { %v830_v46 = vpop.f32.mrb[14].mxu1 }
 0x64d   :  { %v831_v47 = vadd.f32 %v830_v46, %v5017_v9  ;;  %v4150_v48 = vpop.f32.mrb[15].mxu1  ;;  %v834_v49 = vsel %vm477_vm7, %v828_v44, -inf }
 0x64e   :  { %835 = vmax.xlane.f32.xlu1 %v834_v49 }
 0x64f   :  { %v837_v50 = vsel %vm477_vm7, %v831_v47, -inf }
 0x650   :  { %838 = vmax.xlane.f32.xlu0 %v837_v50 }
 0x666   :  { %857 = vrot.lane.b32.xlu0 %v4993_v62, %s4872_s11 }
 0x6db   :  { %v836_v51 = vpop.xlane.xlu1 %835 }
 0x6dc   :  { %v840_v52 = vsub.f32 %v828_v44, %v836_v51 }
 0x6dd   :  { %v839_v53 = vpop.xlane.xlu0 %838 }
 0x6de   :  { %v842_v54 = vmul.f32 1.442695, %v840_v52  ;;  %v841_v55 = vsub.f32 %v831_v47, %v839_v53 }
 0x6e0   :  { %4678 = vpow2.f32 %v842_v54  ;;  %v844_v56 = vmul.f32 1.442695, %v841_v55 }
 0x6e1   :  { %v858_v57 = vpop.permute.xlu0 %857 }
 0x6e2   :  { %4680 = vpow2.f32 %v844_v56  ;;  %4152 = vmatpush3.bf16.msra.mxu0 %v858_v57 }
 0x6e3   :  { %4165 = vmatprep.subr.bf16.mxu0 %v4866_v0 }
 0x6ea   :  { %v4679_v58 = vpop.eup %4678 }
 0x6eb   :  { %v846_v59 = vsel %vm477_vm7, %v4679_v58, 0.0 }
 0x6ec   :  { %v4681_v60 = vpop.eup %4680  ;;  %847 = vadd.xlane.f32.xlu1 %v846_v59 }
 0x6ed   :  { %v849_v1 = vsel %vm477_vm7, %v4681_v60, 0.0 }
 0x6f0   :  { %850 = vadd.xlane.f32.xlu1 %v849_v1 }
 0x701   :  { %965 = vrot.lane.b32.xlu1 %v4995_v63, %s4873_s12  ;;  %v4523_v63 = vld [vmem:[#allocation7 + $0x168] ss:$12 sps:$4 sm:$0xff]  }
 0x702   :  { %4160 = vmatpush3.bf16.msra.mxu1 %v4523_v63  ;;  %v4526_v63 = vld [vmem:[#allocation7 + $0x1b0] ss:$12 sps:$4 sm:$0xff]  }
 0x703   :  { %4171 = vmatprep.subr.bf16.mxu1 %v4866_v0 }
 0x705   :  { %963 = vrot.lane.b32.xlu1 %v4991_v61, %s4873_s12 }
 0x779   :  { %v848_v3 = vpop.xlane.xlu1 %847 }
 0x77a   :  { %4682 = vrcp.f32 %v848_v3  ;;  %v1143_v3 = vld [vmem:[#allocation8 + $0x2] ss:$0 sm:$0xff] }
 0x77d   :  { %v851_v4 = vpop.xlane.xlu1 %850 }
 0x77e   :  { %4684 = vrcp.f32 %v851_v4 }
 0x781   :  { %v966_v11 = vpop.permute.xlu1 %965 }
 0x782   :  { %v971_v13 = vsel %vm90_vm1, %v966_v11, 0 }
 0x784   :  { %v4683_v5 = vpop.eup %4682 }
 0x785   :  { %v854_v8 = vmul.f32 %v4683_v5, %v4679_v58  ;;  %v964_v61 = vpop.permute.xlu1 %963 }
 0x788   :  { %v4685_v6 = vpop.eup %4684 }
 0x789   :  { %v855_v10 = vmul.f32 %v4685_v6, %v4681_v60 }
 0x78b   :  { %v856_v12 = vpack.c.bf16 %v855_v10, %v854_v8 }
 0x78d   :  { %4154 = vmatmul.mubr.msk.bf16.vlgmr.msra.gmra.mrb[24].mxu0 %vm477_vm7, %v856_v12 }
 0x78e   :  { %4166 = vmatpush3.bf16.xpose.msra.mxu0 %v971_v13  ;;  %4167 = vmatprep.mubr.msk.bf16.mxu0 %vm4867_vm0, %v4866_v0 }
 0x78f   :  { %4177 = vmatprep.subr.bf16.mxu0 %v4866_v0 }
 0x795   :  { %4168 = vmatmul.mubr.msk.bf16.vlgmr.msra.gmra.mrb[28].mxu0 %vm90_vm1, %v964_v61 }
 0x796   :  { %4181 = vmatprep.mubr.msk.bf16.mxu0 %vm4867_vm0, %v4866_v0 }
 0x860   :  { %v897_v14 = vpop.f32.mrb[24].mxu0 }
 0x861   :  { %v4155_v15 = vpop.f32.mrb[25].mxu0 }
 0x862   :  { %v900_v16 = vpop.f32.mrb[26].mxu0 }
 0x863   :  { %v904_v17 = vpack.c.bf16 %v900_v16, %v897_v14  ;;  %v4156_v18 = vpop.f32.mrb[27].mxu0  ;;  %v4527_v14 = vld [vmem:[#allocation7 + $0x1c8] ss:$12 sps:$4 sm:$0xff]  }
 0x865   :  { %4162 = vmatmul.mubr.msk.bf16.vlgmr.msra.gmra.mrb[16].mxu1 %vm90_vm1, %v904_v17 }
 0x866   :  { %4173 = vmatprep.mubr.msk.bf16.mxu1 %vm4867_vm0, %v4866_v0 }
 0x868   :  { %v1007_v19 = vpop.f32.mrb[28].mxu0 }
 0x869   :  { %v1008_v20 = vadd.f32 %v1007_v19, %v5015_v7  ;;  %v4169_v21 = vpop.f32.mrb[29].mxu0 }
 0x86a   :  { %v1010_v22 = vpop.f32.mrb[30].mxu0 }
 0x86b   :  { %v1011_v23 = vadd.f32 %v1010_v22, %v5017_v9  ;;  %v4170_v24 = vpop.f32.mrb[31].mxu0  ;;  %v1014_v25 = vsel %vm477_vm7, %v1008_v20, -inf }
 0x86c   :  { %1015 = vmax.xlane.f32.xlu0 %v1014_v25  ;;  %v4530_v24 = vld [vmem:[#allocation7 + $0x210] ss:$12 sps:$4 sm:$0xff]   ;;  %v4531_v25 = vld [vmem:[#allocation7 + $0x228] ss:$12 sps:$4 sm:$0xff]  }
 0x86d   :  { %v1017_v26 = vsel %vm477_vm7, %v1011_v23, -inf }
 0x86e   :  { %1018 = vmax.xlane.f32.xlu1 %v1017_v26  ;;  %v4532_v26 = vld [vmem:[#allocation7 + $0x240] ss:$12 sps:$4 sm:$0xff]  }
 0x87f   :  { %1037 = vrot.lane.b32.xlu1 %v4993_v62, %s4873_s12  ;;  %v4524_v62 = vld [vmem:[#allocation7 + $0x180] ss:$12 sps:$4 sm:$0xff]  }
 0x880   :  { %4178 = vmatpush3.bf16.msra.mxu0 %v4524_v62 }
 0x881   :  { %4179 = vmatprep.subr.bf16.mxu0 %v4866_v0 }
 0x8f9   :  { %v1016_v27 = vpop.xlane.xlu0 %1015 }
 0x8fa   :  { %v1020_v28 = vsub.f32 %v1008_v20, %v1016_v27  ;;  %v4533_v27 = vld [vmem:[#allocation7 + $0x258] ss:$12 sps:$4 sm:$0xff]  }
 0x8fb   :  { %v1019_v30 = vpop.xlane.xlu1 %1018 }
 0x8fc   :  { %v1022_v31 = vmul.f32 1.442695, %v1020_v28  ;;  %v1021_v35 = vsub.f32 %v1011_v23, %v1019_v30  ;;  %v4529_v23 = vld [vmem:[#allocation7 + $0x1f8] ss:$12 sps:$4 sm:$0xff]   ;;  %v4536_v28 = vld [vmem:[#allocation7 + $0x334] ss:$12 sps:$4 sm:$0xff]  }
 0x8fd   :  { %v4558_v30 = vld [vmem:[#allocation7 + $0x270] ss:$12 sps:$4 sm:$0xff]  }
 0x8fe   :  { %4686 = vpow2.f32 %v1022_v31  ;;  %v1024_v7 = vmul.f32 1.442695, %v1021_v35  ;;  %v4559_v31 = vld [vmem:[#allocation7 + $0x288] ss:$12 sps:$4 sm:$0xff]   ;;  %v4560_v35 = vld [vmem:[#allocation7 + $0x2a0] ss:$12 sps:$4 sm:$0xff]  }
 0x8ff   :  { %v1038_v36 = vpop.permute.xlu1 %1037 }
 0x900   :  { %4688 = vpow2.f32 %v1024_v7  ;;  %4172 = vmatpush3.bf16.msra.mxu1 %v1038_v36  ;;  %v4561_v7 = vld [vmem:[#allocation7 + $0x2b8] ss:$12 sps:$4 sm:$0xff]   ;;  %v4562_v36 = vld [vmem:[#allocation7 + $0x2d0] ss:$12 sps:$4 sm:$0xff]  }
 0x901   :  { %4185 = vmatprep.subr.bf16.mxu1 %v4866_v0 }
 0x908   :  { %v4687_v9 = vpop.eup %4686 }
 0x909   :  { %v1026_v38 = vsel %vm477_vm7, %v4687_v9, 0.0 }
 0x90a   :  { %v4689_v42 = vpop.eup %4688  ;;  %1027 = vadd.xlane.f32.xlu0 %v1026_v38 }
 0x90b   :  { %v1029_v44 = vsel %vm477_vm7, %v4689_v42, 0.0 }
 0x90e   :  { %1030 = vadd.xlane.f32.xlu0 %v1029_v44 }
 0x938   :  { %v954_v45 = vpop.f32.mrb[16].mxu1 }
 0x939   :  { %v961_v46 = vadd.f32 %v954_v45, %v5059_v34  ;;  %v4163_v47 = vpop.f32.mrb[17].mxu1  ;;  %v4525_v34 = vld [vmem:[#allocation7 + $0x198] ss:$12 sps:$4 sm:$0xff]  }
 0x93a   :  { %v957_v48 = vpop.f32.mrb[18].mxu1  ;;  %4180 = vmatpush3.bf16.msra.mxu0 %v4525_v34 }
 0x93b   :  { %v962_v49 = vadd.f32 %v957_v48, %v5061_v37  ;;  %v4164_v50 = vpop.f32.mrb[19].mxu1  ;;  %4205 = vmatprep.subr.bf16.mxu0 %v4866_v0 }
 0x997   :  { %v1028_v51 = vpop.xlane.xlu0 %1027 }
 0x998   :  { %4690 = vrcp.f32 %v1028_v51 }
 0x99b   :  { %v1031_v52 = vpop.xlane.xlu0 %1030 }
 0x99c   :  { %4692 = vrcp.f32 %v1031_v52 }
 0x9a2   :  { %v4691_v53 = vpop.eup %4690 }
 0x9a3   :  { %v1034_v55 = vmul.f32 %v4691_v53, %v4687_v9  ;;  %v4563_v9 = vld [vmem:[#allocation7 + $0x2e8] ss:$12 sps:$4 sm:$0xff]  }
 0x9a4   :  { %v1174_v53 = vld [vmem:[#allocation8 + $0x4] ss:$0 sm:$0xff] }
 0x9a6   :  { %v4693_v54 = vpop.eup %4692 }
 0x9a7   :  { %v1035_v56 = vmul.f32 %v4693_v54, %v4689_v42 }
 0x9a9   :  { %v1036_v57 = vpack.c.bf16 %v1035_v56, %v1034_v55 }
 0x9ab   :  { %4174 = vmatmul.mubr.msk.bf16.vlgmr.msra.gmra.mrb[20].mxu1 %vm477_vm7, %v1036_v57  ;;  %v4534_v57 = vld [vmem:[#allocation7 + $0x330] ss:$12 sps:$4 sm:$0xff]  }
 0x9ac   :  { %4201 = vmatprep.mubr.msk.bf16.mxu1 %vm4867_vm0, %v4866_v0  ;;  %4186 = vmatpush3.bf16.msra.mxu1 %v4526_v63  ;;  %v4565_v63 = vld [vmem:[#allocation7 + $0x318] ss:$12 sps:$4 sm:$0xff]  }
 0x9ad   :  { %4187 = vmatprep.subr.bf16.mxu1 %v4866_v0 }
 0x9b0   :  { %4188 = vmatpush3.bf16.msra.mxu1 %v4527_v14  ;;  %v1194_v14 = vld [vmem:[#allocation8 + $0x5] ss:$0 sm:$0xff] }
 0x9b1   :  { %4189 = vmatprep.subr.bf16.mxu1 %v4866_v0 }
 0xa7e   :  { %v1077_v37 = vpop.f32.mrb[20].mxu1 }
 0xa7f   :  { %v4175_v58 = vpop.f32.mrb[21].mxu1 }
 0xa80   :  { %v1080_v59 = vpop.f32.mrb[22].mxu1  ;;  %v4537_v58 = vld [vmem:[#allocation7 + $0x348] ss:$12 sps:$4 sm:$0xff]  }
 0xa81   :  { %v1084_v60 = vpack.c.bf16 %v1080_v59, %v1077_v37  ;;  %v4176_v1 = vpop.f32.mrb[23].mxu1  ;;  %v4539_v37 = vld [vmem:[#allocation7 + $0x34c] ss:$12 sps:$4 sm:$0xff]   ;;  %v4542_v59 = vld [vmem:[#allocation7 + $0x364] ss:$12 sps:$4 sm:$0xff]  }
 0xa82   :  { %v4545_v1 = vld [vmem:[#allocation7 + $0x37c] ss:$12 sps:$4 sm:$0xff]  }
 0xa83   :  { %4182 = vmatmul.mubr.msk.bf16.vlgmr.msra.gmra.mrb[32].mxu0 %vm90_vm1, %v1084_v60  ;;  %v4540_v60 = vld [vmem:[#allocation7 + $0x360] ss:$12 sps:$4 sm:$0xff]  }
 0xa84   :  { %4221 = vmatprep.mubr.msk.bf16.mxu0 %vm4867_vm0, %v4866_v0  ;;  %4206 = vmatpush3.bf16.msra.mxu0 %v4558_v30  ;;  %v1457_v30 = vld [vmem:[#allocation8 + $0x19] ss:$8 sm:$0x7] }
 0xa85   :  { %4207 = vmatprep.subr.bf16.mxu0 %v4866_v0 }
 0xa88   :  { %4208 = vmatpush3.bf16.msra.mxu0 %v4559_v31  ;;  %v1462_v31 = vrot.slane %v1457_v30, %v4981_v40 }
 0xa89   :  { %4209 = vmatprep.subr.bf16.mxu0 %v4866_v0 }
 0xa8c   :  { %4210 = vmatpush3.bf16.msra.mxu0 %v4560_v35  ;;  %v1466_v35 = vrot.slane %v1457_v30, %v4985_v43 }
 0xa8d   :  { %4211 = vmatprep.subr.bf16.mxu0 %v4866_v0 }
 0xa90   :  { %4212 = vmatpush3.bf16.msra.mxu0 %v4561_v7  ;;  %v4572_v7 = vld [vmem:[#allocation7 + $0x3c8] ss:$12 sps:$4 sm:$0xff]  }
 0xa91   :  { %4213 = vmatprep.subr.bf16.mxu0 %v4866_v0 }
 0xa94   :  { %4214 = vmatpush3.bf16.msra.mxu0 %v4562_v36 }
 0xa95   :  { %4215 = vmatprep.subr.bf16.mxu0 %v4866_v0 }
 0xa98   :  { %4216 = vmatpush3.bf16.msra.mxu0 %v4563_v9 }
 0xa99   :  { %4217 = vmatprep.subr.bf16.mxu0 %v4866_v0 }
 0xb56   :  { %v1134_v2 = vpop.f32.mrb[32].mxu0 }
 0xb57   :  { %v1141_v4 = vadd.f32 %v1134_v2, %v961_v46  ;;  %v4183_v5 = vpop.f32.mrb[33].mxu0  ;;  %v4543_v2 = vld [vmem:[#allocation7 + $0x378] ss:$12 sps:$4 sm:$0xff]  }
 0xb58   :  { %v1137_v6 = vpop.f32.mrb[34].mxu0  ;;  %v4551_v5 = vld [vmem:[#allocation7 + $0x3ac] ss:$12 sps:$4 sm:$0xff]  }
 0xb59   :  { %v1144_v8 = vadd.f32 %v1143_v3, %v1141_v4  ;;  %v1142_v10 = vadd.f32 %v1137_v6, %v962_v49  ;;  %v4184_v11 = vpop.f32.mrb[35].mxu0  ;;  %v1171_v49 = vld [vmem:[#allocation8 + $0x3] ss:$0 sm:$0xff]  ;;  %v4549_v6 = vld [vmem:[#allocation7 + $0x3a8] ss:$12 sps:$4 sm:$0xff]  }
 0xb5a   :  { %v4546_v4 = vld [vmem:[#allocation7 + $0x390] ss:$12 sps:$4 sm:$0xff]  }
 0xb5b   :  { %v1145_v12 = vadd.f32 %v1143_v3, %v1142_v10  ;;  %v1146_v13 = vadd.f32 %v1144_v8, %v4970_v33  ;;  %v4548_v3 = vld [vmem:[#allocation7 + $0x394] ss:$12 sps:$4 sm:$0xff]   ;;  %v4554_v8 = vld [vmem:[#allocation7 + $0x3c4] ss:$12 sps:$4 sm:$0xff]   ;;  %v4557_v11 = vld [vmem:[#allocation7 + $0x3dc] ss:$12 sps:$4 sm:$0xff]  }
 0xb5c   :  { %v4552_v10 = vld [vmem:[#allocation7 + $0x3c0] ss:$12 sps:$4 sm:$0xff]  }
 0xb5d   :  { %1148 = vadd.xlane.f32.xlu0 %v1146_v13  ;;  %v1147_v61 = vadd.f32 %v1145_v12, %v4968_v32  ;;  %v4528_v32 = vld [vmem:[#allocation7 + $0x1e0] ss:$12 sps:$4 sm:$0xff]   ;;  %v4555_v12 = vld [vmem:[#allocation7 + $0x3d8] ss:$12 sps:$4 sm:$0xff]  }
 0xb5e   :  { %4190 = vmatpush3.bf16.msra.mxu1 %v4528_v32  ;;  %v4566_v32 = vld [vmem:[#allocation7 + $0x338] ss:$12 sps:$4 sm:$0xff]  }
 0xb5f   :  { %4191 = vmatprep.subr.bf16.mxu1 %v4866_v0 }
 0xb61   :  { %1150 = vadd.xlane.f32.xlu0 %v1147_v61 }
 0xb62   :  { %4192 = vmatpush3.bf16.msra.mxu1 %v4529_v23 }
 0xb63   :  { %4193 = vmatprep.subr.bf16.mxu1 %v4866_v0 }
 0xb66   :  { %4194 = vmatpush3.bf16.msra.mxu1 %v4530_v24  ;;  %v4567_v24 = vld [vmem:[#allocation7 + $0x350] ss:$12 sps:$4 sm:$0xff]  }
 0xb67   :  { %4195 = vmatprep.subr.bf16.mxu1 %v4866_v0 }
 0xb6a   :  { %4196 = vmatpush3.bf16.msra.mxu1 %v4531_v25  ;;  %v4568_v25 = vld [vmem:[#allocation7 + $0x368] ss:$12 sps:$4 sm:$0xff]  }
 0xb6b   :  { %4197 = vmatprep.subr.bf16.mxu1 %v4866_v0 }
 0xb6e   :  { %4198 = vmatpush3.bf16.msra.mxu1 %v4532_v26  ;;  %v4569_v26 = vld [vmem:[#allocation7 + $0x380] ss:$12 sps:$4 sm:$0xff]  }
 0xb6f   :  { %4199 = vmatprep.subr.bf16.mxu1 %v4866_v0 }
 0xb72   :  { %4200 = vmatpush3.bf16.msra.mxu1 %v4533_v27  ;;  %v4570_v27 = vld [vmem:[#allocation7 + $0x398] ss:$12 sps:$4 sm:$0xff]  }
 0xb73   :  { %1602 = vmatprep.subr.bf16.mxu1 %v4536_v28  ;;  %v4571_v28 = vld [vmem:[#allocation7 + $0x3b0] ss:$12 sps:$4 sm:$0xff]  }
 0xbea   :  { %v1149_v15 = vpop.xlane.xlu0 %1148 }
 0xbeb   :  { %v1153_v16 = vmul.f32 0.0078125, %v1149_v15 }
 0xbed   :  { %v1155_v17 = vsub.f32 %v1146_v13, %v1153_v16  ;;  %v1423_v13 = vpack.c.bf16 %v4970_v33, %v4970_v33 }
 0xbee   :  { %v1151_v18 = vpop.xlane.xlu0 %1150 }
 0xbef   :  { %v1154_v19 = vmul.f32 0.0078125, %v1151_v18  ;;  %v1157_v20 = vmul.f32 %v1155_v17, %v1155_v17 }
 0xbf1   :  { %v1156_v21 = vsub.f32 %v1147_v61, %v1154_v19  ;;  %1159 = vadd.xlane.f32.xlu0 %v1157_v20  ;;  %v4564_v61 = vld [vmem:[#allocation7 + $0x300] ss:$12 sps:$4 sm:$0xff]  }
 0xbf2   :  { %4218 = vmatpush3.bf16.msra.mxu0 %v4564_v61 }
 0xbf3   :  { %v1158_v22 = vmul.f32 %v1156_v21, %v1156_v21  ;;  %4219 = vmatprep.subr.bf16.mxu0 %v4866_v0 }
 0xbf5   :  { %1161 = vadd.xlane.f32.xlu0 %v1158_v22 }
 0xbf6   :  { %4220 = vmatpush3.bf16.msra.mxu0 %v4565_v63 }
 0xbf7   :  { %4225 = vmatprep.subr.bf16.mxu0 %v4866_v0 }
 0xc7e   :  { %v1160_v38 = vpop.xlane.xlu0 %1159 }
 0xc7f   :  { %v1163_v42 = vmul.f32 0.0078125, %v1160_v38 }
 0xc81   :  { %v1165_v44 = vadd.f32 1e-05, %v1163_v42 }
 0xc82   :  { %v1162_v62 = vpop.xlane.xlu0 %1161 }
 0xc83   :  { %4694 = vrsqrt.f32 %v1165_v44  ;;  %v1164_v45 = vmul.f32 0.0078125, %v1162_v62  ;;  %v4573_v62 = vld [vmem:[#allocation7 + $0x3e0] ss:$12 sps:$4 sm:$0xff]  }
 0xc85   :  { %v1166_v46 = vadd.f32 1e-05, %v1164_v45 }
 0xc87   :  { %4696 = vrsqrt.f32 %v1166_v46 }
 0xc8d   :  { %v4695_v47 = vpop.eup %4694 }
 0xc8e   :  { %v1169_v48 = vmul.f32 %v4695_v47, %v1155_v17 }
 0xc90   :  { %v1172_v52 = vmul.f32 %v1171_v49, %v1169_v48 }
 0xc91   :  { %v4697_v50 = vpop.eup %4696 }
 0xc92   :  { %v1170_v51 = vmul.f32 %v4697_v50, %v1156_v21  ;;  %v5123_v55 = vadd.f32 %v1174_v53, %v1172_v52 }
 0xc94   :  { %v1173_v54 = vmul.f32 %v1171_v49, %v1170_v51 }
 0xc96   :  { %v5125_v56 = vadd.f32 %v1174_v53, %v1173_v54  ;;  %v5173_v54 = vld [vmem:[#allocation8 + $0x6] ss:$0 sm:$0xff] }
 0xc98   :  { %v1177_v34 = vpack.c.bf16 %v5125_v56, %v5123_v55 }
 0xc9a   :  { %4202 = vmatmul.mubr.bf16.vlgmr.msra.gmra.mrb[24].mxu1 %v1177_v34 }
 0xc9b   :  { %1603 = vmatpush1.bf16.msra.mxu1 %v4534_v57  ;;  %1634 = vmatprep.mubr.bf16.mxu1 %v4868_v29 }
 0xc9c   :  { %1604 = vmatprep.subr.bf16.mxu1 %v4539_v37 }
 0xc9f   :  { %1605 = vmatpush1.bf16.msra.mxu1 %v4537_v58  ;;  %v1470_v58 = vrot.slane %v1457_v30, %v194_v41 }
 0xca0   :  { %1606 = vmatprep.subr.bf16.mxu1 %v4542_v59 }
 0xca3   :  { %1607 = vmatpush1.bf16.msra.mxu1 %v4540_v60 }
 0xca4   :  { %1608 = vmatprep.subr.bf16.mxu1 %v4545_v1 }
 0xca7   :  { %1609 = vmatpush1.bf16.msra.mxu1 %v4543_v2 }
 0xca8   :  { %1610 = vmatprep.subr.bf16.mxu1 %v4548_v3 }
 0xcab   :  { %1611 = vmatpush1.bf16.msra.mxu1 %v4546_v4 }
 0xcac   :  { %1612 = vmatprep.subr.bf16.mxu1 %v4551_v5 }
 0xcaf   :  { %1613 = vmatpush1.bf16.msra.mxu1 %v4549_v6 }
 0xcb0   :  { %1614 = vmatprep.subr.bf16.mxu1 %v4554_v8 }
 0xcb3   :  { %1615 = vmatpush1.bf16.msra.mxu1 %v4552_v10 }
 0xcb4   :  { %1616 = vmatprep.subr.bf16.mxu1 %v4557_v11 }
 0xcb7   :  { %1617 = vmatpush1.bf16.msra.mxu1 %v4555_v12 }
 0xcb8   :  { %4245 = vmatprep.subr.bf16.mxu1 %v4866_v0 }
 0xcba   :  { %1635 = vmatmul.mubr.bf16.vlgmr.msra.gmra.mrb[28].mxu1 %v1423_v13 }
 0xcbb   :  { %4247 = vmatprep.mubr.msk.bf16.mxu1 %vm4867_vm0, %v4866_v0 }
 0xd6d   :  { %v1277_v15 = vpop.f32.mrb[24].mxu1 }
 0xd6e   :  { %v1278_v16 = vadd.f32 %v1277_v15, %v1194_v14  ;;  %v4203_v17 = vpop.f32.mrb[25].mxu1 }
 0xd6f   :  { %v1280_v18 = vpop.f32.mrb[26].mxu1 }
 0xd70   :  { %v1281_v19 = vadd.f32 %v1280_v18, %v1194_v14  ;;  %v4204_v20 = vpop.f32.mrb[27].mxu1  ;;  %v1284_v21 = vmax.f32 %v1278_v16, 0.0 }
 0xd72   :  { %v1285_v22 = vmax.f32 %v1281_v19, 0.0 }
 0xd74   :  { %v1286_v23 = vpack.c.bf16 %v1285_v22, %v1284_v21 }
 0xd76   :  { %4222 = vmatmul.mubr.bf16.vlgmr.msra.gmra.mrb[36].mxu0 %v1286_v23 }
 0xd77   :  { %4226 = vmatpush3.bf16.msra.mxu0 %v4566_v32  ;;  %4241 = vmatprep.mubr.msk.bf16.mxu0 %vm4867_vm0, %v4866_v0 }
 0xd78   :  { %4227 = vmatprep.subr.bf16.mxu0 %v4866_v0 }
 0xd7b   :  { %4228 = vmatpush3.bf16.msra.mxu0 %v4567_v24 }
 0xd7c   :  { %4229 = vmatprep.subr.bf16.mxu0 %v4866_v0 }
 0xd7f   :  { %4230 = vmatpush3.bf16.msra.mxu0 %v4568_v25 }
 0xd80   :  { %4231 = vmatprep.subr.bf16.mxu0 %v4866_v0 }
 0xd83   :  { %4232 = vmatpush3.bf16.msra.mxu0 %v4569_v26 }
 0xd84   :  { %4233 = vmatprep.subr.bf16.mxu0 %v4866_v0 }
 0xd87   :  { %4234 = vmatpush3.bf16.msra.mxu0 %v4570_v27  ;;  %v4576_v27 = vld [vmem:[#allocation7 + $0x420] ss:$12 sps:$4 sm:$0xff]  }
 0xd88   :  { %4235 = vmatprep.subr.bf16.mxu0 %v4866_v0 }
 0xd8b   :  { %4236 = vmatpush3.bf16.msra.mxu0 %v4571_v28  ;;  %v4577_v28 = vld [vmem:[#allocation7 + $0x438] ss:$12 sps:$4 sm:$0xff]  }
 0xd8c   :  { %4237 = vmatprep.subr.bf16.mxu0 %v4866_v0 }
 0xd8d   :  { %v1636_v36 = vpop.f32.mrb[28].mxu1 }
 0xd8e   :  { %v1637_v9 = vadd.f32 %v1636_v36, %v1462_v31  ;;  %v1638_v38 = vpop.f32.mrb[29].mxu1 }
 0xd8f   :  { %v1639_v42 = vadd.f32 %v1638_v38, %v1466_v35  ;;  %v1640_v44 = vpop.f32.mrb[30].mxu1  ;;  %4238 = vmatpush3.bf16.msra.mxu0 %v4572_v7 }
 0xd90   :  { %v5147_v45 = vpack.c.bf16 %v1637_v9, %v1637_v9  ;;  %v1641_v46 = vpop.f32.mrb[31].mxu1  ;;  %4239 = vmatprep.subr.bf16.mxu0 %v4866_v0  ;;  %v4574_v9 = vld [vmem:[#allocation7 + $0x3f0] ss:$12 sps:$4 sm:$0xff]  }
 0xd91   :  { %v5150_v47 = vpack.c.bf16 %v1639_v42, %v1639_v42  ;;  %v4575_v42 = vld [vmem:[#allocation7 + $0x408] ss:$12 sps:$4 sm:$0xff]  }
 0xd92   :  { %1810 = vrot.lane.b32.xlu0 %v5147_v45, %s4869_s3 }
 0xd93   :  { %4240 = vmatpush3.bf16.msra.mxu0 %v4573_v62  ;;  %1813 = vrot.lane.b32.xlu1 %v5150_v47, %s4869_s3  ;;  %v1706_v48 = vsel %vm90_vm1, %v5150_v47, 0 }
 0xd94   :  { %4246 = vmatpush3.bf16.xpose.msra.mxu1 %v1706_v48  ;;  %4251 = vmatprep.subr.bf16.mxu0 %v4866_v0 }
 0xd95   :  { %4257 = vmatprep.subr.bf16.mxu1 %v4866_v0 }
 0xd96   :  { %4242 = vmatmul.mubr.bf16.vlgmr.msra.gmra.mrb[40].mxu0 %v1423_v13 }
 0xd97   :  { %4253 = vmatprep.mubr.msk.bf16.mxu0 %vm4867_vm0, %v4866_v0 }
 0xd9b   :  { %4248 = vmatmul.mubr.msk.bf16.vlgmr.msra.gmra.mrb[32].mxu1 %vm90_vm1, %v5147_v45 }
 0xd9c   :  { %4259 = vmatprep.mubr.msk.bf16.mxu1 %vm4867_vm0, %v4866_v0 }
 0xe04   :  { %v1811_v51 = vpop.permute.xlu0 %1810 }
 0xe05   :  { %v1814_v49 = vpop.permute.xlu1 %1813 }
 0xe06   :  { %v1819_v50 = vsel %vm90_vm1, %v1814_v49, 0 }
 0xe07   :  { %4258 = vmatpush3.bf16.xpose.msra.mxu1 %v1819_v50 }
 0xe08   :  { %4269 = vmatprep.subr.bf16.mxu1 %v4866_v0 }
 0xe0e   :  { %4260 = vmatmul.mubr.msk.bf16.vlgmr.msra.gmra.mrb[36].mxu1 %vm90_vm1, %v1811_v51 }
 0xe0f   :  { %4273 = vmatprep.mubr.msk.bf16.mxu1 %vm4867_vm0, %v4866_v0  ;;  %4270 = vmatpush3.bf16.msra.mxu1 %v4576_v27 }
 0xe10   :  { %4271 = vmatprep.subr.bf16.mxu1 %v4866_v0 }
 0xe13   :  { %4272 = vmatpush3.bf16.msra.mxu1 %v4577_v28 }
 0xe14   :  { %4285 = vmatprep.subr.bf16.mxu1 %v4866_v0 }
 0xe49   :  { %v5171_v52 = vpop.f32.mrb[36].mxu0 }
 0xe4a   :  { %v4223_v53 = vpop.f32.mrb[37].mxu0 }
 0xe4b   :  { %v1389_v57 = vpop.f32.mrb[38].mxu0 }
 0xe4c   :  { %v5176_v34 = vadd.f32 %v1389_v57, %v5173_v54  ;;  %v4224_v37 = vpop.f32.mrb[39].mxu0 }
 0xe69   :  { %v1677_v59 = vpop.f32.mrb[40].mxu0 }
 0xe6a   :  { %v1678_v60 = vadd.f32 %v1677_v59, %v1470_v58  ;;  %v4243_v1 = vpop.f32.mrb[41].mxu0 }
 0xe6b   :  { %v1680_v2 = vpop.f32.mrb[42].mxu0 }
 0xe6c   :  { %v5180_v3 = vpack.c.bf16 %v1678_v60, %v1678_v60  ;;  %v4244_v4 = vpop.f32.mrb[43].mxu0 }
 0xe6e   :  { %v1742_v5 = vpop.f32.mrb[32].mxu1  ;;  %v1766_v6 = vsel %vm1764_vm8, %v5180_v3, 0 }
 0xe6f   :  { %v4249_v8 = vpop.f32.mrb[33].mxu1  ;;  %4252 = vmatpush3.bf16.msra.mxu0 %v1766_v6  ;;  %v1749_v10 = vsel %vm1748_vm9, %v1742_v5, -inf }
 0xe70   :  { %1750 = vmax.xlane.f32.xlu1 %v1749_v10  ;;  %v1745_v39 = vpop.f32.mrb[34].mxu1  ;;  %4263 = vmatprep.subr.bf16.mxu0 %v4866_v0 }
 0xe71   :  { %v4250_v41 = vpop.f32.mrb[35].mxu1 }
 0xee1   :  { %v1855_v11 = vpop.f32.mrb[36].mxu1 }
 0xee2   :  { %v4261_v12 = vpop.f32.mrb[37].mxu1  ;;  %v1861_v13 = vsel %vm1748_vm9, %v1855_v11, -inf }
 0xee3   :  { %1862 = vmax.xlane.f32.xlu0 %v1861_v13  ;;  %v1858_v61 = vpop.f32.mrb[38].mxu1 }
 0xee4   :  { %v4262_v63 = vpop.f32.mrb[39].mxu1 }
 0xef9   :  { %2035 = vrot.lane.b32.xlu0 %v5150_v47, %s4872_s11 }
 0xefd   :  { %v1751_v14 = vpop.xlane.xlu1 %1750 }
 0xefe   :  { %v1752_v15 = vsub.f32 %v1742_v5, %v1751_v14 }
 0xf00   :  { %v1753_v16 = vmul.f32 1.442695, %v1752_v15 }
 0xf02   :  { %4698 = vpow2.f32 %v1753_v16 }
 0xf0c   :  { %v4699_v17 = vpop.eup %4698 }
 0xf0d   :  { %v1755_v18 = vsel %vm1748_vm9, %v4699_v17, 0.0 }
 0xf0e   :  { %1756 = vadd.xlane.f32.xlu1 %v1755_v18 }
 0xf70   :  { %v1863_v19 = vpop.xlane.xlu0 %1862 }
 0xf71   :  { %v1864_v20 = vsub.f32 %v1855_v11, %v1863_v19 }
 0xf73   :  { %v1865_v21 = vmul.f32 1.442695, %v1864_v20 }
 0xf74   :  { %v2036_v50 = vpop.permute.xlu0 %2035 }
 0xf75   :  { %4700 = vpow2.f32 %v1865_v21  ;;  %v2041_v58 = vsel %vm90_vm1, %v2036_v50, 0  ;;  %v4578_v21 = vld [vmem:[#allocation7 + $0x450] ss:$12 sps:$4 sm:$0xff]  }
 0xf7f   :  { %v4701_v22 = vpop.eup %4700 }
 0xf80   :  { %v1867_v32 = vsel %vm1748_vm9, %v4701_v22, 0.0 }
 0xf81   :  { %1868 = vadd.xlane.f32.xlu1 %v1867_v32 }
 0xf92   :  { %1874 = vrot.lane.b32.xlu1 %v5180_v3, %s4869_s3 }
 0xf96   :  { %2033 = vrot.lane.b32.xlu1 %v5147_v45, %s4872_s11 }
 0xf9b   :  { %v1757_v23 = vpop.xlane.xlu1 %1756 }
 0xf9c   :  { %4702 = vrcp.f32 %v1757_v23 }
 0xfa6   :  { %v4703_v24 = vpop.eup %4702 }
 0xfa7   :  { %v1759_v25 = vmul.f32 %v4703_v24, %v4699_v17 }
 0xfa9   :  { %v1760_v26 = vpack.c.bf16 %v1759_v25, %v1759_v25 }
 0xfab   :  { %4254 = vmatmul.mubr.msk.bf16.vlgmr.msra.gmra.mrb[44].mxu0 %vm1748_vm9, %v1760_v26  ;;  %v4579_v26 = vld [vmem:[#allocation7 + $0x468] ss:$12 sps:$4 sm:$0xff]  }
 0xfac   :  { %4265 = vmatprep.mubr.msk.bf16.mxu0 %vm4867_vm0, %v4866_v0 }
0x100e   :  { %v1869_v30 = vpop.xlane.xlu1 %1868 }
0x100f   :  { %4704 = vrcp.f32 %v1869_v30 }
0x1012   :  { %v1875_v31 = vpop.permute.xlu1 %1874 }
0x1013   :  { %v1880_v35 = vsel %vm1764_vm8, %v1875_v31, 0 }
0x1014   :  { %4264 = vmatpush3.bf16.msra.mxu0 %v1880_v35 }
0x1015   :  { %4277 = vmatprep.subr.bf16.mxu0 %v4866_v0 }
0x1016   :  { %v2034_v60 = vpop.permute.xlu1 %2033 }
0x1019   :  { %v4705_v7 = vpop.eup %4704 }
0x101a   :  { %v1871_v36 = vmul.f32 %v4705_v7, %v4701_v22  ;;  %v1387_v7 = vadd.f32 %v5171_v52, %v5173_v54  ;;  %v4580_v52 = vld [vmem:[#allocation7 + $0x480] ss:$12 sps:$4 sm:$0xff]  }
0x101c   :  { %v1872_v38 = vpack.c.bf16 %v1871_v36, %v1871_v36 }
0x101e   :  { %4266 = vmatmul.mubr.msk.bf16.vlgmr.msra.gmra.mrb[48].mxu0 %vm1748_vm9, %v1872_v38 }
0x101f   :  { %4278 = vmatpush3.bf16.msra.mxu0 %v4574_v9  ;;  %4281 = vmatprep.mubr.msk.bf16.mxu0 %vm4867_vm0, %v4866_v0 }
0x1020   :  { %4279 = vmatprep.subr.bf16.mxu0 %v4866_v0 }
0x1023   :  { %4280 = vmatpush3.bf16.msra.mxu0 %v4575_v42 }
0x1024   :  { %4291 = vmatprep.subr.bf16.mxu0 %v4866_v0 }
0x107e   :  { %v1802_v44 = vpop.f32.mrb[44].mxu0 }
0x107f   :  { %v1808_v62 = vpack.c.bf16 %v1802_v44, %v1802_v44  ;;  %v4255_v46 = vpop.f32.mrb[45].mxu0 }
0x1080   :  { %v1805_v48 = vpop.f32.mrb[46].mxu0 }
0x1081   :  { %v4256_v49 = vpop.f32.mrb[47].mxu0  ;;  %4282 = vmatmul.mubr.msk.bf16.vlgmr.msra.gmra.mrb[52].mxu0 %vm90_vm1, %v1808_v62  ;;  %v1393_v62 = vadd.f32 %v1387_v7, %v5123_v55  ;;  %v4606_v7 = vld [vmem:[#allocation7 + $0x4b0] ss:$12 sps:$4 sm:$0xff]  }
0x1082   :  { %4293 = vmatprep.mubr.msk.bf16.mxu0 %vm4867_vm0, %v4866_v0 }
0x10f1   :  { %v1916_v51 = vpop.f32.mrb[48].mxu0 }
0x10f2   :  { %v1922_v53 = vpack.c.bf16 %v1916_v51, %v1916_v51  ;;  %v4267_v57 = vpop.f32.mrb[49].mxu0 }
0x10f3   :  { %v1919_v37 = vpop.f32.mrb[50].mxu0 }
0x10f4   :  { %v4268_v59 = vpop.f32.mrb[51].mxu0  ;;  %4274 = vmatmul.mubr.msk.bf16.vlgmr.msra.gmra.mrb[40].mxu1 %vm90_vm1, %v1922_v53 }
0x10f5   :  { %4286 = vmatpush3.bf16.xpose.msra.mxu1 %v2041_v58  ;;  %4287 = vmatprep.mubr.msk.bf16.mxu1 %vm4867_vm0, %v4866_v0 }
0x10f6   :  { %4297 = vmatprep.subr.bf16.mxu1 %v4866_v0 }
0x10fc   :  { %4288 = vmatmul.mubr.msk.bf16.vlgmr.msra.gmra.mrb[44].mxu1 %vm90_vm1, %v2034_v60 }
0x10fd   :  { %4301 = vmatprep.mubr.msk.bf16.mxu1 %vm4867_vm0, %v4866_v0  ;;  %4298 = vmatpush3.bf16.msra.mxu1 %v4578_v21 }
0x10fe   :  { %4299 = vmatprep.subr.bf16.mxu1 %v4866_v0 }
0x1101   :  { %4300 = vmatpush3.bf16.msra.mxu1 %v4579_v26  ;;  %v4594_v26 = vld [vmem:[#allocation7 + $0x5d0] ss:$12 sps:$4 sm:$0xff]  }
0x1102   :  { %4311 = vmatprep.subr.bf16.mxu1 %v4866_v0 }
0x1154   :  { %v2027_v1 = vpop.f32.mrb[52].mxu0 }
0x1155   :  { %v4283_v2 = vpop.f32.mrb[53].mxu0 }
0x1156   :  { %v2030_v4 = vpop.f32.mrb[54].mxu0 }
0x1157   :  { %v4284_v5 = vpop.f32.mrb[55].mxu0  ;;  %v4581_v4 = vld [vmem:[#allocation7 + $0x498] ss:$12 sps:$4 sm:$0xff]  }
0x11c7   :  { %v1972_v6 = vpop.f32.mrb[40].mxu1 }
0x11c8   :  { %v5218_v8 = vadd.f32 %v2027_v1, %v1972_v6  ;;  %v4275_v10 = vpop.f32.mrb[41].mxu1 }
0x11c9   :  { %v1975_v39 = vpop.f32.mrb[42].mxu1 }
0x11ca   :  { %v4276_v41 = vpop.f32.mrb[43].mxu1 }
0x11cb   :  { %v4582_v41 = vld [vmem:[#allocation7 + $0x570] ss:$12 sps:$4 sm:$0xff]  }
0x11cf   :  { %v2077_v11 = vpop.f32.mrb[44].mxu1 }
0x11d0   :  { %v4289_v12 = vpop.f32.mrb[45].mxu1  ;;  %v2083_v13 = vsel %vm1748_vm9, %v2077_v11, -inf }
0x11d1   :  { %2084 = vmax.xlane.f32.xlu1 %v2083_v13  ;;  %v2080_v61 = vpop.f32.mrb[46].mxu1  ;;  %v4587_v12 = vld [vmem:[#allocation7 + $0x58c] ss:$12 sps:$4 sm:$0xff]   ;;  %v4585_v13 = vld [vmem:[#allocation7 + $0x588] ss:$12 sps:$4 sm:$0xff]  }
0x11d2   :  { %v4290_v63 = vpop.f32.mrb[47].mxu1 }
0x11e2   :  { %2095 = vrot.lane.b32.xlu1 %v5180_v3, %s4872_s11 }
0x11e6   :  { %2200 = vrot.lane.b32.xlu1 %v5147_v45, %s4873_s12 }
0x125e   :  { %v2085_v14 = vpop.xlane.xlu1 %2084 }
0x125f   :  { %v2086_v15 = vsub.f32 %v2077_v11, %v2085_v14  ;;  %v4584_v11 = vld [vmem:[#allocation7 + $0x574] ss:$12 sps:$4 sm:$0xff]   ;;  %v2367_v14 = vld [vmem:[#allocation8 + $0x1a] ss:$0 sm:$0xff] }
0x1261   :  { %v2087_v16 = vmul.f32 1.442695, %v2086_v15 }
0x1262   :  { %v2096_v17 = vpop.permute.xlu1 %2095 }
0x1263   :  { %4706 = vpow2.f32 %v2087_v16  ;;  %v2101_v18 = vsel %vm1764_vm8, %v2096_v17, 0 }
0x1264   :  { %4292 = vmatpush3.bf16.msra.mxu0 %v2101_v18 }
0x1265   :  { %4305 = vmatprep.subr.bf16.mxu0 %v4866_v0 }
0x126d   :  { %v4707_v19 = vpop.eup %4706 }
0x126e   :  { %v2089_v20 = vsel %vm1748_vm9, %v4707_v19, 0.0 }
0x126f   :  { %2090 = vadd.xlane.f32.xlu0 %v2089_v20 }
0x1285   :  { %2202 = vrot.lane.b32.xlu0 %v5150_v47, %s4873_s12  ;;  %v2201_v47 = vpop.permute.xlu1 %2200 }
0x12fc   :  { %v2091_v45 = vpop.xlane.xlu0 %2090 }
0x12fd   :  { %4708 = vrcp.f32 %v2091_v45 }
0x1300   :  { %v2203_v23 = vpop.permute.xlu0 %2202 }
0x1301   :  { %v2208_v25 = vsel %vm90_vm1, %v2203_v23, 0  ;;  %v4590_v23 = vld [vmem:[#allocation7 + $0x5a4] ss:$12 sps:$4 sm:$0xff]  }
0x1307   :  { %v4709_v22 = vpop.eup %4708 }
0x1308   :  { %v2093_v32 = vmul.f32 %v4709_v22, %v4707_v19 }
0x130a   :  { %v2094_v24 = vpack.c.bf16 %v2093_v32, %v2093_v32  ;;  %v4588_v32 = vld [vmem:[#allocation7 + $0x5a0] ss:$12 sps:$4 sm:$0xff]  }
0x130c   :  { %4294 = vmatmul.mubr.msk.bf16.vlgmr.msra.gmra.mrb[56].mxu0 %vm1748_vm9, %v2094_v24  ;;  %v4593_v24 = vld [vmem:[#allocation7 + $0x5bc] ss:$12 sps:$4 sm:$0xff]  }
0x130d   :  { %4306 = vmatpush3.bf16.xpose.msra.mxu0 %v2208_v25  ;;  %4307 = vmatprep.mubr.msk.bf16.mxu0 %vm4867_vm0, %v4866_v0  ;;  %v4591_v25 = vld [vmem:[#allocation7 + $0x5b8] ss:$12 sps:$4 sm:$0xff]  }
0x130e   :  { %4317 = vmatprep.subr.bf16.mxu0 %v4866_v0 }
0x1314   :  { %4308 = vmatmul.mubr.msk.bf16.vlgmr.msra.gmra.mrb[60].mxu0 %vm90_vm1, %v2201_v47  ;;  %v4596_v47 = vld [vmem:[#allocation7 + $0x5d4] ss:$12 sps:$4 sm:$0xff]  }
0x1315   :  { %4321 = vmatprep.mubr.msk.bf16.mxu0 %vm4867_vm0, %v4866_v0  ;;  %4318 = vmatpush3.bf16.msra.mxu0 %v4580_v52  ;;  %v4608_v52 = vld [vmem:[#allocation7 + $0x4e0] ss:$12 sps:$4 sm:$0xff]  }
0x1316   :  { %4319 = vmatprep.subr.bf16.mxu0 %v4866_v0 }
0x1319   :  { %4320 = vmatpush3.bf16.msra.mxu0 %v4581_v4 }
0x131a   :  { %2601 = vmatprep.subr.bf16.mxu0 %v4584_v11 }
0x13df   :  { %v2137_v27 = vpop.f32.mrb[56].mxu0 }
0x13e0   :  { %v2143_v28 = vpack.c.bf16 %v2137_v27, %v2137_v27  ;;  %v4295_v30 = vpop.f32.mrb[57].mxu0  ;;  %v4599_v27 = vld [vmem:[#allocation7 + $0x5ec] ss:$12 sps:$4 sm:$0xff]  }
0x13e1   :  { %v2140_v31 = vpop.f32.mrb[58].mxu0  ;;  %v4602_v30 = vld [vmem:[#allocation7 + $0x604] ss:$12 sps:$4 sm:$0xff]  }
0x13e2   :  { %v4296_v35 = vpop.f32.mrb[59].mxu0  ;;  %4302 = vmatmul.mubr.msk.bf16.vlgmr.msra.gmra.mrb[48].mxu1 %vm90_vm1, %v2143_v28  ;;  %v4597_v28 = vld [vmem:[#allocation7 + $0x5e8] ss:$12 sps:$4 sm:$0xff]  }
0x13e3   :  { %4313 = vmatprep.mubr.msk.bf16.mxu1 %vm4867_vm0, %v4866_v0  ;;  %v4605_v31 = vld [vmem:[#allocation7 + $0x61c] ss:$12 sps:$4 sm:$0xff]   ;;  %v4603_v35 = vld [vmem:[#allocation7 + $0x618] ss:$12 sps:$4 sm:$0xff]  }
0x13e7   :  { %v2244_v36 = vpop.f32.mrb[60].mxu0 }
0x13e8   :  { %v4309_v9 = vpop.f32.mrb[61].mxu0  ;;  %v2250_v38 = vsel %vm1748_vm9, %v2244_v36, -inf }
0x13e9   :  { %2251 = vmax.xlane.f32.xlu1 %v2250_v38  ;;  %v2247_v42 = vpop.f32.mrb[62].mxu0 }
0x13ea   :  { %v4310_v44 = vpop.f32.mrb[63].mxu0 }
0x13ed   :  { %1395 = vadd.xlane.f32.xlu1 %v1393_v62 }
0x1476   :  { %v2252_v46 = vpop.xlane.xlu1 %2251 }
0x1477   :  { %v2253_v48 = vsub.f32 %v2244_v36, %v2252_v46  ;;  %v4607_v36 = vld [vmem:[#allocation7 + $0x4c8] ss:$12 sps:$4 sm:$0xff]  }
0x1479   :  { %v2254_v49 = vmul.f32 1.442695, %v2253_v48 }
0x147a   :  { %v1396_v61 = vpop.xlane.xlu1 %1395 }
0x147b   :  { %4710 = vpow2.f32 %v2254_v49  ;;  %v1399_v15 = vmul.f32 0.0078125, %v1396_v61 }
0x147d   :  { %v1401_v21 = vsub.f32 %v1393_v62, %v1399_v15 }
0x147f   :  { %v1403_v22 = vmul.f32 %v1401_v21, %v1401_v21 }
0x1485   :  { %v4711_v50 = vpop.eup %4710 }
0x1486   :  { %v2256_v51 = vsel %vm1748_vm9, %v4711_v50, 0.0 }
0x1487   :  { %2257 = vadd.xlane.f32.xlu0 %v2256_v51 }
0x149d   :  { %2262 = vrot.lane.b32.xlu0 %v5180_v3, %s4873_s12 }
0x14b5   :  { %v2193_v54 = vpop.f32.mrb[48].mxu1 }
0x14b6   :  { %v2199_v53 = vadd.f32 %v2193_v54, %v5218_v8  ;;  %v4303_v55 = vpop.f32.mrb[49].mxu1  ;;  %v5265_v54 = vld [vmem:[#allocation8 + $0x18] ss:$0 sm:$0xff] }
0x14b7   :  { %v2196_v57 = vpop.f32.mrb[50].mxu1 }
0x14b8   :  { %v4304_v37 = vpop.f32.mrb[51].mxu1  ;;  %v4609_v57 = vld [vmem:[#allocation7 + $0x4f8] ss:$12 sps:$4 sm:$0xff]  }
0x1514   :  { %v2258_v58 = vpop.xlane.xlu0 %2257 }
0x1515   :  { %4712 = vrcp.f32 %v2258_v58  ;;  %v4610_v58 = vld [vmem:[#allocation7 + $0x510] ss:$12 sps:$4 sm:$0xff]  }
0x1518   :  { %v2263_v59 = vpop.permute.xlu0 %2262 }
0x1519   :  { %v2268_v60 = vsel %vm1764_vm8, %v2263_v59, 0  ;;  %v4611_v59 = vld [vmem:[#allocation7 + $0x528] ss:$12 sps:$4 sm:$0xff]  }
0x151a   :  { %4312 = vmatpush3.bf16.msra.mxu1 %v2268_v60  ;;  %v4612_v60 = vld [vmem:[#allocation7 + $0x540] ss:$12 sps:$4 sm:$0xff]  }
0x151b   :  { %4325 = vmatprep.subr.bf16.mxu1 %v4866_v0 }
0x151f   :  { %v4713_v1 = vpop.eup %4712 }
0x1520   :  { %v2260_v3 = vmul.f32 %v4713_v1, %v4711_v50  ;;  %v5263_v50 = vld [vmem:[#allocation8 + $0x7] ss:$0 sm:$0xff]  ;;  %v4613_v1 = vld [vmem:[#allocation7 + $0x558] ss:$12 sps:$4 sm:$0xff]  }
0x1522   :  { %v2261_v2 = vpack.c.bf16 %v2260_v3, %v2260_v3 }
0x1524   :  { %4314 = vmatmul.mubr.msk.bf16.vlgmr.msra.gmra.mrb[52].mxu1 %vm1748_vm9, %v2261_v2 }
0x1525   :  { %4341 = vmatprep.mubr.msk.bf16.mxu1 %vm4867_vm0, %v4866_v0  ;;  %4326 = vmatpush3.bf16.msra.mxu1 %v4606_v7 }
0x1526   :  { %4327 = vmatprep.subr.bf16.mxu1 %v4866_v0 }
0x1529   :  { %4328 = vmatpush3.bf16.msra.mxu1 %v4607_v36 }
0x152a   :  { %4329 = vmatprep.subr.bf16.mxu1 %v4866_v0 }
0x152d   :  { %4330 = vmatpush3.bf16.msra.mxu1 %v4608_v52 }
0x152e   :  { %4331 = vmatprep.subr.bf16.mxu1 %v4866_v0 }
0x1531   :  { %4332 = vmatpush3.bf16.msra.mxu1 %v4609_v57 }
0x1532   :  { %4333 = vmatprep.subr.bf16.mxu1 %v4866_v0 }
0x1535   :  { %4334 = vmatpush3.bf16.msra.mxu1 %v4610_v58 }
0x1536   :  { %4335 = vmatprep.subr.bf16.mxu1 %v4866_v0 }
0x1539   :  { %4336 = vmatpush3.bf16.msra.mxu1 %v4611_v59 }
0x153a   :  { %4337 = vmatprep.subr.bf16.mxu1 %v4866_v0 }
0x153d   :  { %4338 = vmatpush3.bf16.msra.mxu1 %v4612_v60 }
0x153e   :  { %4339 = vmatprep.subr.bf16.mxu1 %v4866_v0 }
0x1541   :  { %4340 = vmatpush3.bf16.msra.mxu1 %v4613_v1 }
0x1542   :  { %4345 = vmatprep.subr.bf16.mxu1 %v4866_v0 }
0x15f7   :  { %v2304_v5 = vpop.f32.mrb[52].mxu1 }
0x15f8   :  { %v2310_v6 = vpack.c.bf16 %v2304_v5, %v2304_v5  ;;  %v4315_v8 = vpop.f32.mrb[53].mxu1 }
0x15f9   :  { %v2307_v10 = vpop.f32.mrb[54].mxu1 }
0x15fa   :  { %v4316_v39 = vpop.f32.mrb[55].mxu1  ;;  %4322 = vmatmul.mubr.msk.bf16.vlgmr.msra.gmra.mrb[64].mxu0 %vm90_vm1, %v2310_v6  ;;  %v2381_v6 = vld [vmem:[#allocation8 + $0x1b] ss:$0 sm:$0xff]  ;;  %v2383_v10 = vld [vmem:[#allocation8 + $0x1c] ss:$0 sm:$0xff] }
0x15fb   :  { %2633 = vmatprep.mubr.bf16.mxu0 %v4868_v29  ;;  %2602 = vmatpush1.bf16.msra.mxu0 %v4582_v41 }
0x15fc   :  { %2603 = vmatprep.subr.bf16.mxu0 %v4587_v12  ;;  %v2509_v12 = vld [vmem:[#allocation8 + $0x1e] ss:$8 sm:$0x3] }
0x15fd   :  { %v2518_v61 = vrot.slane %v2509_v12, %v4985_v43 }
0x15ff   :  { %2604 = vmatpush1.bf16.msra.mxu0 %v4585_v13  ;;  %v2514_v13 = vrot.slane %v2509_v12, %v4981_v40 }
0x1600   :  { %2605 = vmatprep.subr.bf16.mxu0 %v4590_v23 }
0x1603   :  { %2606 = vmatpush1.bf16.msra.mxu0 %v4588_v32 }
0x1604   :  { %2607 = vmatprep.subr.bf16.mxu0 %v4593_v24 }
0x1607   :  { %2608 = vmatpush1.bf16.msra.mxu0 %v4591_v25 }
0x1608   :  { %2609 = vmatprep.subr.bf16.mxu0 %v4596_v47 }
0x160b   :  { %2610 = vmatpush1.bf16.msra.mxu0 %v4594_v26 }
0x160c   :  { %2611 = vmatprep.subr.bf16.mxu0 %v4599_v27 }
0x160f   :  { %2612 = vmatpush1.bf16.msra.mxu0 %v4597_v28 }
0x1610   :  { %2613 = vmatprep.subr.bf16.mxu0 %v4602_v30 }
0x16cd   :  { %v2360_v63 = vpop.f32.mrb[64].mxu0 }
0x16ce   :  { %v2366_v16 = vadd.f32 %v2360_v63, %v2199_v53  ;;  %v4323_v17 = vpop.f32.mrb[65].mxu0 }
0x16cf   :  { %v2363_v18 = vpop.f32.mrb[66].mxu0 }
0x16d0   :  { %v2368_v19 = vadd.f32 %v2367_v14, %v2366_v16  ;;  %v4324_v20 = vpop.f32.mrb[67].mxu0 }
0x16d2   :  { %v2369_v45 = vadd.f32 %v2368_v19, %v4970_v33  ;;  %v4600_v33 = vld [vmem:[#allocation7 + $0x600] ss:$12 sps:$4 sm:$0xff]  }
0x16d3   :  { %2614 = vmatpush1.bf16.msra.mxu0 %v4600_v33 }
0x16d4   :  { %2370 = vadd.xlane.f32.xlu1 %v2369_v45  ;;  %2615 = vmatprep.subr.bf16.mxu0 %v4605_v31 }
0x16d7   :  { %2616 = vmatpush1.bf16.msra.mxu0 %v4603_v35 }
0x16d8   :  { %1405 = vadd.xlane.f32.xlu1 %v1403_v22  ;;  %4351 = vmatprep.subr.bf16.mxu0 %v4866_v0  ;;  %v2402_v22 = vld [vmem:[#allocation8 + $0x1d] ss:$0 sm:$0xff] }
0x1761   :  { %v2371_v9 = vpop.xlane.xlu1 %2370 }
0x1762   :  { %v2372_v38 = vmul.f32 0.0078125, %v2371_v9 }
0x1764   :  { %v2373_v42 = vsub.f32 %v2369_v45, %v2372_v38 }
0x1765   :  { %v1406_v44 = vpop.xlane.xlu1 %1405 }
0x1766   :  { %v1409_v62 = vmul.f32 0.0078125, %v1406_v44  ;;  %v2374_v46 = vmul.f32 %v2373_v42, %v2373_v42 }
0x1768   :  { %v1411_v48 = vadd.f32 1e-05, %v1409_v62  ;;  %2375 = vadd.xlane.f32.xlu1 %v2374_v46 }
0x176a   :  { %4714 = vrsqrt.f32 %v1411_v48 }
0x1774   :  { %v4715_v49 = vpop.eup %4714 }
0x1775   :  { %v1415_v51 = vmul.f32 %v4715_v49, %v1401_v21 }
0x1777   :  { %v1418_v53 = vmul.f32 %v5263_v50, %v1415_v51 }
0x1779   :  { %v1421_v55 = vadd.f32 %v5265_v54, %v1418_v53 }
0x177b   :  { %v2491_v37 = vpack.c.bf16 %v1421_v55, %v1421_v55 }
0x177d   :  { %2634 = vmatmul.mubr.bf16.vlgmr.msra.gmra.mrb[68].mxu0 %v2491_v37 }
0x177e   :  { %4353 = vmatprep.mubr.msk.bf16.mxu0 %vm4867_vm0, %v4866_v0 }
0x17f5   :  { %v2376_v3 = vpop.xlane.xlu1 %2375 }
0x17f6   :  { %v2377_v2 = vmul.f32 0.0078125, %v2376_v3 }
0x17f8   :  { %v2378_v4 = vadd.f32 1e-05, %v2377_v2  ;;  %v4616_v2 = vld [vmem:[#allocation7 + $0x660] ss:$12 sps:$4 sm:$0xff]  }
0x17fa   :  { %4716 = vrsqrt.f32 %v2378_v4  ;;  %v4617_v4 = vld [vmem:[#allocation7 + $0x678] ss:$12 sps:$4 sm:$0xff]  }
0x1804   :  { %v4717_v5 = vpop.eup %4716 }
0x1805   :  { %v2380_v8 = vmul.f32 %v4717_v5, %v2373_v42 }
0x1807   :  { %v2382_v39 = vmul.f32 %v2381_v6, %v2380_v8 }
0x1809   :  { %v5277_v41 = vadd.f32 %v2383_v10, %v2382_v39 }
0x180b   :  { %v2385_v11 = vpack.c.bf16 %v5277_v41, %v5277_v41 }
0x180d   :  { %4342 = vmatmul.mubr.bf16.vlgmr.msra.gmra.mrb[56].mxu1 %v2385_v11  ;;  %v4614_v11 = vld [vmem:[#allocation7 + $0x630] ss:$12 sps:$4 sm:$0xff]  }
0x180e   :  { %4347 = vmatprep.mubr.msk.bf16.mxu1 %vm4867_vm0, %v4866_v0 }
0x1850   :  { %v2635_v63 = vpop.f32.mrb[68].mxu0 }
0x1851   :  { %v2636_v14 = vadd.f32 %v2635_v63, %v2514_v13  ;;  %v2637_v15 = vpop.f32.mrb[69].mxu0  ;;  %v4615_v13 = vld [vmem:[#allocation7 + $0x648] ss:$12 sps:$4 sm:$0xff]  }
0x1852   :  { %v2638_v16 = vadd.f32 %v2637_v15, %v2518_v61  ;;  %v2639_v17 = vpop.f32.mrb[70].mxu0 }
0x1853   :  { %v5285_v18 = vpack.c.bf16 %v2636_v14, %v2636_v14  ;;  %v2640_v19 = vpop.f32.mrb[71].mxu0 }
0x1854   :  { %v5287_v20 = vpack.c.bf16 %v2638_v16, %v2638_v16 }
0x1855   :  { %2770 = vrot.lane.b32.xlu1 %v5285_v18, %s4869_s3  ;;  %v2665_v21 = vsel %vm90_vm1, %v5285_v18, 0 }
0x1856   :  { %4346 = vmatpush3.bf16.xpose.msra.mxu1 %v2665_v21  ;;  %v2723_v45 = vsel %vm1764_vm8, %v5287_v20, 0 }
0x1857   :  { %4352 = vmatpush3.bf16.msra.mxu0 %v2723_v45  ;;  %4357 = vmatprep.subr.bf16.mxu1 %v4866_v0 }
0x1858   :  { %4363 = vmatprep.subr.bf16.mxu0 %v4866_v0 }
0x18c7   :  { %v2771_v25 = vpop.permute.xlu1 %2770 }
0x18c8   :  { %v2776_v28 = vsel %vm90_vm1, %v2771_v25, 0 }
0x18e0   :  { %v2485_v32 = vpop.f32.mrb[56].mxu1 }
0x18e1   :  { %v2486_v23 = vadd.f32 %v2485_v32, %v2402_v22  ;;  %v4343_v24 = vpop.f32.mrb[57].mxu1 }
0x18e2   :  { %v2488_v47 = vpop.f32.mrb[58].mxu1 }
0x18e3   :  { %v5297_v26 = vpack.c.bf16 %v2486_v23, %v2486_v23  ;;  %v4344_v27 = vpop.f32.mrb[59].mxu1 }
0x18e5   :  { %2767 = vrot.lane.b32.xlu0 %v5297_v26, %s4869_s3  ;;  %4348 = vmatmul.mubr.msk.bf16.vlgmr.msra.gmra.mrb[60].mxu1 %vm90_vm1, %v5297_v26 }
0x18e6   :  { %4358 = vmatpush3.bf16.xpose.msra.mxu1 %v2776_v28  ;;  %4359 = vmatprep.mubr.msk.bf16.mxu1 %vm4867_vm0, %v4866_v0 }
0x18e7   :  { %4369 = vmatprep.subr.bf16.mxu1 %v4866_v0 }
0x1957   :  { %v2768_v30 = vpop.permute.xlu0 %2767 }
0x1958   :  { %4360 = vmatmul.mubr.msk.bf16.vlgmr.msra.gmra.mrb[64].mxu1 %vm90_vm1, %v2768_v30 }
0x1959   :  { %4373 = vmatprep.mubr.msk.bf16.mxu1 %vm4867_vm0, %v4866_v0  ;;  %4370 = vmatpush3.bf16.msra.mxu1 %v4616_v2 }
0x195a   :  { %4371 = vmatprep.subr.bf16.mxu1 %v4866_v0 }
0x195d   :  { %4372 = vmatpush3.bf16.msra.mxu1 %v4617_v4 }
0x195e   :  { %4385 = vmatprep.subr.bf16.mxu1 %v4866_v0 }
0x19b8   :  { %v2701_v33 = vpop.f32.mrb[60].mxu1 }
0x19b9   :  { %v4349_v31 = vpop.f32.mrb[61].mxu1  ;;  %v2707_v35 = vsel %vm1748_vm9, %v2701_v33, -inf }
0x19ba   :  { %2708 = vmax.xlane.f32.xlu0 %v2707_v35  ;;  %v2704_v7 = vpop.f32.mrb[62].mxu1 }
0x19bb   :  { %v4350_v36 = vpop.f32.mrb[63].mxu1 }
0x1a2b   :  { %v2812_v9 = vpop.f32.mrb[64].mxu1 }
0x1a2c   :  { %v4361_v38 = vpop.f32.mrb[65].mxu1  ;;  %v2818_v42 = vsel %vm1748_vm9, %v2812_v9, -inf }
0x1a2d   :  { %2819 = vmax.xlane.f32.xlu1 %v2818_v42  ;;  %v2815_v44 = vpop.f32.mrb[66].mxu1 }
0x1a2e   :  { %v4362_v62 = vpop.f32.mrb[67].mxu1 }
0x1a3e   :  { %2992 = vrot.lane.b32.xlu1 %v5285_v18, %s4872_s11 }
0x1a47   :  { %v2709_v46 = vpop.xlane.xlu0 %2708 }
0x1a48   :  { %v2710_v48 = vsub.f32 %v2701_v33, %v2709_v46 }
0x1a4a   :  { %v2711_v49 = vmul.f32 1.442695, %v2710_v48 }
0x1a4c   :  { %4718 = vpow2.f32 %v2711_v49 }
0x1a56   :  { %v4719_v51 = vpop.eup %4718 }
0x1a57   :  { %v2713_v52 = vsel %vm1748_vm9, %v4719_v51, 0.0 }
0x1a58   :  { %2714 = vadd.xlane.f32.xlu0 %v2713_v52  ;;  %v4618_v52 = vld [vmem:[#allocation7 + $0x690] ss:$12 sps:$4 sm:$0xff]  }
0x1aba   :  { %v2820_v53 = vpop.xlane.xlu1 %2819 }
0x1abb   :  { %v2821_v55 = vsub.f32 %v2812_v9, %v2820_v53 }
0x1abd   :  { %v2822_v57 = vmul.f32 1.442695, %v2821_v55 }
0x1abe   :  { %v2993_v17 = vpop.permute.xlu1 %2992 }
0x1abf   :  { %4720 = vpow2.f32 %v2822_v57  ;;  %v2998_v32 = vsel %vm90_vm1, %v2993_v17, 0 }
0x1ac9   :  { %v4721_v37 = vpop.eup %4720 }
0x1aca   :  { %v2824_v58 = vsel %vm1748_vm9, %v4721_v37, 0.0 }
0x1acb   :  { %2825 = vadd.xlane.f32.xlu0 %v2824_v58 }
0x1ae1   :  { %2831 = vrot.lane.b32.xlu0 %v5287_v20, %s4869_s3 }
0x1ae5   :  { %v2715_v59 = vpop.xlane.xlu0 %2714  ;;  %2990 = vrot.lane.b32.xlu0 %v5297_v26, %s4872_s11 }
0x1ae6   :  { %4722 = vrcp.f32 %v2715_v59 }
0x1af0   :  { %v4723_v60 = vpop.eup %4722 }
0x1af1   :  { %v2717_v1 = vmul.f32 %v4723_v60, %v4719_v51 }
0x1af3   :  { %v2718_v3 = vpack.c.bf16 %v2717_v1, %v2717_v1  ;;  %v4619_v1 = vld [vmem:[#allocation7 + $0x6a8] ss:$12 sps:$4 sm:$0xff]  }
0x1af5   :  { %4354 = vmatmul.mubr.msk.bf16.vlgmr.msra.gmra.mrb[72].mxu0 %vm1748_vm9, %v2718_v3 }
0x1af6   :  { %4365 = vmatprep.mubr.msk.bf16.mxu0 %vm4867_vm0, %v4866_v0 }
0x1b58   :  { %v2826_v5 = vpop.xlane.xlu0 %2825 }
0x1b59   :  { %4724 = vrcp.f32 %v2826_v5 }
0x1b5c   :  { %v2832_v6 = vpop.permute.xlu0 %2831 }
0x1b5d   :  { %v2837_v8 = vsel %vm1764_vm8, %v2832_v6, 0 }
0x1b5e   :  { %4364 = vmatpush3.bf16.msra.mxu0 %v2837_v8 }
0x1b5f   :  { %4377 = vmatprep.subr.bf16.mxu0 %v4866_v0 }
0x1b60   :  { %v2991_v24 = vpop.permute.xlu0 %2990 }
0x1b63   :  { %v4725_v10 = vpop.eup %4724 }
0x1b64   :  { %v2828_v39 = vmul.f32 %v4725_v10, %v4721_v37 }
0x1b66   :  { %v2829_v12 = vpack.c.bf16 %v2828_v39, %v2828_v39 }
0x1b68   :  { %4366 = vmatmul.mubr.msk.bf16.vlgmr.msra.gmra.mrb[76].mxu0 %vm1748_vm9, %v2829_v12 }
0x1b69   :  { %4378 = vmatpush3.bf16.msra.mxu0 %v4614_v11  ;;  %4381 = vmatprep.mubr.msk.bf16.mxu0 %vm4867_vm0, %v4866_v0 }
0x1b6a   :  { %4379 = vmatprep.subr.bf16.mxu0 %v4866_v0 }
0x1b6d   :  { %4380 = vmatpush3.bf16.msra.mxu0 %v4615_v13 }
0x1b6e   :  { %4391 = vmatprep.subr.bf16.mxu0 %v4866_v0 }
0x1bc8   :  { %v2759_v61 = vpop.f32.mrb[72].mxu0 }
0x1bc9   :  { %v2765_v63 = vpack.c.bf16 %v2759_v61, %v2759_v61  ;;  %v4355_v14 = vpop.f32.mrb[73].mxu0 }
0x1bca   :  { %v2762_v15 = vpop.f32.mrb[74].mxu0 }
0x1bcb   :  { %v4356_v16 = vpop.f32.mrb[75].mxu0  ;;  %4382 = vmatmul.mubr.msk.bf16.vlgmr.msra.gmra.mrb[80].mxu0 %vm90_vm1, %v2765_v63 }
0x1bcc   :  { %4393 = vmatprep.mubr.msk.bf16.mxu0 %vm4867_vm0, %v4866_v0 }
0x1c3b   :  { %v2873_v19 = vpop.f32.mrb[76].mxu0 }
0x1c3c   :  { %v2879_v21 = vpack.c.bf16 %v2873_v19, %v2873_v19  ;;  %v4367_v45 = vpop.f32.mrb[77].mxu0  ;;  %v4620_v19 = vld [vmem:[#allocation7 + $0x6c0] ss:$12 sps:$4 sm:$0xff]  }
0x1c3d   :  { %v2876_v22 = vpop.f32.mrb[78].mxu0 }
0x1c3e   :  { %v4368_v23 = vpop.f32.mrb[79].mxu0  ;;  %4374 = vmatmul.mubr.msk.bf16.vlgmr.msra.gmra.mrb[68].mxu1 %vm90_vm1, %v2879_v21 }
0x1c3f   :  { %4386 = vmatpush3.bf16.xpose.msra.mxu1 %v2998_v32  ;;  %4387 = vmatprep.mubr.msk.bf16.mxu1 %vm4867_vm0, %v4866_v0 }
0x1c40   :  { %4397 = vmatprep.subr.bf16.mxu1 %v4866_v0 }
0x1c46   :  { %4388 = vmatmul.mubr.msk.bf16.vlgmr.msra.gmra.mrb[72].mxu1 %vm90_vm1, %v2991_v24 }
0x1c47   :  { %4401 = vmatprep.mubr.msk.bf16.mxu1 %vm4867_vm0, %v4866_v0  ;;  %4398 = vmatpush3.bf16.msra.mxu1 %v4618_v52 }
0x1c48   :  { %4399 = vmatprep.subr.bf16.mxu1 %v4866_v0 }
0x1c4b   :  { %4400 = vmatpush3.bf16.msra.mxu1 %v4619_v1  ;;  %v4633_v1 = vld [vmem:[#allocation7 + $0x7f8] ss:$12 sps:$4 sm:$0xff]  }
0x1c4c   :  { %4411 = vmatprep.subr.bf16.mxu1 %v4866_v0 }
0x1c9e   :  { %v2984_v25 = vpop.f32.mrb[80].mxu0 }
0x1c9f   :  { %v4383_v47 = vpop.f32.mrb[81].mxu0 }
0x1ca0   :  { %v2987_v27 = vpop.f32.mrb[82].mxu0 }
0x1ca1   :  { %v4384_v28 = vpop.f32.mrb[83].mxu0  ;;  %v4621_v27 = vld [vmem:[#allocation7 + $0x6d8] ss:$12 sps:$4 sm:$0xff]  }
0x1d11   :  { %v2929_v30 = vpop.f32.mrb[68].mxu1 }
0x1d12   :  { %v5343_v33 = vadd.f32 %v2984_v25, %v2929_v30  ;;  %v4375_v31 = vpop.f32.mrb[69].mxu1 }
0x1d13   :  { %v2932_v35 = vpop.f32.mrb[70].mxu1 }
0x1d14   :  { %v4376_v7 = vpop.f32.mrb[71].mxu1 }
0x1d19   :  { %v3034_v36 = vpop.f32.mrb[72].mxu1 }
0x1d1a   :  { %v4389_v9 = vpop.f32.mrb[73].mxu1  ;;  %v3040_v38 = vsel %vm1748_vm9, %v3034_v36, -inf }
0x1d1b   :  { %3041 = vmax.xlane.f32.xlu1 %v3040_v38  ;;  %v3037_v42 = vpop.f32.mrb[74].mxu1 }
0x1d1c   :  { %v4390_v44 = vpop.f32.mrb[75].mxu1 }
0x1d2c   :  { %3159 = vrot.lane.b32.xlu1 %v5285_v18, %s4873_s12 }
0x1d30   :  { %3157 = vrot.lane.b32.xlu1 %v5297_v26, %s4873_s12 }
0x1da8   :  { %v3042_v62 = vpop.xlane.xlu1 %3041 }
0x1da9   :  { %v3043_v46 = vsub.f32 %v3034_v36, %v3042_v62  ;;  %v3324_v36 = vld [vmem:[#allocation8 + $0x1f] ss:$0 sm:$0xff] }
0x1dab   :  { %v3044_v48 = vmul.f32 1.442695, %v3043_v46 }
0x1dac   :  { %v3160_v37 = vpop.permute.xlu1 %3159 }
0x1dad   :  { %4726 = vpow2.f32 %v3044_v48  ;;  %v3165_v59 = vsel %vm90_vm1, %v3160_v37, 0  ;;  %v4622_v48 = vld [vmem:[#allocation7 + $0x6f0] ss:$12 sps:$4 sm:$0xff]   ;;  %v4627_v37 = vld [vmem:[#allocation7 + $0x768] ss:$12 sps:$4 sm:$0xff]  }
0x1db0   :  { %v3158_v60 = vpop.permute.xlu1 %3157 }
0x1db7   :  { %v4727_v49 = vpop.eup %4726 }
0x1db8   :  { %v3046_v51 = vsel %vm1748_vm9, %v4727_v49, 0.0 }
0x1db9   :  { %3047 = vadd.xlane.f32.xlu0 %v3046_v51 }
0x1dcf   :  { %3052 = vrot.lane.b32.xlu0 %v5287_v20, %s4872_s11 }
0x1e46   :  { %v3048_v53 = vpop.xlane.xlu0 %3047 }
0x1e47   :  { %4728 = vrcp.f32 %v3048_v53 }
0x1e4a   :  { %v3053_v18 = vpop.permute.xlu0 %3052 }
0x1e4b   :  { %v3058_v26 = vsel %vm1764_vm8, %v3053_v18, 0 }
0x1e4c   :  { %4392 = vmatpush3.bf16.msra.mxu0 %v3058_v26  ;;  %v5388_v26 = vadd.f32 %v5176_v34, %v5125_v56  ;;  %v4628_v56 = vld [vmem:[#allocation7 + $0x780] ss:$12 sps:$4 sm:$0xff]   ;;  %v4629_v34 = vld [vmem:[#allocation7 + $0x798] ss:$12 sps:$4 sm:$0xff]  }
0x1e4d   :  { %4405 = vmatprep.subr.bf16.mxu0 %v4866_v0 }
0x1e51   :  { %v4729_v55 = vpop.eup %4728 }
0x1e52   :  { %v3050_v57 = vmul.f32 %v4729_v55, %v4727_v49  ;;  %v4623_v49 = vld [vmem:[#allocation7 + $0x708] ss:$12 sps:$4 sm:$0xff]   ;;  %v4625_v55 = vld [vmem:[#allocation7 + $0x738] ss:$12 sps:$4 sm:$0xff]  }
0x1e54   :  { %v3051_v58 = vpack.c.bf16 %v3050_v57, %v3050_v57  ;;  %v4626_v57 = vld [vmem:[#allocation7 + $0x750] ss:$12 sps:$4 sm:$0xff]  }
0x1e56   :  { %4394 = vmatmul.mubr.msk.bf16.vlgmr.msra.gmra.mrb[84].mxu0 %vm1748_vm9, %v3051_v58  ;;  %v4630_v58 = vld [vmem:[#allocation7 + $0x7b0] ss:$12 sps:$4 sm:$0xff]  }
0x1e57   :  { %4406 = vmatpush3.bf16.xpose.msra.mxu0 %v3165_v59  ;;  %4407 = vmatprep.mubr.msk.bf16.mxu0 %vm4867_vm0, %v4866_v0  ;;  %v4631_v59 = vld [vmem:[#allocation7 + $0x7c8] ss:$12 sps:$4 sm:$0xff]  }
0x1e58   :  { %4417 = vmatprep.subr.bf16.mxu0 %v4866_v0 }
0x1e5e   :  { %4408 = vmatmul.mubr.msk.bf16.vlgmr.msra.gmra.mrb[88].mxu0 %vm90_vm1, %v3158_v60  ;;  %v4632_v60 = vld [vmem:[#allocation7 + $0x7e0] ss:$12 sps:$4 sm:$0xff]  }
0x1e5f   :  { %4421 = vmatprep.mubr.msk.bf16.mxu0 %vm4867_vm0, %v4866_v0  ;;  %4418 = vmatpush3.bf16.msra.mxu0 %v4620_v19 }
0x1e60   :  { %4419 = vmatprep.subr.bf16.mxu0 %v4866_v0 }
0x1e63   :  { %4420 = vmatpush3.bf16.msra.mxu0 %v4621_v27 }
0x1e64   :  { %4445 = vmatprep.subr.bf16.mxu0 %v4866_v0 }
0x1f29   :  { %v3094_v3 = vpop.f32.mrb[84].mxu0 }
0x1f2a   :  { %v3100_v2 = vpack.c.bf16 %v3094_v3, %v3094_v3  ;;  %v4395_v4 = vpop.f32.mrb[85].mxu0  ;;  %v4634_v3 = vld [vmem:[#allocation7 + $0x810] ss:$12 sps:$4 sm:$0xff]  }
0x1f2b   :  { %v3097_v5 = vpop.f32.mrb[86].mxu0 }
0x1f2c   :  { %v4396_v6 = vpop.f32.mrb[87].mxu0  ;;  %4402 = vmatmul.mubr.msk.bf16.vlgmr.msra.gmra.mrb[76].mxu1 %vm90_vm1, %v3100_v2  ;;  %v4635_v2 = vld [vmem:[#allocation7 + $0x828] ss:$12 sps:$4 sm:$0xff]  }
0x1f2d   :  { %4413 = vmatprep.mubr.msk.bf16.mxu1 %vm4867_vm0, %v4866_v0 }
0x1f31   :  { %v3201_v8 = vpop.f32.mrb[88].mxu0 }
0x1f32   :  { %v4409_v10 = vpop.f32.mrb[89].mxu0  ;;  %v3207_v39 = vsel %vm1748_vm9, %v3201_v8, -inf }
0x1f33   :  { %3208 = vmax.xlane.f32.xlu0 %v3207_v39  ;;  %v3204_v11 = vpop.f32.mrb[90].mxu0  ;;  %v3338_v10 = vld [vmem:[#allocation8 + $0x30] ss:$0 sm:$0xff] }
0x1f34   :  { %v4410_v12 = vpop.f32.mrb[91].mxu0  ;;  %v3340_v11 = vld [vmem:[#allocation8 + $0x31] ss:$0 sm:$0xff] }
0x1f49   :  { %3219 = vrot.lane.b32.xlu0 %v5287_v20, %s4873_s12 }
0x1fc0   :  { %v3209_v13 = vpop.xlane.xlu0 %3208 }
0x1fc1   :  { %v3210_v61 = vsub.f32 %v3201_v8, %v3209_v13 }
0x1fc3   :  { %v3211_v63 = vmul.f32 1.442695, %v3210_v61 }
0x1fc4   :  { %v3220_v14 = vpop.permute.xlu0 %3219 }
0x1fc5   :  { %4730 = vpow2.f32 %v3211_v63  ;;  %v3225_v15 = vsel %vm1764_vm8, %v3220_v14, 0  ;;  %v4636_v63 = vld [vmem:[#allocation7 + $0x840] ss:$12 sps:$4 sm:$0xff]   ;;  %v4637_v14 = vld [vmem:[#allocation7 + $0x858] ss:$12 sps:$4 sm:$0xff]  }
0x1fc6   :  { %4412 = vmatpush3.bf16.msra.mxu1 %v3225_v15  ;;  %v3359_v15 = vld [vmem:[#allocation8 + $0x32] ss:$0 sm:$0xff] }
0x1fc7   :  { %4425 = vmatprep.subr.bf16.mxu1 %v4866_v0 }
0x1fcf   :  { %v4731_v16 = vpop.eup %4730 }
0x1fd0   :  { %v3213_v17 = vsel %vm1748_vm9, %v4731_v16, 0.0 }
0x1fd1   :  { %3214 = vadd.xlane.f32.xlu1 %v3213_v17 }
0x1fff   :  { %v3150_v21 = vpop.f32.mrb[76].mxu1 }
0x2000   :  { %v3156_v20 = vadd.f32 %v3150_v21, %v5343_v33  ;;  %v4403_v45 = vpop.f32.mrb[77].mxu1 }
0x2001   :  { %v3153_v22 = vpop.f32.mrb[78].mxu1 }
0x2002   :  { %v4404_v32 = vpop.f32.mrb[79].mxu1 }
0x205e   :  { %v3215_v23 = vpop.xlane.xlu1 %3214 }
0x205f   :  { %4732 = vrcp.f32 %v3215_v23  ;;  %v3466_v23 = vld [vmem:[#allocation8 + $0x33] ss:$0 sm:$0xff] }
0x2069   :  { %v4733_v24 = vpop.eup %4732 }
0x206a   :  { %v3217_v25 = vmul.f32 %v4733_v24, %v4731_v16 }
0x206c   :  { %v3218_v47 = vpack.c.bf16 %v3217_v25, %v3217_v25 }
0x206e   :  { %4414 = vmatmul.mubr.msk.bf16.vlgmr.msra.gmra.mrb[80].mxu1 %vm1748_vm9, %v3218_v47 }
0x206f   :  { %4441 = vmatprep.mubr.msk.bf16.mxu1 %vm4867_vm0, %v4866_v0  ;;  %4426 = vmatpush3.bf16.msra.mxu1 %v4622_v48  ;;  %v4649_v48 = vld [vmem:[#allocation7 + $0x8bc] ss:$12 sps:$4 sm:$0xff]  }
0x2070   :  { %4427 = vmatprep.subr.bf16.mxu1 %v4866_v0 }
0x2073   :  { %4428 = vmatpush3.bf16.msra.mxu1 %v4623_v49  ;;  %v4647_v49 = vld [vmem:[#allocation7 + $0x8b8] ss:$12 sps:$4 sm:$0xff]  }
0x2074   :  { %4429 = vmatprep.subr.bf16.mxu1 %v4866_v0 }
0x2141   :  { %v3261_v28 = vpop.f32.mrb[80].mxu1 }
0x2142   :  { %v3267_v30 = vpack.c.bf16 %v3261_v28, %v3261_v28  ;;  %v4415_v33 = vpop.f32.mrb[81].mxu1 }
0x2143   :  { %v3264_v31 = vpop.f32.mrb[82].mxu1 }
0x2144   :  { %v4416_v35 = vpop.f32.mrb[83].mxu1  ;;  %4422 = vmatmul.mubr.msk.bf16.vlgmr.msra.gmra.mrb[92].mxu0 %vm90_vm1, %v3267_v30  ;;  %v4638_v31 = vld [vmem:[#allocation7 + $0x870] ss:$12 sps:$4 sm:$0xff]  }
0x2145   :  { %4461 = vmatprep.mubr.msk.bf16.mxu0 %vm4867_vm0, %v4866_v0  ;;  %4446 = vmatpush3.bf16.msra.mxu0 %v4630_v58  ;;  %v4640_v35 = vld [vmem:[#allocation7 + $0x874] ss:$12 sps:$4 sm:$0xff]  }
0x2146   :  { %4447 = vmatprep.subr.bf16.mxu0 %v4866_v0 }
0x2149   :  { %4448 = vmatpush3.bf16.msra.mxu0 %v4631_v59 }
0x214a   :  { %4449 = vmatprep.subr.bf16.mxu0 %v4866_v0 }
0x214d   :  { %4450 = vmatpush3.bf16.msra.mxu0 %v4632_v60 }
0x214e   :  { %4451 = vmatprep.subr.bf16.mxu0 %v4866_v0 }
0x2151   :  { %4452 = vmatpush3.bf16.msra.mxu0 %v4633_v1 }
0x2152   :  { %4453 = vmatprep.subr.bf16.mxu0 %v4866_v0 }
0x2155   :  { %4454 = vmatpush3.bf16.msra.mxu0 %v4634_v3 }
0x2156   :  { %4455 = vmatprep.subr.bf16.mxu0 %v4866_v0 }
0x2159   :  { %4456 = vmatpush3.bf16.msra.mxu0 %v4635_v2 }
0x215a   :  { %4457 = vmatprep.subr.bf16.mxu0 %v4866_v0 }
0x215d   :  { %4458 = vmatpush3.bf16.msra.mxu0 %v4636_v63 }
0x215e   :  { %4459 = vmatprep.subr.bf16.mxu0 %v4866_v0 }
0x2161   :  { %4460 = vmatpush3.bf16.msra.mxu0 %v4637_v14 }
0x2217   :  { %v3317_v7 = vpop.f32.mrb[92].mxu0 }
0x2218   :  { %v3323_v9 = vadd.f32 %v3317_v7, %v3156_v20  ;;  %v4423_v38 = vpop.f32.mrb[93].mxu0  ;;  %v4643_v7 = vld [vmem:[#allocation7 + $0x88c] ss:$12 sps:$4 sm:$0xff]  }
0x2219   :  { %v3320_v42 = vpop.f32.mrb[94].mxu0  ;;  %v4644_v38 = vld [vmem:[#allocation7 + $0x8a0] ss:$12 sps:$4 sm:$0xff]  }
0x221a   :  { %v3325_v44 = vadd.f32 %v3324_v36, %v3323_v9  ;;  %v4424_v62 = vpop.f32.mrb[95].mxu0  ;;  %v4641_v36 = vld [vmem:[#allocation7 + $0x888] ss:$12 sps:$4 sm:$0xff]   ;;  %v4646_v9 = vld [vmem:[#allocation7 + $0x8a4] ss:$12 sps:$4 sm:$0xff]  }
0x221c   :  { %v3326_v46 = vadd.f32 %v3325_v44, %v5277_v41  ;;  %v4624_v41 = vld [vmem:[#allocation7 + $0x720] ss:$12 sps:$4 sm:$0xff]  }
0x221d   :  { %4430 = vmatpush3.bf16.msra.mxu1 %v4624_v41  ;;  %v4656_v41 = vld [vmem:[#allocation7 + $0x900] ss:$12 sps:$4 sm:$0xff]  }
0x221e   :  { %3327 = vadd.xlane.f32.xlu1 %v3326_v46  ;;  %4431 = vmatprep.subr.bf16.mxu1 %v4866_v0 }
0x2221   :  { %4432 = vmatpush3.bf16.msra.mxu1 %v4625_v55  ;;  %v4661_v55 = vld [vmem:[#allocation7 + $0x91c] ss:$12 sps:$4 sm:$0xff]  }
0x2222   :  { %4433 = vmatprep.subr.bf16.mxu1 %v4866_v0 }
0x2225   :  { %4434 = vmatpush3.bf16.msra.mxu1 %v4626_v57  ;;  %v4659_v57 = vld [vmem:[#allocation7 + $0x918] ss:$12 sps:$4 sm:$0xff]  }
0x2226   :  { %4435 = vmatprep.subr.bf16.mxu1 %v4866_v0 }
0x2229   :  { %4436 = vmatpush3.bf16.msra.mxu1 %v4627_v37 }
0x222a   :  { %4437 = vmatprep.subr.bf16.mxu1 %v4866_v0 }
0x222d   :  { %4438 = vmatpush3.bf16.msra.mxu1 %v4628_v56 }
0x222e   :  { %4439 = vmatprep.subr.bf16.mxu1 %v4866_v0 }
0x2231   :  { %4440 = vmatpush3.bf16.msra.mxu1 %v4629_v34 }
0x2232   :  { %3681 = vmatprep.subr.bf16.mxu1 %v4640_v35 }
0x22ab   :  { %v3328_v51 = vpop.xlane.xlu1 %3327 }
0x22ac   :  { %v3329_v52 = vmul.f32 0.0078125, %v3328_v51  ;;  %v4652_v51 = vld [vmem:[#allocation7 + $0x8d4] ss:$12 sps:$4 sm:$0xff]  }
0x22ae   :  { %v3330_v53 = vsub.f32 %v3326_v46, %v3329_v52  ;;  %v4650_v52 = vld [vmem:[#allocation7 + $0x8d0] ss:$12 sps:$4 sm:$0xff]  }
0x22b0   :  { %v3331_v18 = vmul.f32 %v3330_v53, %v3330_v53 }
0x22b2   :  { %3332 = vadd.xlane.f32.xlu1 %v3331_v18  ;;  %v4653_v18 = vld [vmem:[#allocation7 + $0x8e8] ss:$12 sps:$4 sm:$0xff]  }
0x22b6   :  { %1397 = vadd.xlane.f32.xlu1 %v5388_v26 }
0x233f   :  { %v3333_v4 = vpop.xlane.xlu1 %3332 }
0x2340   :  { %v3334_v5 = vmul.f32 0.0078125, %v3333_v4  ;;  %v3567_v4 = vld [vmem:[#allocation8 + $0x34] ss:$0 sm:$0xff] }
0x2342   :  { %v3335_v6 = vadd.f32 1e-05, %v3334_v5 }
0x2343   :  { %v1398_v32 = vpop.xlane.xlu1 %1397 }
0x2344   :  { %4734 = vrsqrt.f32 %v3335_v6  ;;  %v1400_v24 = vmul.f32 0.0078125, %v1398_v32 }
0x2346   :  { %v1402_v0 = vsub.f32 %v5388_v26, %v1400_v24  ;;  %v4658_v26 = vld [vmem:[#allocation7 + $0x904] ss:$12 sps:$4 sm:$0xff]  }
0x2348   :  { %v1404_v33 = vmul.f32 %v1402_v0, %v1402_v0 }
0x234e   :  { %v4735_v8 = vpop.eup %4734 }
0x234f   :  { %v3337_v39 = vmul.f32 %v4735_v8, %v3330_v53  ;;  %v4655_v53 = vld [vmem:[#allocation7 + $0x8ec] ss:$12 sps:$4 sm:$0xff]   ;;  %v3569_v8 = vld [vmem:[#allocation8 + $0x35] ss:$0 sm:$0xff] }
0x2351   :  { %v3339_v12 = vmul.f32 %v3338_v10, %v3337_v39 }
0x2353   :  { %v3341_v13 = vadd.f32 %v3340_v11, %v3339_v12 }
0x2355   :  { %v3342_v61 = vpack.c.bf16 %v3341_v13, %v3341_v13 }
0x2357   :  { %4442 = vmatmul.mubr.bf16.vlgmr.msra.gmra.mrb[84].mxu1 %v3342_v61 }
0x2358   :  { %3713 = vmatprep.mubr.bf16.mxu1 %v4868_v29  ;;  %3682 = vmatpush1.bf16.msra.mxu1 %v4638_v31 }
0x2359   :  { %3683 = vmatprep.subr.bf16.mxu1 %v4643_v7 }
0x235c   :  { %3684 = vmatpush1.bf16.msra.mxu1 %v4641_v36 }
0x235d   :  { %3685 = vmatprep.subr.bf16.mxu1 %v4646_v9 }
0x2360   :  { %3686 = vmatpush1.bf16.msra.mxu1 %v4644_v38 }
0x2361   :  { %3687 = vmatprep.subr.bf16.mxu1 %v4649_v48 }
0x2364   :  { %3688 = vmatpush1.bf16.msra.mxu1 %v4647_v49 }
0x2365   :  { %3689 = vmatprep.subr.bf16.mxu1 %v4652_v51 }
0x2368   :  { %3690 = vmatpush1.bf16.msra.mxu1 %v4650_v52 }
0x2369   :  { %3691 = vmatprep.subr.bf16.mxu1 %v4655_v53 }
0x236c   :  { %3692 = vmatpush1.bf16.msra.mxu1 %v4653_v18 }
0x236d   :  { %3693 = vmatprep.subr.bf16.mxu1 %v4658_v26 }
0x2370   :  { %3694 = vmatpush1.bf16.msra.mxu1 %v4656_v41 }
0x2371   :  { %3695 = vmatprep.subr.bf16.mxu1 %v4661_v55 }
0x2374   :  { %3696 = vmatpush1.bf16.msra.mxu1 %v4659_v57 }
0x242a   :  { %v3442_v16 = vpop.f32.mrb[84].mxu1 }
0x242b   :  { %v3443_v17 = vadd.f32 %v3442_v16, %v3359_v15  ;;  %v4443_v19 = vpop.f32.mrb[85].mxu1 }
0x242c   :  { %v3445_v21 = vpop.f32.mrb[86].mxu1 }
0x242d   :  { %v3448_v20 = vmax.f32 %v3443_v17, 0.0  ;;  %v4444_v45 = vpop.f32.mrb[87].mxu1 }
0x242f   :  { %v3449_v22 = vpack.c.bf16 %v3448_v20, %v3448_v20 }
0x2431   :  { %4462 = vmatmul.mubr.bf16.vlgmr.msra.gmra.mrb[96].mxu0 %v3449_v22 }
0x2504   :  { %v3549_v25 = vpop.f32.mrb[96].mxu0 }
0x2505   :  { %v3550_v29 = vadd.f32 %v3549_v25, %v3466_v23  ;;  %v4463_v47 = vpop.f32.mrb[97].mxu0 }
0x2506   :  { %v3552_v27 = vpop.f32.mrb[98].mxu0 }
0x2507   :  { %v4464_v28 = vpop.f32.mrb[99].mxu0  ;;  %v3555_v30 = vadd.f32 %v3550_v29, %v3341_v13  ;;  %v3589_v13 = vld [vmem:[#allocation8 + $0x36] ss:$8 sm:$0x3] }
0x2508   :  { %v3594_v61 = vrot.slane %v3589_v13, %v4981_v40  ;;  %v3598_v14 = vrot.slane %v3589_v13, %v4985_v43 }
0x2509   :  { %3556 = vadd.xlane.f32.xlu1 %v3555_v30 }
0x250d   :  { %1407 = vadd.xlane.f32.xlu1 %v1404_v33 }
0x2596   :  { %v3557_v42 = vpop.xlane.xlu1 %3556 }
0x2597   :  { %v3558_v44 = vmul.f32 0.0078125, %v3557_v42 }
0x2599   :  { %v3559_v62 = vsub.f32 %v3555_v30, %v3558_v44 }
0x259a   :  { %v1408_v37 = vpop.xlane.xlu1 %1407 }
0x259b   :  { %v3560_v46 = vmul.f32 %v3559_v62, %v3559_v62  ;;  %v1410_v56 = vmul.f32 0.0078125, %v1408_v37 }
0x259d   :  { %3561 = vadd.xlane.f32.xlu0 %v3560_v46  ;;  %v1412_v34 = vadd.f32 1e-05, %v1410_v56 }
0x259f   :  { %4736 = vrsqrt.f32 %v1412_v34 }
0x25a9   :  { %v4737_v1 = vpop.eup %4736 }
0x25aa   :  { %v1416_v3 = vmul.f32 %v4737_v1, %v1402_v0 }
0x25ac   :  { %v1419_v6 = vmul.f32 %v5263_v50, %v1416_v3 }
0x25ae   :  { %v1422_v39 = vadd.f32 %v5265_v54, %v1419_v6 }
0x262a   :  { %v3562_v58 = vpop.xlane.xlu0 %3561 }
0x262b   :  { %v3563_v59 = vmul.f32 0.0078125, %v3562_v58 }
0x262d   :  { %v3564_v60 = vadd.f32 1e-05, %v3563_v59 }
0x262f   :  { %4738 = vrsqrt.f32 %v3564_v60 }
0x2639   :  { %v4739_v2 = vpop.eup %4738 }
0x263a   :  { %v3566_v5 = vmul.f32 %v4739_v2, %v3559_v62 }
0x263c   :  { %v3568_v10 = vmul.f32 %v3567_v4, %v3566_v5 }
0x263e   :  { %v3570_v11 = vadd.f32 %v3569_v8, %v3568_v10 }
0x2640   :  { %v3571_v12 = vpack.c.bf16 %v3570_v11, %v1422_v39 }
0x2642   :  { %3714 = vmatmul.mubr.bf16.vlgmr.msra.gmra.mrb[88].mxu1 %v3571_v12 }
0x2715   :  { %v3715_v63 = vpop.f32.mrb[88].mxu1 }
0x2716   :  { %v3716_v15 = vadd.f32 %v3715_v63, %v3594_v61  ;;  %v3717_v16 = vpop.f32.mrb[89].mxu1 }
0x2717   :  { %v3718_v17 = vpop.f32.mrb[90].mxu1 }
0x2718   :  { %3722 = vst [vmem:[#allocation10] sm:$0xff] %v3716_v15  ;;  %v3719_v50 = vpop.f32.mrb[91].mxu1 }
0x2719   :  { %v3720_v19 = vadd.f32 %v3719_v50, %v3598_v14 }
0x271b   :  { %3724 = vst [vmem:[#allocation10 + $0x8] sm:$0xff] %v3720_v19 }
0x271c   :  { %4839 = shalt.err (!%p4836_p8)
}
0x271d   :  { %s4840_s19 = scalar_lea.hbm %s5425_s4, 256 }
0x271e   :  { %p4841_p9 = scmp.ne.s32.totalorder %s5425_s4, %s4840_s19  ;;  %p4844_p10 = scmp.lt.u32.totalorder %s4840_s19, %s5425_s4 }
0x2720   :  { %p4846_p11 = pnand %p4844_p10, %p4841_p9 }
0x2722   :  { %4849 = shalt.err (!%p4846_p11)
}
0x2723   :  { %s4875_s18 = smov 128   ;;  %s4876_s23 = smov 8  }
0x2724   :  { %3736 = dma.vmem_to_hbm [thread:$0]  %s3731_s14, 256, %s5425_s4, [#allocation4], %s4875_s18, %s4875_s18, %s4876_s23  }
0x2725   :  { %4856 = dma.done.wait [#allocation4], 256  }
0x2726   :  { %4857 = vsyncadd [#allocation4], 4294967040 }
0x2727   :  { %3740 = vsyncpa [#allocation3], 1 }
0x2728   :  { %3741 = vsyncpa [#allocation6], 1 }
0x2729   :  { %3742 = vsyncpa [#allocation9], 1 }
0x272a   :  { %3743 = vsyncpa [#allocation4], 1 }

</bundles_post_ra>
